<compile_context>
chip_gen: v7x
topology: tpu7x:2x2x1
jax: 0.10.0
libtpu: 0.0.40
codegen_flags: <defaults>
</compile_context>

<pallas_src>
from functools import partial

import jax
import jax.numpy as jnp
from jax.experimental import pallas as pl
from jax.experimental.pallas import tpu as pltpu

BF16 = jnp.bfloat16
F32 = jnp.float32


# ----------------------------------------------------------------------------- utilities

def _round_up(x, m):
    return (x + m - 1) // m * m


def _cp(n_par=1):
    return pltpu.CompilerParams(
        dimension_semantics=("parallel",) * n_par,
        vmem_limit_bytes=48 * 1024 * 1024,
    )


# ----------------------------------------------------------------------------- Pallas kernels

def _linear_kernel(x_ref, w_ref, b_ref, o_ref, *, act):
    # bf16 x / w -> MXU, f32 accumulate; bias + activation fused in the epilogue.
    acc = jnp.dot(x_ref[...], w_ref[...], preferred_element_type=jnp.float32)
    acc = acc + b_ref[...]
    if act == "relu":
        acc = jnp.maximum(acc, 0.0)
    elif act == "leaky_relu":
        acc = jnp.where(acc >= 0.0, acc, 0.01 * acc)
    elif act == "sigmoid":
        acc = jax.nn.sigmoid(acc)
    elif act == "tanh":
        acc = jnp.tanh(acc)
    elif act == "swish":
        acc = acc * jax.nn.sigmoid(acc)
    elif act == "glu":
        h = o_ref.shape[-1]
        acc = acc[:, :h] * jax.nn.sigmoid(acc[:, h:])
    o_ref[...] = acc.astype(o_ref.dtype)


@partial(jax.jit, static_argnames=("act",))
def pallas_linear(x2, w, b, act="none"):
    """y = act(x2 @ w + b); x2 (M,K) bf16, w (K,N) bf16, b (N,) f32.  No K/N padding:
    full-extent blocks; only M is rounded up when tiled."""
    M, K = x2.shape
    N = w.shape[1]
    n_out = N // 2 if act == "glu" else N
    tm = 512
    if M <= tm:
        Mp = _round_up(M, 8)
        tm = Mp
    else:
        Mp = _round_up(M, tm)
    xp = x2 if Mp == M else jnp.pad(x2, ((0, Mp - M), (0, 0)))
    out = pl.pallas_call(
        partial(_linear_kernel, act=act),
        out_shape=jax.ShapeDtypeStruct((Mp, n_out), BF16),
        grid=(Mp // tm,),
        in_specs=[
            pl.BlockSpec((tm, K), lambda i: (i, 0)),
            pl.BlockSpec((K, N), lambda i: (0, 0)),
            pl.BlockSpec((1, N), lambda i: (0, 0)),
        ],
        out_specs=pl.BlockSpec((tm, n_out), lambda i: (i, 0)),
        compiler_params=_cp(1),
    )(xp, w, b.reshape(1, N))
    return out if Mp == M else out[:M]


def _conv3x3_kernel(x_ref, w_ref, b_ref, o_ref, *, R, Wp, relu):
    # x_ref: (1, (H+3)*Wp, Cin) flattened padded slab; w_ref: (9, Cin, Cout);
    # the 9 taps become contiguous row-slices of the flattened slab -> 9 MXU matmuls.
    cout = o_ref.shape[-1]
    acc = jnp.zeros((R, cout), jnp.float32)
    for di in range(3):
        for dj in range(3):
            base = di * Wp + dj
            acc = acc + jnp.dot(x_ref[0, base:base + R, :], w_ref[di * 3 + dj],
                                preferred_element_type=jnp.float32)
    acc = acc + b_ref[...]
    if relu:
        acc = jnp.maximum(acc, 0.0)
    o_ref[0] = acc.astype(o_ref.dtype)


@partial(jax.jit, static_argnames=("stride_w", "relu"))
def conv3x3(x, w9, b, *, stride_w=1, relu=True):
    """3x3 conv, pad 1, stride 1 over time; freq stride handled by subsampling the output.
    x (N,H,W,Cin) bf16, w9 (9,Cin,Cout) bf16 (BN folded), b (Cout,) f32."""
    # TODO(synk): for very long time axes, additionally tile the time dimension.
    N, H, W, Cin = x.shape
    Cout = w9.shape[-1]
    Wp = W + 3
    xp = jnp.pad(x, ((0, 0), (1, 2), (1, 2), (0, 0))).reshape(N, (H + 3) * Wp, Cin)
    R = H * Wp
    out = pl.pallas_call(
        partial(_conv3x3_kernel, R=R, Wp=Wp, relu=relu),
        out_shape=jax.ShapeDtypeStruct((N, R, Cout), BF16),
        grid=(N,),
        in_specs=[
            pl.BlockSpec((1, (H + 3) * Wp, Cin), lambda i: (i, 0, 0)),
            pl.BlockSpec((9, Cin, Cout), lambda i: (0, 0, 0)),
            pl.BlockSpec((1, Cout), lambda i: (0, 0)),
        ],
        out_specs=pl.BlockSpec((1, R, Cout), lambda i: (i, 0, 0)),
        compiler_params=_cp(1),
    )(xp, w9, b.reshape(1, Cout))
    y = out.reshape(N, H, Wp, Cout)[:, :, :W, :]
    if stride_w != 1:
        y = y[:, :, ::stride_w, :]
    return y


def _ln_kernel(x_ref, g_ref, b_ref, o_ref):
    x = x_ref[...].astype(jnp.float32)
    mu = jnp.mean(x, axis=-1, keepdims=True)
    xc = x - mu
    var = jnp.mean(xc * xc, axis=-1, keepdims=True)
    y = xc * jax.lax.rsqrt(var + 1e-5) * g_ref[...] + b_ref[...]
    o_ref[...] = y.astype(o_ref.dtype)


@jax.jit
def pallas_layernorm2d(x2, g, b):
    M, D = x2.shape
    tm = 256
    if M <= tm:
        Mp = _round_up(M, 8)
        tm = Mp
    else:
        Mp = _round_up(M, tm)
    xp = x2 if Mp == M else jnp.pad(x2, ((0, Mp - M), (0, 0)))
    out = pl.pallas_call(
        _ln_kernel,
        out_shape=jax.ShapeDtypeStruct((Mp, D), BF16),
        grid=(Mp // tm,),
        in_specs=[
            pl.BlockSpec((tm, D), lambda i: (i, 0)),
            pl.BlockSpec((1, D), lambda i: (0, 0)),
            pl.BlockSpec((1, D), lambda i: (0, 0)),
        ],
        out_specs=pl.BlockSpec((tm, D), lambda i: (i, 0)),
        compiler_params=_cp(1),
    )(xp, g.reshape(1, D), b.reshape(1, D))
    return out if Mp == M else out[:M]


def _attn_kernel(q_ref, k_ref, v_ref, bias_ref, o_ref, *, scale):
    q = q_ref[...]            # (Hb, n, d) bf16
    k = k_ref[...]
    v = v_ref[...]
    dots = jnp.einsum("hqd,hkd->hqk", q, k, preferred_element_type=jnp.float32)
    dots = dots * scale + bias_ref[...]
    m = jnp.max(dots, axis=-1, keepdims=True)
    p = jnp.exp(dots - m)
    l = jnp.sum(p, axis=-1, keepdims=True)
    p = p * pl.reciprocal(l, approx=True)
    o = jnp.einsum("hqk,hkd->hqd", p.astype(v.dtype), v, preferred_element_type=jnp.float32)
    o_ref[...] = o.astype(o_ref.dtype)


@partial(jax.jit, static_argnames=("scale",))
def pallas_attention(q, k, v, bias, scale):
    """q/k/v (B*H, n, d) bf16, bias (B*H, n, n) f32 (rel-pos, already scaled)."""
    BH, n, d = q.shape
    hb = 8 if BH % 8 == 0 else 1       # batch several heads per grid step
    return pl.pallas_call(
        partial(_attn_kernel, scale=scale),
        out_shape=jax.ShapeDtypeStruct((BH, n, d), BF16),
        grid=(BH // hb,),
        in_specs=[
            pl.BlockSpec((hb, n, d), lambda i: (i, 0, 0)),
            pl.BlockSpec((hb, n, d), lambda i: (i, 0, 0)),
            pl.BlockSpec((hb, n, d), lambda i: (i, 0, 0)),
            pl.BlockSpec((hb, n, n), lambda i: (i, 0, 0)),
        ],
        out_specs=pl.BlockSpec((hb, n, d), lambda i: (i, 0, 0)),
        compiler_params=_cp(1),
    )(q, k, v, bias)


def _dwconv_kernel(x_ref, w_ref, b_ref, o_ref, *, n, ksize):
    # eval BatchNorm already folded into w/b; Swish fused in epilogue.
    acc = x_ref[0, 0:n, :].astype(jnp.float32) * w_ref[0, :]
    for t in range(1, ksize):
        acc = acc + x_ref[0, t:t + n, :].astype(jnp.float32) * w_ref[t, :]
    acc = acc + b_ref[...]
    acc = acc * jax.nn.sigmoid(acc)
    o_ref[0] = acc.astype(o_ref.dtype)


@jax.jit
def pallas_dwconv1d(x, w, b):
    """Depthwise 1-D conv over time, 'same' padding, fused BN+Swish.  x (B,n,C) bf16."""
    B, n, C = x.shape
    ksize = w.shape[0]
    pad = ksize // 2
    xp = jnp.pad(x, ((0, 0), (pad, ksize - 1 - pad), (0, 0)))
    return pl.pallas_call(
        partial(_dwconv_kernel, n=n, ksize=ksize),
        out_shape=jax.ShapeDtypeStruct((B, n, C), BF16),
        grid=(B,),
        in_specs=[
            pl.BlockSpec((1, n + ksize - 1, C), lambda i: (i, 0, 0)),
            pl.BlockSpec((ksize, C), lambda i: (0, 0)),
            pl.BlockSpec((1, C), lambda i: (0, 0)),
        ],
        out_specs=pl.BlockSpec((1, n, C), lambda i: (i, 0, 0)),
        compiler_params=_cp(1),
    )(xp, w, b.reshape(1, C))


# ----------------------------------------------------------------------------- thin JAX helpers

def linear(x, w, b=None, act="none"):
    K, N = w.shape
    if b is None:
        b = jnp.zeros((N,), F32)
    shp = x.shape
    y = pallas_linear(x.reshape(-1, K).astype(BF16), w, b, act=act)
    return y.reshape(shp[:-1] + (y.shape[-1],))


def layernorm(x, g, b):
    shp = x.shape
    return pallas_layernorm2d(x.reshape(-1, shp[-1]).astype(BF16), g, b).reshape(shp)


def avg_pool_t(z, k=5):
    B, T, C = z.shape
    zz = z[:, :(T // k) * k, :].reshape(B, T // k, k, C).astype(F32)
    return zz.mean(axis=2).astype(BF16)


def max_pool_t(z, k=5):
    B, T, C = z.shape
    return z[:, :(T // k) * k, :].reshape(B, T // k, k, C).max(axis=2)


# ----------------------------------------------------------------------------- ResNet (nopool, freq-only strides)

RESNET_CFG = [(64, 64, 1), (64, 64, 1), (64, 128, 2), (128, 128, 1),
              (128, 256, 2), (256, 256, 1), (256, 256, 2), (256, 256, 1)]


def basic_block_fwd(p, x, stride_w):
    out = conv3x3(x, p["conv1_w"], p["conv1_b"], stride_w=stride_w, relu=True)
    out = conv3x3(out, p["conv2_w"], p["conv2_b"], stride_w=1, relu=False)
    if "down_w" in p:
        xs = x[:, :, ::stride_w, :] if stride_w != 1 else x
        idt = linear(xs, p["down_w"], p["down_b"])
    else:
        idt = x
    return jnp.maximum(out + idt, 0).astype(BF16)


def resnet_forward(p, x_nchw):
    x = jnp.transpose(x_nchw, (0, 2, 3, 1)).astype(BF16)   # NCHW -> NHWC (time, freq)
    x = conv3x3(x, p["stem_w"], p["stem_b"], stride_w=1, relu=True)
    for bp, (_, _, s) in zip(p["blocks"], RESNET_CFG):
        x = basic_block_fwd(bp, x, s)
    return x  # (N, T, Wf, 256)


# ----------------------------------------------------------------------------- Conformer block (lucidrains-style, eval)

HEADS = 8
DIM_HEAD = 32
MAX_POS_EMB = 512


def _ff(p, x):
    h = layernorm(x, p["ln_g"], p["ln_b"])
    h = linear(h, p["w1"], p["b1"], act="swish")
    return linear(h, p["w2"], p["b2"])


def _rel_pos_bias(qh, rel_emb, scale):
    """Shaw rel-pos bias via q @ rel_emb^T MXU matmul + skew (no (n,n,d) tensor)."""
    BH, n, d = qh.shape
    P = MAX_POS_EMB
    rel_idx = jnp.clip((n - 1) - jnp.arange(2 * n - 1), -P, P) + P        # column c <-> i-j
    rel_slice = rel_emb[rel_idx].astype(BF16)                             # (2n-1, d)
    s = jnp.einsum("bnd,rd->bnr", qh, rel_slice,
                   preferred_element_type=jnp.float32)                    # (BH, n, 2n-1)
    s = jnp.pad(s, ((0, 0), (0, 0), (0, 1))).reshape(BH, 2 * n * n)
    s = jax.lax.slice_in_dim(s, n - 1, n - 1 + n * (2 * n - 1), axis=1)
    pos = s.reshape(BH, n, 2 * n - 1)[:, :, :n]                           # pos[i,j] = <q_i, rel(i-j)>
    return pos * scale


def _mhsa(p, x):
    B, n, _ = x.shape
    h = layernorm(x, p["ln_g"], p["ln_b"])
    q = linear(h, p["q_w"])                 # bias=False
    kv = linear(h, p["kv_w"])               # bias=False
    inner = HEADS * DIM_HEAD
    k, v = kv[..., :inner], kv[..., inner:]

    def split_heads(z):
        return z.reshape(B, n, HEADS, DIM_HEAD).transpose(0, 2, 1, 3).reshape(B * HEADS, n, DIM_HEAD)

    qh, kh, vh = split_heads(q), split_heads(k), split_heads(v)
    scale = float(DIM_HEAD) ** -0.5
    bias = _rel_pos_bias(qh, p["rel_emb"], scale)          # (B*H, n, n) f32
    o = pallas_attention(qh, kh, vh, bias, scale)
    o = o.reshape(B, HEADS, n, DIM_HEAD).transpose(0, 2, 1, 3).reshape(B, n, inner)
    return linear(o, p["out_w"], p["out_b"])


def _conv_module(p, x):
    h = layernorm(x, p["ln_g"], p["ln_b"])
    h = linear(h, p["pw1_w"], p["pw1_b"], act="glu")        # pointwise conv + fused GLU
    h = pallas_dwconv1d(h, p["dw_w"], p["dw_b"])            # depthwise k=7, fused BN + Swish
    return linear(h, p["pw2_w"], p["pw2_b"])                # pointwise conv back to dim


def conformer_block(p, x):
    x = x + 0.5 * _ff(p["ff1"], x)
    x = x + _mhsa(p["attn"], x)
    x = x + _conv_module(p["conv"], x)
    x = x + 0.5 * _ff(p["ff2"], x)
    return layernorm(x, p["post_g"], p["post_b"])


# ----------------------------------------------------------------------------- AudioVisualAttentionNetwork_weight

def av_attention(p, audio, visual):
    a = linear(audio, p["a1_w"], p["a1_b"], act="leaky_relu")
    a = linear(a, p["a2_w"], p["a2_b"])
    v = linear(visual, p["v1_w"], p["v1_b"], act="leaky_relu")
    v = linear(v, p["v2_w"], p["v2_b"])
    av = jnp.tanh(a.astype(F32) + v.astype(F32)).astype(BF16)
    return linear(av, p["wc_w"], p["wc_b"], act="sigmoid")


# ----------------------------------------------------------------------------- full model forward

def model_forward(params, x, vx_res):
    a_N, a_C, a_T, a_F = x.shape
    feat = resnet_forward(params["resnet"], x)            # (N, T, Wf, C) bf16
    N, T, Wf, C = feat.shape
    # torch: permute(0,2,1,3).reshape(N, T, C*W)
    audio_outputs = jnp.transpose(feat, (0, 1, 3, 2)).reshape(N, T, C * Wf)

    N_av, frame_num, C_av, W_av = vx_res.shape
    vx_r = vx_res.reshape(N_av, frame_num, C_av * W_av).astype(BF16)

    ap1 = avg_pool_t(audio_outputs)
    vx_1 = av_attention(params["cma_m"], ap1, vx_r)
    vx_1 = linear(vx_1, params["proj_v"]["w"], params["proj_v"]["b"])
    ao_1 = linear(audio_outputs, params["proj_a"]["w"], params["proj_a"]["b"])
    for bp in params["conf_a1"]:
        ao_1 = conformer_block(bp, ao_1)
    for bp in params["conf_v1"]:
        vx_1 = conformer_block(bp, vx_1)

    ap2 = avg_pool_t(ao_1)
    vx_2 = av_attention(params["cma_l1"], ap2, vx_1)
    ao_2 = ao_1
    for bp in params["conf_a2"]:
        ao_2 = conformer_block(bp, ao_2)
    for bp in params["conf_v2"]:
        vx_2 = conformer_block(bp, vx_2)

    ap3 = avg_pool_t(ao_2)
    vx_3 = av_attention(params["cma_l2"], ap3, vx_2)
    ao_3 = ao_2
    for bp in params["conf_a3"]:
        ao_3 = conformer_block(bp, ao_3)
    for bp in params["conf_v3"]:
        vx_3 = conformer_block(bp, vx_3)

    ap4 = avg_pool_t(ao_3)
    vx_4 = av_attention(params["cma_l3"], ap4, vx_3)
    rep = a_T // frame_num
    vx_5 = jnp.broadcast_to(vx_4[:, :, None, :], (a_N, frame_num, rep, C)).reshape(a_N, a_T, C)

    conf = vx_5 + ao_3
    for bp in params["conf_final"]:
        conf = conformer_block(bp, conf)

    out = max_pool_t(conf)
    sed = linear(out, params["sed1"]["w"], params["sed1"]["b"], act="leaky_relu")
    sed = linear(sed, params["sed2"]["w"], params["sed2"]["b"], act="sigmoid")
    coord = linear(out, params["co1"]["w"], params["co1"]["b"])
    coord = linear(coord, params["co2"]["w"], params["co2"]["b"])
    return jnp.concatenate([sed, coord], axis=-1).astype(F32)


# ----------------------------------------------------------------------------- deterministic parameter init
# Eval BatchNorm is folded offline into the adjacent conv/linear weights (w' = w*s, b' = b*s + t).

class ParamGen:
    def __init__(self, seed):
        self._key = jax.random.PRNGKey(seed)

    def normal(self, shape, scale=0.05):
        self._key, k = jax.random.split(self._key)
        return scale * jax.random.normal(k, shape, F32)


def init_bn_fold(pg, c):
    gamma = 1.0 + pg.normal((c,), 0.02)
    beta = pg.normal((c,), 0.02)
    s = gamma / jnp.sqrt(1.0 + 1e-5)      # running_mean=0, running_var=1
    return s, beta


def init_conv_bn(pg, cin, cout):
    w = pg.normal((9, cin, cout))
    s, t = init_bn_fold(pg, cout)
    return (w * s).astype(BF16), t.astype(F32)


def init_basic_block(pg, cin, cout, stride):
    p = {}
    p["conv1_w"], p["conv1_b"] = init_conv_bn(pg, cin, cout)
    p["conv2_w"], p["conv2_b"] = init_conv_bn(pg, cout, cout)
    if stride != 1 or cin != cout:
        w = pg.normal((cin, cout))
        s, t = init_bn_fold(pg, cout)
        p["down_w"] = (w * s).astype(BF16)
        p["down_b"] = t.astype(F32)
    return p


def init_resnet(pg, in_ch):
    p = {}
    p["stem_w"], p["stem_b"] = init_conv_bn(pg, in_ch, 64)
    p["blocks"] = [init_basic_block(pg, cin, cout, s) for cin, cout, s in RESNET_CFG]
    return p


def init_linear(pg, din, dout):
    return {"w": pg.normal((din, dout)).astype(BF16), "b": pg.normal((dout,), 0.01)}


def init_ff(pg, dim, mult):
    return {"ln_g": jnp.ones((dim,), F32), "ln_b": jnp.zeros((dim,), F32),
            "w1": pg.normal((dim, dim * mult)).astype(BF16), "b1": pg.normal((dim * mult,), 0.01),
            "w2": pg.normal((dim * mult, dim)).astype(BF16), "b2": pg.normal((dim,), 0.01)}


def init_attn(pg, dim):
    inner = HEADS * DIM_HEAD
    return {"ln_g": jnp.ones((dim,), F32), "ln_b": jnp.zeros((dim,), F32),
            "q_w": pg.normal((dim, inner)).astype(BF16),
            "kv_w": pg.normal((dim, inner * 2)).astype(BF16),
            "out_w": pg.normal((inner, dim)).astype(BF16), "out_b": pg.normal((dim,), 0.01),
            "rel_emb": pg.normal((2 * MAX_POS_EMB + 1, DIM_HEAD), 0.02)}


def init_convmod(pg, dim, expansion, ksize):
    inner = dim * expansion
    s, t = init_bn_fold(pg, inner)
    dw_w = pg.normal((ksize, inner))
    dw_b = pg.normal((inner,), 0.01)
    return {"ln_g": jnp.ones((dim,), F32), "ln_b": jnp.zeros((dim,), F32),
            "pw1_w": pg.normal((dim, inner * 2)).astype(BF16), "pw1_b": pg.normal((inner * 2,), 0.01),
            "dw_w": (dw_w * s).astype(F32), "dw_b": (dw_b * s + t).astype(F32),
            "pw2_w": pg.normal((inner, dim)).astype(BF16), "pw2_b": pg.normal((dim,), 0.01)}


def init_conformer_block(pg, dim=256, ff_mult=2, expansion=2, ksize=7):
    return {"ff1": init_ff(pg, dim, ff_mult), "attn": init_attn(pg, dim),
            "conv": init_convmod(pg, dim, expansion, ksize), "ff2": init_ff(pg, dim, ff_mult),
            "post_g": jnp.ones((dim,), F32), "post_b": jnp.zeros((dim,), F32)}


def init_av(pg, a_dim, v_dim, att_dim):
    return {"a1_w": pg.normal((a_dim, a_dim)).astype(BF16), "a1_b": pg.normal((a_dim,), 0.01),
            "a2_w": pg.normal((a_dim, att_dim)).astype(BF16), "a2_b": pg.normal((att_dim,), 0.01),
            "v1_w": pg.normal((v_dim, v_dim)).astype(BF16), "v1_b": pg.normal((v_dim,), 0.01),
            "v2_w": pg.normal((v_dim, att_dim)).astype(BF16), "v2_b": pg.normal((att_dim,), 0.01),
            "wc_w": pg.normal((att_dim, att_dim)).astype(BF16), "wc_b": pg.normal((att_dim,), 0.01)}


def init_model(in_channel, seed=1234):
    pg = ParamGen(seed)
    params = {
        "resnet": init_resnet(pg, in_channel),
        "cma_m": init_av(pg, 512, 49, 49),
        "cma_l1": init_av(pg, 256, 256, 256),
        "cma_l2": init_av(pg, 256, 256, 256),
        "cma_l3": init_av(pg, 256, 256, 256),
        "proj_a": init_linear(pg, 512, 256),
        "proj_v": init_linear(pg, 49, 256),
        "sed1": init_linear(pg, 256, 256),
        "sed2": init_linear(pg, 256, 13),
        "co1": init_linear(pg, 256, 256),
        "co2": init_linear(pg, 256, 39),
    }
    for name in ("conf_a1", "conf_a2", "conf_a3", "conf_v1", "conf_v2", "conf_v3", "conf_final"):
        params[name] = [init_conformer_block(pg) for _ in range(2)]
    return params


# ----------------------------------------------------------------------------- main

if __name__ == "__main__":
    # Shape-consistent example: a_T divisible by 5 and by frame_num, a_T // 5 == frame_num,
    # a_F reduces to width 2 through the 3 stride-2 freq stages (256*2 = 512 = audio dim).
    batch, in_channel, a_T, a_F = 2, 4, 40, 16
    frame_num = 8
    key = jax.random.PRNGKey(0)
    kx, kv = jax.random.split(key)
    x = jax.random.normal(kx, (batch, in_channel, a_T, a_F), F32)       # NCHW audio spectrogram
    vx_res = jax.random.normal(kv, (batch, frame_num, 7, 7), F32)       # (N, frames, 7, 7) visual maps

    params = init_model(in_channel)
    pred = model_forward(params, x, vx_res)
    pred = jax.block_until_ready(pred)
    assert pred.shape == (batch, a_T // 5, 52), pred.shape
    print("KERNEL_OK")
</pallas_src>

<mosaic_0001>
module attributes {stable_mosaic.version = 11 : i64} {
  func.func @_conv3x3_kernel(%arg0: i32, %arg1: memref<1x817x4xbf16, #tpu.memory_space<vmem>>, %arg2: memref<9x4x64xbf16, #tpu.memory_space<vmem>>, %arg3: memref<1x64xf32, #tpu.memory_space<vmem>>, %arg4: memref<1x760x64xbf16, #tpu.memory_space<vmem>>) attributes {dimension_semantics = [#tpu.dimension_semantics<parallel>], iteration_bounds = array<i64: 2>, scalar_prefetch = 0 : i64, scratch_operands = 0 : i64, tpu.core_type = #tpu.core_type<tc>, window_params = [{transform_indices = @transform_0, window_bounds = array<i64: 1, 817, 4>}, {pipeline_mode = #tpu.pipeline_mode<synchronous>, transform_indices = @transform_1, window_bounds = array<i64: 9, 4, 64>}, {pipeline_mode = #tpu.pipeline_mode<synchronous>, transform_indices = @transform_2, window_bounds = array<i64: 1, 64>}, {transform_indices = @transform_3, window_bounds = array<i64: 1, 760, 64>}]} {
    %cst = arith.constant 0.000000e+00 : f32
    %0 = vector.broadcast %cst : f32 to vector<760x64xf32>
    %c0 = arith.constant 0 : index
    %c0_0 = arith.constant 0 : index
    %c0_1 = arith.constant 0 : index
    %1 = vector.load %arg1[%c0, %c0_0, %c0_1] : memref<1x817x4xbf16, #tpu.memory_space<vmem>>, vector<1x760x4xbf16>
    %2 = vector.shape_cast %1 : vector<1x760x4xbf16> to vector<760x4xbf16>
    %c0_2 = arith.constant 0 : index
    %c0_3 = arith.constant 0 : index
    %c0_4 = arith.constant 0 : index
    %3 = vector.load %arg2[%c0_2, %c0_3, %c0_4] : memref<9x4x64xbf16, #tpu.memory_space<vmem>>, vector<1x4x64xbf16>
    %4 = vector.shape_cast %3 : vector<1x4x64xbf16> to vector<4x64xbf16>
    %cst_5 = arith.constant dense<0.000000e+00> : vector<760x64xf32>
    %5 = tpu.matmul %2, %4, %cst_5 {dimension_numbers = #tpu.dot_dimension_numbers<[1], [0], [0], [1], [0, 0, 1, 1], [], []>} : vector<760x4xbf16>, vector<4x64xbf16>, vector<760x64xf32> -> vector<760x64xf32>
    %6 = arith.addf %0, %5 : vector<760x64xf32>
    %c0_6 = arith.constant 0 : index
    %c1 = arith.constant 1 : index
    %c0_7 = arith.constant 0 : index
    %7 = vector.load %arg1[%c0_6, %c1, %c0_7] : memref<1x817x4xbf16, #tpu.memory_space<vmem>>, vector<1x760x4xbf16>
    %8 = vector.shape_cast %7 : vector<1x760x4xbf16> to vector<760x4xbf16>
    %c1_8 = arith.constant 1 : index
    %c0_9 = arith.constant 0 : index
    %c0_10 = arith.constant 0 : index
    %9 = vector.load %arg2[%c1_8, %c0_9, %c0_10] : memref<9x4x64xbf16, #tpu.memory_space<vmem>>, vector<1x4x64xbf16>
    %10 = vector.shape_cast %9 : vector<1x4x64xbf16> to vector<4x64xbf16>
    %cst_11 = arith.constant dense<0.000000e+00> : vector<760x64xf32>
    %11 = tpu.matmul %8, %10, %cst_11 {dimension_numbers = #tpu.dot_dimension_numbers<[1], [0], [0], [1], [0, 0, 1, 1], [], []>} : vector<760x4xbf16>, vector<4x64xbf16>, vector<760x64xf32> -> vector<760x64xf32>
    %12 = arith.addf %6, %11 : vector<760x64xf32>
    %c0_12 = arith.constant 0 : index
    %c2 = arith.constant 2 : index
    %c0_13 = arith.constant 0 : index
    %13 = vector.load %arg1[%c0_12, %c2, %c0_13] : memref<1x817x4xbf16, #tpu.memory_space<vmem>>, vector<1x760x4xbf16>
    %14 = vector.shape_cast %13 : vector<1x760x4xbf16> to vector<760x4xbf16>
    %c2_14 = arith.constant 2 : index
    %c0_15 = arith.constant 0 : index
    %c0_16 = arith.constant 0 : index
    %15 = vector.load %arg2[%c2_14, %c0_15, %c0_16] : memref<9x4x64xbf16, #tpu.memory_space<vmem>>, vector<1x4x64xbf16>
    %16 = vector.shape_cast %15 : vector<1x4x64xbf16> to vector<4x64xbf16>
    %cst_17 = arith.constant dense<0.000000e+00> : vector<760x64xf32>
    %17 = tpu.matmul %14, %16, %cst_17 {dimension_numbers = #tpu.dot_dimension_numbers<[1], [0], [0], [1], [0, 0, 1, 1], [], []>} : vector<760x4xbf16>, vector<4x64xbf16>, vector<760x64xf32> -> vector<760x64xf32>
    %18 = arith.addf %12, %17 : vector<760x64xf32>
    %c0_18 = arith.constant 0 : index
    %c19 = arith.constant 19 : index
    %c0_19 = arith.constant 0 : index
    %19 = vector.load %arg1[%c0_18, %c19, %c0_19] : memref<1x817x4xbf16, #tpu.memory_space<vmem>>, vector<1x760x4xbf16>
    %20 = vector.shape_cast %19 : vector<1x760x4xbf16> to vector<760x4xbf16>
    %c3 = arith.constant 3 : index
    %c0_20 = arith.constant 0 : index
    %c0_21 = arith.constant 0 : index
    %21 = vector.load %arg2[%c3, %c0_20, %c0_21] : memref<9x4x64xbf16, #tpu.memory_space<vmem>>, vector<1x4x64xbf16>
    %22 = vector.shape_cast %21 : vector<1x4x64xbf16> to vector<4x64xbf16>
    %cst_22 = arith.constant dense<0.000000e+00> : vector<760x64xf32>
    %23 = tpu.matmul %20, %22, %cst_22 {dimension_numbers = #tpu.dot_dimension_numbers<[1], [0], [0], [1], [0, 0, 1, 1], [], []>} : vector<760x4xbf16>, vector<4x64xbf16>, vector<760x64xf32> -> vector<760x64xf32>
    %24 = arith.addf %18, %23 : vector<760x64xf32>
    %c0_23 = arith.constant 0 : index
    %c20 = arith.constant 20 : index
    %c0_24 = arith.constant 0 : index
    %25 = vector.load %arg1[%c0_23, %c20, %c0_24] : memref<1x817x4xbf16, #tpu.memory_space<vmem>>, vector<1x760x4xbf16>
    %26 = vector.shape_cast %25 : vector<1x760x4xbf16> to vector<760x4xbf16>
    %c4 = arith.constant 4 : index
    %c0_25 = arith.constant 0 : index
    %c0_26 = arith.constant 0 : index
    %27 = vector.load %arg2[%c4, %c0_25, %c0_26] : memref<9x4x64xbf16, #tpu.memory_space<vmem>>, vector<1x4x64xbf16>
    %28 = vector.shape_cast %27 : vector<1x4x64xbf16> to vector<4x64xbf16>
    %cst_27 = arith.constant dense<0.000000e+00> : vector<760x64xf32>
    %29 = tpu.matmul %26, %28, %cst_27 {dimension_numbers = #tpu.dot_dimension_numbers<[1], [0], [0], [1], [0, 0, 1, 1], [], []>} : vector<760x4xbf16>, vector<4x64xbf16>, vector<760x64xf32> -> vector<760x64xf32>
    %30 = arith.addf %24, %29 : vector<760x64xf32>
    %c0_28 = arith.constant 0 : index
    %c21 = arith.constant 21 : index
    %c0_29 = arith.constant 0 : index
    %31 = vector.load %arg1[%c0_28, %c21, %c0_29] : memref<1x817x4xbf16, #tpu.memory_space<vmem>>, vector<1x760x4xbf16>
    %32 = vector.shape_cast %31 : vector<1x760x4xbf16> to vector<760x4xbf16>
    %c5 = arith.constant 5 : index
    %c0_30 = arith.constant 0 : index
    %c0_31 = arith.constant 0 : index
    %33 = vector.load %arg2[%c5, %c0_30, %c0_31] : memref<9x4x64xbf16, #tpu.memory_space<vmem>>, vector<1x4x64xbf16>
    %34 = vector.shape_cast %33 : vector<1x4x64xbf16> to vector<4x64xbf16>
    %cst_32 = arith.constant dense<0.000000e+00> : vector<760x64xf32>
    %35 = tpu.matmul %32, %34, %cst_32 {dimension_numbers = #tpu.dot_dimension_numbers<[1], [0], [0], [1], [0, 0, 1, 1], [], []>} : vector<760x4xbf16>, vector<4x64xbf16>, vector<760x64xf32> -> vector<760x64xf32>
    %36 = arith.addf %30, %35 : vector<760x64xf32>
    %c0_33 = arith.constant 0 : index
    %c38 = arith.constant 38 : index
    %c0_34 = arith.constant 0 : index
    %37 = vector.load %arg1[%c0_33, %c38, %c0_34] : memref<1x817x4xbf16, #tpu.memory_space<vmem>>, vector<1x760x4xbf16>
    %38 = vector.shape_cast %37 : vector<1x760x4xbf16> to vector<760x4xbf16>
    %c6 = arith.constant 6 : index
    %c0_35 = arith.constant 0 : index
    %c0_36 = arith.constant 0 : index
    %39 = vector.load %arg2[%c6, %c0_35, %c0_36] : memref<9x4x64xbf16, #tpu.memory_space<vmem>>, vector<1x4x64xbf16>
    %40 = vector.shape_cast %39 : vector<1x4x64xbf16> to vector<4x64xbf16>
    %cst_37 = arith.constant dense<0.000000e+00> : vector<760x64xf32>
    %41 = tpu.matmul %38, %40, %cst_37 {dimension_numbers = #tpu.dot_dimension_numbers<[1], [0], [0], [1], [0, 0, 1, 1], [], []>} : vector<760x4xbf16>, vector<4x64xbf16>, vector<760x64xf32> -> vector<760x64xf32>
    %42 = arith.addf %36, %41 : vector<760x64xf32>
    %c0_38 = arith.constant 0 : index
    %c39 = arith.constant 39 : index
    %c0_39 = arith.constant 0 : index
    %43 = vector.load %arg1[%c0_38, %c39, %c0_39] : memref<1x817x4xbf16, #tpu.memory_space<vmem>>, vector<1x760x4xbf16>
    %44 = vector.shape_cast %43 : vector<1x760x4xbf16> to vector<760x4xbf16>
    %c7 = arith.constant 7 : index
    %c0_40 = arith.constant 0 : index
    %c0_41 = arith.constant 0 : index
    %45 = vector.load %arg2[%c7, %c0_40, %c0_41] : memref<9x4x64xbf16, #tpu.memory_space<vmem>>, vector<1x4x64xbf16>
    %46 = vector.shape_cast %45 : vector<1x4x64xbf16> to vector<4x64xbf16>
    %cst_42 = arith.constant dense<0.000000e+00> : vector<760x64xf32>
    %47 = tpu.matmul %44, %46, %cst_42 {dimension_numbers = #tpu.dot_dimension_numbers<[1], [0], [0], [1], [0, 0, 1, 1], [], []>} : vector<760x4xbf16>, vector<4x64xbf16>, vector<760x64xf32> -> vector<760x64xf32>
    %48 = arith.addf %42, %47 : vector<760x64xf32>
    %c0_43 = arith.constant 0 : index
    %c40 = arith.constant 40 : index
    %c0_44 = arith.constant 0 : index
    %49 = vector.load %arg1[%c0_43, %c40, %c0_44] : memref<1x817x4xbf16, #tpu.memory_space<vmem>>, vector<1x760x4xbf16>
    %50 = vector.shape_cast %49 : vector<1x760x4xbf16> to vector<760x4xbf16>
    %c8 = arith.constant 8 : index
    %c0_45 = arith.constant 0 : index
    %c0_46 = arith.constant 0 : index
    %51 = vector.load %arg2[%c8, %c0_45, %c0_46] : memref<9x4x64xbf16, #tpu.memory_space<vmem>>, vector<1x4x64xbf16>
    %52 = vector.shape_cast %51 : vector<1x4x64xbf16> to vector<4x64xbf16>
    %cst_47 = arith.constant dense<0.000000e+00> : vector<760x64xf32>
    %53 = tpu.matmul %50, %52, %cst_47 {dimension_numbers = #tpu.dot_dimension_numbers<[1], [0], [0], [1], [0, 0, 1, 1], [], []>} : vector<760x4xbf16>, vector<4x64xbf16>, vector<760x64xf32> -> vector<760x64xf32>
    %54 = arith.addf %48, %53 : vector<760x64xf32>
    %c0_48 = arith.constant 0 : index
    %c0_49 = arith.constant 0 : index
    %55 = vector.load %arg3[%c0_48, %c0_49] : memref<1x64xf32, #tpu.memory_space<vmem>>, vector<1x64xf32>
    %56 = vector.broadcast %55 : vector<1x64xf32> to vector<760x64xf32>
    %57 = arith.addf %54, %56 : vector<760x64xf32>
    %cst_50 = arith.constant 0.000000e+00 : f32
    %58 = vector.broadcast %cst_50 : f32 to vector<760x64xf32>
    %59 = arith.maximumf %57, %58 : vector<760x64xf32>
    %60 = arith.truncf %59 : vector<760x64xf32> to vector<760x64xbf16>
    %c0_51 = arith.constant 0 : index
    %c0_52 = arith.constant 0 : index
    %c0_53 = arith.constant 0 : index
    %61 = vector.load %arg4[%c0_51, %c0_52, %c0_53] : memref<1x760x64xbf16, #tpu.memory_space<vmem>>, vector<1x760x64xbf16>
    %62 = vector.shape_cast %61 : vector<1x760x64xbf16> to vector<760x64xbf16>
    %63 = vector.shape_cast %60 : vector<760x64xbf16> to vector<1x760x64xbf16>
    tpu.vector_store %arg4[%c0_51, %c0_52, %c0_53], %63 {strides = array<i32>} : memref<1x760x64xbf16, #tpu.memory_space<vmem>>, vector<1x760x64xbf16>,
    return
  }
  func.func @transform_0(%arg0: i32) -> (i32, i32, i32) {
    %c0_i32 = arith.constant 0 : i32
    %c0_i32_0 = arith.constant 0 : i32
    %c0_i32_1 = arith.constant 0 : i32
    return %arg0, %c0_i32, %c0_i32_0 : i32, i32, i32
  }
  func.func @transform_1(%arg0: i32) -> (i32, i32, i32) {
    %c0_i32 = arith.constant 0 : i32
    %c0_i32_0 = arith.constant 0 : i32
    %c0_i32_1 = arith.constant 0 : i32
    %c0_i32_2 = arith.constant 0 : i32
    return %c0_i32, %c0_i32_0, %c0_i32_1 : i32, i32, i32
  }
  func.func @transform_2(%arg0: i32) -> (i32, i32) {
    %c0_i32 = arith.constant 0 : i32
    %c0_i32_0 = arith.constant 0 : i32
    %c0_i32_1 = arith.constant 0 : i32
    return %c0_i32, %c0_i32_0 : i32, i32
  }
  func.func @transform_3(%arg0: i32) -> (i32, i32, i32) {
    %c0_i32 = arith.constant 0 : i32
    %c0_i32_0 = arith.constant 0 : i32
    %c0_i32_1 = arith.constant 0 : i32
    return %arg0, %c0_i32, %c0_i32_0 : i32, i32, i32
  }
}

</mosaic_0001>

<bundles_post_ra>
// kernel: conv3x3.1
= control target key start
LH: loop header
LB: loop body
LE: loop exit
PB: predicated region body
PF: predicated region fallthrough
CT: control target
= control target key end

     0   :  { %s12724_s12 = smov 0   ;;  %s15501_s0 = inlined_call_operand.vmem [shape: bf16[2,817,4], index: 0, kind: input, shape index: {}]   ;;  %s15502_s1 = inlined_call_operand.vmem [shape: bf16[9,4,64], index: 1, kind: input, shape index: {}]   ;;  %s15503_s2 = inlined_call_operand.vmem [shape: f32[1,64], index: 2, kind: input, shape index: {}]   ;;  %s15504_s3 = inlined_call_operand.vmem [shape: bf16[2,760,64], index: 3, kind: output, shape index: {}]  }
   0x1 LB: > { %s9416_s13 = sadd.s32 4294967295, %s12702_s12   ;;  %p9420_p0 = scmp.ge.s32.totalorder %s12702_s12, 1  ;;  %s12702_s12 = sphi %s12724_s12, %s13_s12  }
   0x2   : > { %p137_p1 = scmp.lt.s32.totalorder %s12702_s12, 3 }
   0x4   : > { %p138_p2 = pnand %p9420_p0, %p137_p1 }
   0x6   : > { %141 = sbr.rel (%p138_p2) target bundleno = 1120 (0x460), region = 32 }
   0xd   : > { %vm1040_vm0 = vcmask 1041408   ;;  %v9716_v0 = vld [vmem:[%s15502_s1 + $0x8] sm:$0x3]  ;;  %v9423_v1 = vld [vmem:[%s15502_s1 + $0x2] sm:$0x3]  ;;  %p161_p3 = scmp.lt.s32.totalorder %s9416_s13, 1 }
   0xe   : > { %12318 = vmatprep.subr.msk.bf16.mxu0 %vm1040_vm0, %v9716_v0  ;;  %v12740_v2 = vsel %vm1040_vm0, %v9716_v0, 0  ;;  %12314 = vmatprep.subr.msk.bf16.mxu1 %vm1040_vm0, %v9423_v1  ;;  %v1042_v3 = vsel %vm1040_vm0, %v9423_v1, 0  ;;  %v267_v4 = vld [vmem:[%s15502_s1] sm:$0x3]  ;;  %v9766_v5 = vld [vmem:[%s15502_s1 + $0xa] sm:$0x3] }
   0xf   : > { %15729 = vst [vmem:[#allocation2_spill] sm:$0xff] %v12740_v2  ;;  %11087 = vmatpush3.bf16.msra.mxu0 %v12740_v2  ;;  %s15986_s13 = smov (!%p161_p3, %s9416_s13), 1  ;;  %10695 = vmatpush3.bf16.msra.mxu1 %v1042_v3  ;;  %vm895_vm1 = vcmask 31744   ;;  %vm4171_vm2 = vcmask 1045504   ;;  %vm511_vm3 = vsmask.f32 7424 }
  0x10   : > { %12315 = vmatprep.subr.msk.bf16.mxu1 %vm1040_vm0, %v267_v4  ;;  %12320 = vmatprep.subr.msk.bf16.mxu0 %vm1040_vm0, %v9766_v5  ;;  %s12324_s22 = smul.u32 412, %s15986_s13  ;;  %v1559_v9 = vsel %vm1040_vm0, %v267_v4, 0  ;;  %v5278_v12 = vsel %vm1040_vm0, %v9766_v5, 0  ;;  %v12784_v22 = vld [vmem:[%s15502_s1 + $0xc] sm:$0x3]  ;;  %vm6129_vm5 = vcmask 1044480  }
  0x11   : > { %vm4931_vm4 = vsmask.f32 5376  ;;  %vm1983_vm6 = vcmask 1046528   ;;  %vm6889_vm7 = vsmask.f32 4352  ;;  %s12325_s15 = smul.u32 380, %s15986_s13 }
  0x12   : > { %s12759_s25 = scalar_lea.vmem %s15501_s0, %s12324_s22  ;;  %vm3075_vm8 = vsmask.f32 6400  ;;  %vm9265_vm9 = vcmask 519168  }
  0x13   : > { %v2738_v6 = vld [vmem:[%s12759_s25 + $0xc] sm:$0xf]  ;;  %v12763_v7 = vld [vmem:[%s12759_s25 + $0x10] sm:$0xff]   ;;  %v4165_v8 = vld [vmem:[%s12759_s25 + $0x8] sm:$0xc]  ;;  %s15144_s18 = scalar_lea.vmem %s15504_s3, %s12325_s15 }
  0x14   : > { %15730 = vst [vmem:[#allocation3_spill] sm:$0xff] %v12763_v7  ;;  %v12767_v10 = vcombine.low %v4165_v8, %v2738_v6  ;;  %v12770_v11 = vld [vmem:[%s12759_s25 + $0x18] sm:$0xff]   ;;  %v4173_v13 = vrot.slane %v12763_v7, 2  ;;  %v172_v14 = vld [vmem:[%s12759_s25] sm:$0xf]  ;;  %v12339_v16 = vld [vmem:[%s12759_s25 + $0x8] sm:$0xff]  }
  0x15   : > { %15731 = vst [vmem:[#allocation4_spill] sm:$0xff] %v12770_v11  ;;  %v173_v15 = vld [vmem:[%s12759_s25 + $0x4] sm:$0xf]  ;;  %v4175_v18 = vrot.slane %v12770_v11, 2  ;;  %v520_v20 = vshll.u32 %v12339_v16, 16  ;;  %v524_v21 = vshrl.u32 %v12339_v16, 16 }
  0x16   : > { %v4172_v17 = vrot.slane %v12767_v10, 2  ;;  %v12779_v19 = vcombine.low %v172_v14, %v173_v15  ;;  %v12340_v27 = vld [vmem:[%s12759_s25 + $0x10] sm:$0xff]   ;;  %v12792_v28 = vld [vmem:[%s12759_s25 + $0x20] sm:$0xff]   ;;  %v12796_v30 = vld [vmem:[%s12759_s25 + $0x28] sm:$0xff]  }
  0x17   : > { %v4176_v24 = vsel %vm4171_vm2, %v4173_v13, %v4175_v18  ;;  %15732 = vst [vmem:[#allocation5_spill] sm:$0xff] %v12792_v28  ;;  %v522_v29 = vrot.slane %v520_v20, 1  ;;  %15733 = vst [vmem:[#allocation6_spill] sm:$0xff] %v12796_v30  ;;  %v528_v32 = vshll.u32 %v12340_v27, 16  ;;  %v4177_v33 = vrot.slane %v12792_v28, 2  ;;  %v12343_v34 = vld [vmem:[%s12759_s25 + $0x18] sm:$0xff]  }
  0x18   : > { %v4174_v23 = vsel %vm4171_vm2, %v4172_v17, %v4173_v13  ;;  %v513_v25 = vshrl.u32 %v12779_v19, 16  ;;  %v515_v26 = vshll.u32 %v12779_v19, 16  ;;  %v4179_v36 = vrot.slane %v12796_v30, 2  ;;  %v12344_v42 = vld [vmem:[%s12759_s25 + $0x20] sm:$0xff]   ;;  %v12810_v48 = vld [vmem:[%s12759_s25 + $0x30] sm:$0xff]   ;;  %v12815_v51 = vld [vmem:[%s12759_s25 + $0x38] sm:$0xff]  }
  0x19   : > { %11088 = vmatprep.mubr.msk.bf16.mxu0 %vm895_vm1, %v4174_v23  ;;  %v526_v35 = vor.u32 %v524_v21, %v522_v29  ;;  %v532_v37 = vshrl.u32 %v12340_v27, 16  ;;  %v530_v39 = vrot.slane %v528_v32, 1  ;;  %v4178_v40 = vsel %vm4171_vm2, %v4175_v18, %v4177_v33  ;;  %15734 = vst [vmem:[#allocation7_spill] sm:$0xff] %v12810_v48  ;;  %15735 = vst [vmem:[#allocation8_spill] sm:$0xff] %v12815_v51  ;;  %v12347_v54 = vld [vmem:[%s12759_s25 + $0x28] sm:$0xff]   ;;  %v12348_v56 = vld [vmem:[%s12759_s25 + $0x30] sm:$0xff]  }
  0x1a   : > { %11089 = vmatmul.mubr.msk.bf16.vlgmr.msra.gmra.mrb[0].mxu0 %vm895_vm1, %v4176_v24  ;;  %v517_v31 = vrot.slane %v515_v26, 1  ;;  %v536_v41 = vshll.u32 %v12343_v34, 16  ;;  %v540_v43 = vshrl.u32 %v12343_v34, 16  ;;  %v4180_v49 = vsel %vm4171_vm2, %v4177_v33, %v4179_v36  ;;  %v12826_v61 = vld [vmem:[%s12759_s25 + $0x40] sm:$0xff]   ;;  %v12351_v4 = vld [vmem:[%s12759_s25 + $0x38] sm:$0xff]   ;;  %v12836_v13 = vld [vmem:[%s12759_s25 + $0x48] sm:$0xff]  }
  0x1b   : > { %11185 = vmatpush3.bf16.msra.mxu0 %v5278_v12  ;;  %11092 = vmatprep.mubr.msk.bf16.mxu0 %vm895_vm1, %v4178_v40  ;;  %v531_v45 = vsel %vm511_vm3, %v526_v35, %v530_v39  ;;  %v534_v46 = vor.u32 %v532_v37, %v530_v39  ;;  %v544_v50 = vshll.u32 %v12344_v42, 16  ;;  %v4181_v53 = vrot.slane %v12810_v48, 2  ;;  %15736 = vst [vmem:[#allocation9_spill] sm:$0xff] %v12826_v61  ;;  %v12352_v15 = vld [vmem:[%s12759_s25 + $0x40] sm:$0xff]   ;;  %v12842_v18 = vld [vmem:[%s12759_s25 + $0x50] sm:$0xff]   ;;  %v12355_v24 = vld [vmem:[%s12759_s25 + $0x48] sm:$0xff]  }
  0x1c   : > { %v518_v38 = vor.u32 %v517_v31, %v513_v25  ;;  %12321 = vmatprep.subr.msk.bf16.mxu0 %vm1040_vm0, %v12784_v22  ;;  %v538_v47 = vrot.slane %v536_v41, 1  ;;  %v548_v55 = vshrl.u32 %v12344_v42, 16  ;;  %v552_v60 = vshll.u32 %v12347_v54, 16  ;;  %15737 = vst [vmem:[#allocation10_spill] sm:$0xff] %v12836_v13  ;;  %15738 = vst [vmem:[#allocation11_spill] sm:$0xff] %v12842_v18  ;;  %v12853_v33 = vld [vmem:[%s12759_s25 + $0x58] sm:$0xff]  }
  0x1d   : > { %v546_v58 = vrot.slane %v544_v50, 1  ;;  %v4182_v59 = vsel %vm4171_vm2, %v4179_v36, %v4181_v53  ;;  %v4183_v62 = vrot.slane %v12815_v51, 2  ;;  %v560_v1 = vshll.u32 %v12348_v56, 16  ;;  %15739 = vst [vmem:[#allocation12_spill] sm:$0xff] %v12853_v33  ;;  %v12356_v37 = vld [vmem:[%s12759_s25 + $0x50] sm:$0xff]   ;;  %v12860_v40 = vld [vmem:[%s12759_s25 + $0x60] sm:$0xff]  }
  0x1e   : > { %v523_v44 = vsel %vm511_vm3, %v518_v38, %v522_v29  ;;  %v539_v52 = vsel %vm511_vm3, %v534_v46, %v538_v47  ;;  %v542_v57 = vor.u32 %v540_v43, %v538_v47  ;;  %v554_v0 = vrot.slane %v552_v60, 1  ;;  %15740 = vst [vmem:[#allocation13_spill] sm:$0xff] %v12860_v40  ;;  %v12878_v60 = vld [vmem:[%s12759_s25 + $0x70] sm:$0xff]   ;;  %v13787_v2 = vld [vmem:[%s12759_s25 + $0xe0] sm:$0xff]  }
  0x1f   : > { %10696 = vmatprep.mubr.msk.bf16.mxu1 %vm895_vm1, %v523_v44  ;;  %v550_v63 = vor.u32 %v548_v55, %v546_v58  ;;  %v4185_v3 = vrot.slane %v12826_v61, 2  ;;  %v556_v6 = vshrl.u32 %v12347_v54, 16  ;;  %v564_v8 = vshrl.u32 %v12348_v56, 16  ;;  %v12359_v44 = vld [vmem:[%s12759_s25 + $0x58] sm:$0xff]   ;;  %v12872_v56 = vld [vmem:[%s12759_s25 + $0x68] sm:$0xff]   ;;  %15742 = vst [vmem:[#allocation15_spill] sm:$0xff] %v12878_v60 }
  0x20   : > { %10697 = vmatmul.mubr.msk.bf16.vlgmr.msra.gmra.mrb[0].mxu1 %vm895_vm1, %v531_v45  ;;  %v547_v5 = vsel %vm511_vm3, %v542_v57, %v546_v58  ;;  %v4184_v12 = vsel %vm4171_vm2, %v4181_v53, %v4183_v62  ;;  %v568_v14 = vshll.u32 %v12351_v4, 16  ;;  %v562_v16 = vrot.slane %v560_v1, 1  ;;  %15741 = vst [vmem:[#allocation14_spill] sm:$0xff] %v12872_v56  ;;  %v12363_v1 = vld [vmem:[%s12759_s25 + $0x68] sm:$0xff]  }
  0x21   : > { %10793 = vmatpush3.bf16.msra.mxu1 %v1559_v9  ;;  %10700 = vmatprep.mubr.msk.bf16.mxu1 %vm895_vm1, %v539_v52  ;;  %v555_v9 = vsel %vm511_vm3, %v550_v63, %v554_v0  ;;  %v4186_v17 = vsel %vm4171_vm2, %v4183_v62, %v4185_v3  ;;  %v558_v20 = vor.u32 %v556_v6, %v554_v0  ;;  %v4187_v25 = vrot.slane %v12836_v13, 2 }
  0x22   : > { %11093 = vmatmul.mubr.msk.bf16.gmra.mrb[4].mxu0 %vm895_vm1, %v4180_v49  ;;  %v566_v21 = vor.u32 %v564_v8, %v562_v16  ;;  %v570_v23 = vrot.slane %v568_v14, 1  ;;  %v576_v26 = vshll.u32 %v12352_v15, 16  ;;  %v4189_v27 = vrot.slane %v12842_v18, 2 }
  0x23   : > { %11096 = vmatprep.mubr.msk.bf16.mxu0 %vm895_vm1, %v4182_v59  ;;  %v563_v29 = vsel %vm511_vm3, %v558_v20, %v562_v16  ;;  %v572_v31 = vshrl.u32 %v12351_v4, 16  ;;  %v580_v34 = vshrl.u32 %v12352_v15, 16  ;;  %v584_v35 = vshll.u32 %v12355_v24, 16  ;;  %v12360_v59 = vld [vmem:[%s12759_s25 + $0x60] sm:$0xff]  }
  0x24   : > { %v571_v32 = vsel %vm511_vm3, %v566_v21, %v570_v23  ;;  %v4188_v36 = vsel %vm4171_vm2, %v4185_v3, %v4187_v25  ;;  %v578_v38 = vrot.slane %v576_v26, 1  ;;  %v4190_v39 = vsel %vm4171_vm2, %v4187_v25, %v4189_v27 }
  0x25   : > { %v574_v41 = vor.u32 %v572_v31, %v570_v23  ;;  %v586_v43 = vrot.slane %v584_v35, 1  ;;  %v4191_v45 = vrot.slane %v12853_v33, 2  ;;  %v592_v46 = vshll.u32 %v12356_v37, 16  ;;  %v12896_v23 = vld [vmem:[%s12759_s25 + $0x80] sm:$0xff]  }
  0x26   : > { %v582_v42 = vor.u32 %v580_v34, %v578_v38  ;;  %v4193_v47 = vrot.slane %v12860_v40, 2  ;;  %v588_v50 = vshrl.u32 %v12355_v24, 16  ;;  %v596_v53 = vshrl.u32 %v12356_v37, 16  ;;  %15744 = vst [vmem:[#allocation17_spill] sm:$0xff] %v12896_v23  ;;  %v12907_v37 = vld [vmem:[%s12759_s25 + $0x88] sm:$0xff]  }
  0x27   : > { %v579_v49 = vsel %vm511_vm3, %v574_v41, %v578_v38  ;;  %v600_v54 = vshll.u32 %v12359_v44, 16  ;;  %v4192_v55 = vsel %vm4171_vm2, %v4189_v27, %v4191_v45  ;;  %v594_v57 = vrot.slane %v592_v46, 1  ;;  %v12367_v27 = vld [vmem:[%s12759_s25 + $0x78] sm:$0xff]   ;;  %15745 = vst [vmem:[#allocation18_spill] sm:$0xff] %v12907_v37  ;;  %v12368_v41 = vld [vmem:[%s12759_s25 + $0x80] sm:$0xff]  }
  0x28   : > { %10701 = vmatmul.mubr.msk.bf16.gmra.mrb[4].mxu1 %vm895_vm1, %v547_v5  ;;  %v587_v52 = vsel %vm511_vm3, %v582_v42, %v586_v43  ;;  %v4194_v58 = vsel %vm4171_vm2, %v4191_v45, %v4193_v47  ;;  %v590_v62 = vor.u32 %v588_v50, %v586_v43  ;;  %v4195_v3 = vrot.slane %v12872_v56, 2  ;;  %v12912_v43 = vld [vmem:[%s12759_s25 + $0x90] sm:$0xff]  }
  0x29   : > { %10704 = vmatprep.mubr.msk.bf16.mxu1 %vm895_vm1, %v555_v9  ;;  %v598_v63 = vor.u32 %v596_v53, %v594_v57  ;;  %v602_v0 = vrot.slane %v600_v54, 1  ;;  %v608_v4 = vshll.u32 %v12360_v59, 16  ;;  %v4197_v5 = vrot.slane %v12878_v60, 2  ;;  %v12888_v9 = vld [vmem:[%s12759_s25 + $0x78] sm:$0xff]   ;;  %15746 = vst [vmem:[#allocation19_spill] sm:$0xff] %v12912_v43 }
  0x2a   : > { %11097 = vmatmul.mubr.msk.bf16.gmra.mrb[8].mxu0 %vm895_vm1, %v4184_v12  ;;  %v595_v6 = vsel %vm511_vm3, %v590_v62, %v594_v57  ;;  %v604_v8 = vshrl.u32 %v12359_v44, 16  ;;  %15743 = vst [vmem:[#allocation16_spill] sm:$0xff] %v12888_v9  ;;  %v612_v14 = vshrl.u32 %v12360_v59, 16  ;;  %v616_v15 = vshll.u32 %v12363_v1, 16 }
  0x2b   : > { %11100 = vmatprep.mubr.msk.bf16.mxu0 %vm895_vm1, %v4186_v17  ;;  %v603_v12 = vsel %vm511_vm3, %v598_v63, %v602_v0  ;;  %v4196_v16 = vsel %vm4171_vm2, %v4193_v47, %v4195_v3  ;;  %v12364_v17 = vld [vmem:[%s12759_s25 + $0x70] sm:$0xff]   ;;  %v610_v20 = vrot.slane %v608_v4, 1  ;;  %v4198_v21 = vsel %vm4171_vm2, %v4195_v3, %v4197_v5 }
  0x2c   : > { %v606_v24 = vor.u32 %v604_v8, %v602_v0  ;;  %v618_v26 = vrot.slane %v616_v15, 1  ;;  %v624_v31 = vshll.u32 %v12364_v17, 16  ;;  %v620_v35 = vshrl.u32 %v12363_v1, 16  ;;  %v12926_v0 = vld [vmem:[%s12759_s25 + $0x98] sm:$0xff]   ;;  %v12372_v4 = vld [vmem:[%s12759_s25 + $0x90] sm:$0xff]  }
  0x2d   : > { %v614_v25 = vor.u32 %v612_v14, %v610_v20  ;;  %v628_v38 = vshrl.u32 %v12364_v17, 16  ;;  %v4203_v47 = vrot.slane %v12907_v37, 2  ;;  %v640_v53 = vshll.u32 %v12368_v41, 16  ;;  %15747 = vst [vmem:[#allocation20_spill] sm:$0xff] %v12926_v0  ;;  %v12375_v14 = vld [vmem:[%s12759_s25 + $0x98] sm:$0xff]  }
  0x2e   : > { %v611_v34 = vsel %vm511_vm3, %v606_v24, %v610_v20  ;;  %v626_v44 = vrot.slane %v624_v31, 1  ;;  %v622_v46 = vor.u32 %v620_v35, %v618_v26  ;;  %v4205_v54 = vrot.slane %v12912_v43, 2  ;;  %v12950_v35 = vld [vmem:[%s12759_s25 + $0xb0] sm:$0xff]  }
  0x2f   : > { %v636_v57 = vshrl.u32 %v12367_v27, 16  ;;  %v644_v59 = vshrl.u32 %v12368_v41, 16  ;;  %v642_v1 = vrot.slane %v640_v53, 1  ;;  %v4207_v15 = vrot.slane %v12926_v0, 2  ;;  %15750 = vst [vmem:[#allocation23_spill] sm:$0xff] %v12950_v35  ;;  %v12379_v41 = vld [vmem:[%s12759_s25 + $0xa8] sm:$0xff]  }
  0x30   : > { %10705 = vmatmul.mubr.msk.bf16.gmra.mrb[8].mxu1 %vm895_vm1, %v563_v29  ;;  %v4199_v29 = vrot.slane %v12888_v9, 2  ;;  %v4206_v3 = vsel %vm4171_vm2, %v4203_v47, %v4205_v54  ;;  %v680_v53 = vshll.u32 %v12379_v41, 16 }
  0x31   : > { %10708 = vmatprep.mubr.msk.bf16.mxu1 %vm895_vm1, %v571_v32  ;;  %v4201_v32 = vrot.slane %v12896_v23, 2  ;;  %v646_v8 = vor.u32 %v644_v59, %v642_v1  ;;  %v12968_v59 = vld [vmem:[%s12759_s25 + $0xc0] sm:$0xff]  }
  0x32   : > { %11101 = vmatmul.mubr.msk.bf16.gmra.mrb[12].mxu0 %vm895_vm1, %v4188_v36  ;;  %v619_v36 = vsel %vm511_vm3, %v614_v25, %v618_v26  ;;  %v4200_v42 = vsel %vm4171_vm2, %v4197_v5, %v4199_v29  ;;  %v12932_v5 = vld [vmem:[%s12759_s25 + $0xa0] sm:$0xff]   ;;  %v660_v25 = vshrl.u32 %v12372_v4, 16  ;;  %v664_v26 = vshll.u32 %v12375_v14, 16  ;;  %15752 = vst [vmem:[#allocation25_spill] sm:$0xff] %v12968_v59 }
  0x33   : > { %11104 = vmatprep.mubr.msk.bf16.mxu0 %vm895_vm1, %v4190_v39  ;;  %v632_v39 = vshll.u32 %v12367_v27, 16  ;;  %v4202_v45 = vsel %vm4171_vm2, %v4199_v29, %v4201_v32  ;;  %v4204_v63 = vsel %vm4171_vm2, %v4201_v32, %v4203_v47  ;;  %15748 = vst [vmem:[#allocation21_spill] sm:$0xff] %v12932_v5  ;;  %v4209_v17 = vrot.slane %v12932_v5, 2  ;;  %v12944_v29 = vld [vmem:[%s12759_s25 + $0xa8] sm:$0xff]  }
  0x34   : > { %v4208_v27 = vsel %vm4171_vm2, %v4205_v54, %v4207_v15  ;;  %15749 = vst [vmem:[#allocation22_spill] sm:$0xff] %v12944_v29  ;;  %v668_v47 = vshrl.u32 %v12375_v14, 16  ;;  %v684_v14 = vshrl.u32 %v12379_v41, 16 }
  0x35   : > { %v634_v50 = vrot.slane %v632_v39, 1  ;;  %v4210_v32 = vsel %vm4171_vm2, %v4207_v15, %v4209_v17  ;;  %v666_v39 = vrot.slane %v664_v26, 1  ;;  %v4217_v15 = vrot.slane %v12968_v59, 2 }
  0x38   : > { %10709 = vmatmul.mubr.msk.bf16.gmra.mrb[12].mxu1 %vm895_vm1, %v579_v49  ;;  %v630_v49 = vor.u32 %v628_v38, %v626_v44 }
  0x39   : > { %10712 = vmatprep.mubr.msk.bf16.mxu1 %vm895_vm1, %v587_v52  ;;  %v12371_v52 = vld [vmem:[%s12759_s25 + $0x88] sm:$0xff]  }
  0x3a   : > { %11105 = vmatmul.mubr.msk.bf16.gmra.mrb[16].mxu0 %vm895_vm1, %v4192_v55  ;;  %v627_v55 = vsel %vm511_vm3, %v622_v46, %v626_v44  ;;  %v648_v62 = vshll.u32 %v12371_v52, 16 }
  0x3b   : > { %11108 = vmatprep.mubr.msk.bf16.mxu0 %vm895_vm1, %v4194_v58  ;;  %v635_v58 = vsel %vm511_vm3, %v630_v49, %v634_v50 }
  0x40   : > { %10713 = vmatmul.mubr.msk.bf16.gmra.mrb[16].mxu1 %vm895_vm1, %v595_v6  ;;  %v638_v6 = vor.u32 %v636_v57, %v634_v50  ;;  %v12961_v50 = vld [vmem:[%s12759_s25 + $0xb8] sm:$0xff]  }
  0x41   : > { %10716 = vmatprep.mubr.msk.bf16.mxu1 %vm895_vm1, %v603_v12  ;;  %v650_v12 = vrot.slane %v648_v62, 1  ;;  %15751 = vst [vmem:[#allocation24_spill] sm:$0xff] %v12961_v50  ;;  %v670_v62 = vor.u32 %v668_v47, %v666_v39  ;;  %v12385_v47 = vld [vmem:[%s12759_s25 + $0xc8] sm:$0xff]  }
  0x42   : > { %11109 = vmatmul.mubr.msk.bf16.gmra.mrb[20].mxu0 %vm895_vm1, %v4196_v16  ;;  %v656_v16 = vshll.u32 %v12372_v4, 16  ;;  %v643_v20 = vsel %vm511_vm3, %v638_v6, %v642_v1  ;;  %v4215_v4 = vrot.slane %v12961_v50, 2 }
  0x43   : > { %11112 = vmatprep.mubr.msk.bf16.mxu0 %vm895_vm1, %v4198_v21  ;;  %v652_v21 = vshrl.u32 %v12371_v52, 16  ;;  %v651_v24 = vsel %vm511_vm3, %v646_v8, %v650_v12  ;;  %v15551_v8 = vshrl.u32 %v12763_v7, 16 }
  0x44   : > { %v658_v31 = vrot.slane %v656_v16, 1  ;;  %v4933_v16 = vshrl.u32 %v12767_v10, 16 }
  0x46   : > { %v662_v38 = vor.u32 %v660_v25, %v658_v31 }
  0x48   : > { %10717 = vmatmul.mubr.msk.bf16.gmra.mrb[20].mxu1 %vm895_vm1, %v611_v34  ;;  %v12376_v34 = vld [vmem:[%s12759_s25 + $0xa0] sm:$0xff]   ;;  %v667_v49 = vsel %vm511_vm3, %v662_v38, %v666_v39  ;;  %v4935_v38 = vrot.slane %v4933_v16, 2 }
  0x49   : > { %10720 = vmatprep.mubr.msk.bf16.mxu1 %vm895_vm1, %v619_v36  ;;  %v654_v36 = vor.u32 %v652_v21, %v650_v12  ;;  %v672_v44 = vshll.u32 %v12376_v34, 16  ;;  %v676_v52 = vshrl.u32 %v12376_v34, 16  ;;  %v15550_v12 = vshll.u32 %v12763_v7, 16  ;;  %v12982_v21 = vld [vmem:[%s12759_s25 + $0xc8] sm:$0xff]   ;;  %v5816_v7 = vld [vmem:[%s12759_s25 + $0x74] sm:$0xf] }
  0x4a   : > { %11113 = vmatmul.mubr.msk.bf16.gmra.mrb[24].mxu0 %vm895_vm1, %v4200_v42  ;;  %v4211_v42 = vrot.slane %v12944_v29, 2  ;;  %15753 = vst [vmem:[#allocation26_spill] sm:$0xff] %v12982_v21  ;;  %v4940_v34 = vrot.slane %v15551_v8, 2 }
  0x4b   : > { %11116 = vmatprep.mubr.msk.bf16.mxu0 %vm895_vm1, %v4202_v45  ;;  %v4213_v45 = vrot.slane %v12950_v35, 2  ;;  %v659_v46 = vsel %vm511_vm3, %v654_v36, %v658_v31  ;;  %v674_v57 = vrot.slane %v672_v44, 1  ;;  %v4941_v36 = vrot.slane %v15550_v12, 3  ;;  %v13324_v12 = vld [vmem:[%s12759_s25 + $0xd8] sm:$0xff]  }
  0x4c   : > { %v4212_v54 = vsel %vm4171_vm2, %v4209_v17, %v4211_v42  ;;  %v4936_v17 = vshll.u32 %v12767_v10, 16  ;;  %v4218_v10 = vsel %vm4171_vm2, %v4215_v4, %v4217_v15  ;;  %15758 = vst [vmem:[#allocation31_spill] sm:$0xff] %v13324_v12 }
  0x4d   : > { %v678_v1 = vor.u32 %v676_v52, %v674_v57  ;;  %v4216_v31 = vsel %vm4171_vm2, %v4213_v45, %v4215_v4  ;;  %v15546_v52 = vshll.u32 %v12770_v11, 16  ;;  %v712_v4 = vshll.u32 %v12385_v47, 16 }
  0x4e   : > { %v4938_v39 = vrot.slane %v4936_v17, 3 }
  0x4f   : > { %v4945_v17 = vrot.slane %v15546_v52, 3 }
  0x50   : > { %10721 = vmatmul.mubr.msk.bf16.gmra.mrb[24].mxu1 %vm895_vm1, %v627_v55  ;;  %v12380_v55 = vld [vmem:[%s12759_s25 + $0xb0] sm:$0xff]  }
  0x51   : > { %10724 = vmatprep.mubr.msk.bf16.mxu1 %vm895_vm1, %v635_v58  ;;  %v4214_v58 = vsel %vm4171_vm2, %v4211_v42, %v4213_v45  ;;  %v688_v6 = vshll.u32 %v12380_v55, 16  ;;  %v692_v26 = vshrl.u32 %v12380_v55, 16  ;;  %v15505_v42 = vrot.slane %v12982_v21, 2 }
  0x52   : > { %11117 = vmatmul.mubr.msk.bf16.gmra.mrb[28].mxu0 %vm895_vm1, %v4204_v63  ;;  %v12383_v63 = vld [vmem:[%s12759_s25 + $0xb8] sm:$0xff]   ;;  %v15543_v55 = vshrl.u32 %v12792_v28, 16 }
  0x53   : > { %11120 = vmatprep.mubr.msk.bf16.mxu0 %vm895_vm1, %v4206_v3  ;;  %v682_v3 = vrot.slane %v680_v53, 1  ;;  %v4939_v53 = vor.u32 %v4938_v39, %v4935_v38 }
  0x55   : > { %v683_v25 = vsel %vm511_vm3, %v678_v1, %v682_v3  ;;  %v686_v41 = vor.u32 %v684_v14, %v682_v3 }
  0x58   : > { %10725 = vmatmul.mubr.msk.bf16.gmra.mrb[28].mxu1 %vm895_vm1, %v643_v20  ;;  %v675_v20 = vsel %vm511_vm3, %v670_v62, %v674_v57  ;;  %v15542_v57 = vshll.u32 %v12792_v28, 16  ;;  %v700_v62 = vshrl.u32 %v12383_v63, 16  ;;  %v13803_v28 = vld [vmem:[%s12759_s25 + $0xe8] sm:$0xff]  }
  0x59   : > { %10728 = vmatprep.mubr.msk.bf16.mxu1 %vm895_vm1, %v651_v24  ;;  %v696_v24 = vshll.u32 %v12383_v63, 16 }
  0x5a   : > { %11121 = vmatmul.mubr.msk.bf16.gmra.mrb[32].mxu0 %vm895_vm1, %v4208_v27  ;;  %v12384_v27 = vld [vmem:[%s12759_s25 + $0xc0] sm:$0xff]  }
  0x5b   : > { %11124 = vmatprep.mubr.msk.bf16.mxu0 %vm895_vm1, %v4210_v32  ;;  %v690_v32 = vrot.slane %v688_v6, 1  ;;  %v698_v44 = vrot.slane %v696_v24, 1  ;;  %v708_v3 = vshrl.u32 %v12384_v27, 16  ;;  %v4220_v6 = vsel %vm4171_vm2, %v4217_v15, %v15505_v42 }
  0x5c   : > { %v4948_v24 = vrot.slane %v15543_v55, 2 }
  0x5d   : > { %v694_v45 = vor.u32 %v692_v26, %v690_v32  ;;  %v702_v15 = vor.u32 %v700_v62, %v698_v44  ;;  %v13022_v26 = vld [vmem:[%s15502_s1 + $0x4] sm:$0x3] }
  0x5e   : > { %12316 = vmatprep.subr.msk.bf16.mxu1 %vm1040_vm0, %v13022_v26 }
  0x5f   : > { %v699_v1 = vsel %vm511_vm3, %v694_v45, %v698_v44  ;;  %v15532_v44 = vshll.u32 %v12810_v48, 16 }
  0x60   : > { %10729 = vmatmul.mubr.msk.bf16.gmra.mrb[32].mxu1 %vm895_vm1, %v659_v46  ;;  %v704_v46 = vshll.u32 %v12384_v27, 16 }
  0x61   : > { %10732 = vmatprep.mubr.msk.bf16.mxu1 %vm895_vm1, %v667_v49  ;;  %v15549_v49 = vshrl.u32 %v12770_v11, 16  ;;  %v13811_v11 = vld [vmem:[%s12759_s25 + $0xf0] sm:$0xff]  }
  0x62   : > { %11125 = vmatmul.mubr.msk.bf16.gmra.mrb[36].mxu0 %vm895_vm1, %v4212_v54  ;;  %v4942_v54 = vor.u32 %v4941_v36, %v4940_v34  ;;  %v706_v14 = vrot.slane %v704_v46, 1  ;;  %v15541_v36 = vshrl.u32 %v12796_v30, 16  ;;  %v716_v46 = vshrl.u32 %v12385_v47, 16  ;;  %15781 = vst [vmem:[#allocation54_spill] sm:$0xff] %v13811_v11 }
  0x63   : > { %11128 = vmatprep.mubr.msk.bf16.mxu0 %vm895_vm1, %v4214_v58  ;;  %v691_v58 = vsel %vm511_vm3, %v686_v41, %v690_v32  ;;  %v4944_v16 = vrot.slane %v15549_v49, 2  ;;  %v12387_v32 = vld [vmem:[%s12759_s25 + $0xd8] sm:$0xff]   ;;  %v15537_v41 = vshrl.u32 %v12810_v48, 16  ;;  %v5812_v48 = vld [vmem:[%s12759_s25 + $0x64] sm:$0xf] }
  0x64   : > { %v4943_v63 = vsel %vm4931_vm4, %v4939_v53, %v4942_v54  ;;  %v710_v27 = vor.u32 %v708_v3, %v706_v14  ;;  %v707_v45 = vsel %vm511_vm3, %v702_v15, %v706_v14  ;;  %v728_v62 = vshll.u32 %v12387_v32, 16 }
  0x65   : > { %v4946_v34 = vor.u32 %v4945_v17, %v4944_v16  ;;  %v6370_v16 = vsel %vm1040_vm0, %v12784_v22, 0  ;;  %v4956_v17 = vrot.slane %v15537_v41, 2  ;;  %v12389_v22 = vld [vmem:[%s12759_s25 + $0xe8] sm:$0xff]  }
  0x67   : > { %v4947_v3 = vsel %vm4931_vm4, %v4942_v54, %v4946_v34  ;;  %v4957_v54 = vrot.slane %v15532_v44, 3  ;;  %v13224_v44 = vld [vmem:[%s12759_s25 + $0x158] sm:$0xff]  }
  0x68   : > { %10733 = vmatmul.mubr.msk.bf16.gmra.mrb[36].mxu1 %vm895_vm1, %v675_v20  ;;  %v12386_v20 = vld [vmem:[%s12759_s25 + $0xd0] sm:$0xff]  }
  0x69   : > { %10736 = vmatprep.mubr.msk.bf16.mxu1 %vm895_vm1, %v683_v25  ;;  %v4949_v25 = vrot.slane %v15542_v57, 3  ;;  %v720_v38 = vshll.u32 %v12386_v20, 16  ;;  %v13286_v57 = vld [vmem:[%s12759_s25 + $0x170] sm:$0xff]  }
  0x6a   : > { %11129 = vmatmul.mubr.msk.bf16.gmra.mrb[40].mxu0 %vm895_vm1, %v4216_v31  ;;  %v714_v31 = vrot.slane %v712_v4, 1  ;;  %v4952_v4 = vrot.slane %v15541_v36, 2 }
  0x6b   : > { %11132 = vmatprep.mubr.msk.bf16.mxu0 %vm895_vm1, %v4218_v10  ;;  %v15538_v10 = vshll.u32 %v12796_v30, 16  ;;  %v4950_v39 = vor.u32 %v4949_v25, %v4948_v24  ;;  %v722_v47 = vrot.slane %v720_v38, 1  ;;  %v730_v24 = vrot.slane %v728_v62, 1 }
  0x6c   : > { %v715_v53 = vsel %vm511_vm3, %v710_v27, %v714_v31  ;;  %v15530_v27 = vshrl.u32 %v12815_v51, 16  ;;  %v4958_v38 = vor.u32 %v4957_v54, %v4956_v17  ;;  %v12390_v17 = vld [vmem:[%s12759_s25 + $0xf0] sm:$0xff]  }
  0x6d   : > { %v4951_v14 = vsel %vm4931_vm4, %v4946_v34, %v4950_v39  ;;  %v15528_v34 = vshll.u32 %v12815_v51, 16  ;;  %v752_v42 = vshll.u32 %v12390_v17, 16  ;;  %v13779_v51 = vld [vmem:[%s12759_s25 + $0xd8] sm:$0xff]  }
  0x70   : > { %10737 = vmatmul.mubr.msk.bf16.gmra.mrb[40].mxu1 %vm895_vm1, %v691_v58  ;;  %v724_v58 = vshrl.u32 %v12386_v20, 16  ;;  %v718_v20 = vor.u32 %v716_v46, %v714_v31  ;;  %v15507_v31 = vshll.u32 %v12826_v61, 16 }
  0x71   : > { %10740 = vmatprep.mubr.msk.bf16.mxu1 %vm895_vm1, %v699_v1  ;;  %v12388_v1 = vld [vmem:[%s12759_s25 + $0xe0] sm:$0xff]  }
  0x72   : > { %11133 = vmatmul.mubr.msk.bf16.gmra.mrb[44].mxu0 %vm895_vm1, %v4220_v6  ;;  %v4953_v6 = vrot.slane %v15538_v10, 3  ;;  %v736_v25 = vshll.u32 %v12388_v1, 16  ;;  %v723_v46 = vsel %vm511_vm3, %v718_v20, %v722_v47  ;;  %v740_v62 = vshrl.u32 %v12388_v1, 16  ;;  %v13261_v10 = vld [vmem:[%s12759_s25 + $0x168] sm:$0xff]  }
  0x73   : > { %11186 = vmatprep.mubr.msk.bf16.mxu0 %vm895_vm1, %v4943_v63  ;;  %v726_v63 = vor.u32 %v724_v58, %v722_v47  ;;  %v4965_v1 = vrot.slane %v15507_v31, 3  ;;  %v15509_v31 = vshrl.u32 %v12842_v18, 16 }
  0x74   : > { %v4954_v15 = vor.u32 %v4953_v6, %v4952_v4  ;;  %v738_v6 = vrot.slane %v736_v25, 1 }
  0x75   : > { %v731_v58 = vsel %vm511_vm3, %v726_v63, %v730_v24  ;;  %v12391_v63 = vld [vmem:[%s12759_s25 + $0xf8] sm:$0xff]  }
  0x76   : > { %v4955_v4 = vsel %vm4931_vm4, %v4950_v39, %v4954_v15  ;;  %v4959_v47 = vsel %vm4931_vm4, %v4954_v15, %v4958_v38  ;;  %v742_v54 = vor.u32 %v740_v62, %v738_v6  ;;  %v15508_v15 = vshrl.u32 %v12836_v13, 16 }
  0x78   : > { %10741 = vmatmul.mubr.msk.bf16.gmra.mrb[44].mxu1 %vm895_vm1, %v707_v45  ;;  %v15506_v45 = vshrl.u32 %v12826_v61, 16 }
  0x79   : > { %10744 = vmatprep.mubr.msk.bf16.mxu1 %vm895_vm1, %v715_v53  ;;  %v732_v53 = vshrl.u32 %v12387_v32, 16 }
  0x7a   : > { %11187 = vmatmul.mubr.msk.bf16.vlgmr.msra.gmra.mrb[0].mxu0 %vm895_vm1, %v4947_v3  ;;  %v744_v3 = vshll.u32 %v12389_v22, 16  ;;  %v4964_v32 = vrot.slane %v15506_v45, 2 }
  0x7b   : > { %11190 = vmatprep.mubr.msk.bf16.mxu0 %vm895_vm1, %v4951_v14  ;;  %11283 = vmatpush3.bf16.msra.mxu0 %v6370_v16  ;;  %v4960_v16 = vrot.slane %v15530_v27, 2  ;;  %v4961_v14 = vrot.slane %v15528_v34, 3  ;;  %v734_v39 = vor.u32 %v732_v53, %v730_v24  ;;  %v748_v53 = vshrl.u32 %v12389_v22, 16 }
  0x7c   : > { %v746_v20 = vrot.slane %v744_v3, 1  ;;  %v4966_v45 = vor.u32 %v4965_v1, %v4964_v32  ;;  %v756_v3 = vshrl.u32 %v12390_v17, 16  ;;  %v754_v1 = vrot.slane %v752_v42, 1 }
  0x7d   : > { %v4962_v25 = vor.u32 %v4961_v14, %v4960_v16  ;;  %v739_v24 = vsel %vm511_vm3, %v734_v39, %v738_v6  ;;  %v4968_v14 = vrot.slane %v15508_v15, 2  ;;  %v4972_v22 = vrot.slane %v15509_v31, 2  ;;  %v12393_v15 = vld [vmem:[%s12759_s25 + $0x108] sm:$0xff]  }
  0x7e   : > { %v747_v62 = vsel %vm511_vm3, %v742_v54, %v746_v20  ;;  %v758_v39 = vor.u32 %v756_v3, %v754_v1  ;;  %v15512_v31 = vshll.u32 %v12853_v33, 16 }
  0x7f   : > { %v4963_v16 = vsel %vm4931_vm4, %v4958_v38, %v4962_v25  ;;  %v4967_v6 = vsel %vm4931_vm4, %v4962_v25, %v4966_v45  ;;  %v750_v38 = vor.u32 %v748_v53, %v746_v20  ;;  %v15514_v25 = vshrl.u32 %v12853_v33, 16 }
  0x80   : > { %10745 = vmatmul.mubr.msk.bf16.gmra.mrb[48].mxu1 %vm895_vm1, %v723_v46  ;;  %v15510_v46 = vshll.u32 %v12836_v13, 16  ;;  %v764_v53 = vshrl.u32 %v12391_v63, 16  ;;  %v5808_v13 = vld [vmem:[%s12759_s25 + $0x54] sm:$0xf] }
  0x81   : > { %10748 = vmatprep.mubr.msk.bf16.mxu1 %vm895_vm1, %v731_v58  ;;  %v15511_v58 = vshll.u32 %v12842_v18, 16  ;;  %v755_v20 = vsel %vm511_vm3, %v750_v38, %v754_v1  ;;  %v12394_v1 = vld [vmem:[%s12759_s25 + $0x110] sm:$0xff]  }
  0x82   : > { %11191 = vmatmul.mubr.msk.bf16.gmra.mrb[4].mxu0 %vm895_vm1, %v4955_v4  ;;  %v12392_v4 = vld [vmem:[%s12759_s25 + $0x100] sm:$0xff]   ;;  %v4969_v32 = vrot.slane %v15510_v46, 3  ;;  %v13763_v18 = vld [vmem:[%s12759_s25 + $0xd0] sm:$0xff]  }
  0x83   : > { %11194 = vmatprep.mubr.msk.bf16.mxu0 %vm895_vm1, %v4959_v47  ;;  %v760_v47 = vshll.u32 %v12391_v63, 16  ;;  %v4973_v17 = vrot.slane %v15511_v58, 3  ;;  %v768_v42 = vshll.u32 %v12392_v4, 16  ;;  %v15513_v58 = vshrl.u32 %v12860_v40, 16 }
  0x85   : > { %v762_v54 = vrot.slane %v760_v47, 1  ;;  %v4974_v46 = vor.u32 %v4973_v17, %v4972_v22  ;;  %v772_v47 = vshrl.u32 %v12392_v4, 16  ;;  %v770_v22 = vrot.slane %v768_v42, 1 }
  0x86   : > { %v4980_v63 = vrot.slane %v15513_v58, 2  ;;  %v784_v58 = vshll.u32 %v12394_v1, 16 }
  0x87   : > { %v763_v3 = vsel %vm511_vm3, %v758_v39, %v762_v54  ;;  %v774_v38 = vor.u32 %v772_v47, %v770_v22 }
  0x88   : > { %10749 = vmatmul.mubr.msk.bf16.gmra.mrb[52].mxu1 %vm895_vm1, %v739_v24  ;;  %v4970_v24 = vor.u32 %v4969_v32, %v4968_v14  ;;  %v4976_v32 = vrot.slane %v15514_v25, 2 }
  0x89   : > { %10752 = vmatprep.mubr.msk.bf16.mxu1 %vm895_vm1, %v747_v62  ;;  %v15515_v62 = vshll.u32 %v12860_v40, 16  ;;  %v13739_v40 = vld [vmem:[%s12759_s25 + $0xc0] sm:$0xff]  }
  0x8a   : > { %11195 = vmatmul.mubr.msk.bf16.gmra.mrb[8].mxu0 %vm895_vm1, %v4963_v16  ;;  %v776_v16 = vshll.u32 %v12393_v15, 16  ;;  %v4971_v14 = vsel %vm4931_vm4, %v4966_v45, %v4970_v24  ;;  %v4975_v17 = vsel %vm4931_vm4, %v4970_v24, %v4974_v46  ;;  %v766_v45 = vor.u32 %v764_v53, %v762_v54 }
  0x8b   : > { %11198 = vmatprep.mubr.msk.bf16.mxu0 %vm895_vm1, %v4967_v6  ;;  %v4977_v6 = vrot.slane %v15512_v31, 3  ;;  %v4981_v4 = vrot.slane %v15515_v62, 3  ;;  %v12395_v31 = vld [vmem:[%s12759_s25 + $0x118] sm:$0xff]   ;;  %v15518_v24 = vshrl.u32 %v12872_v56, 16  ;;  %v15517_v62 = vshrl.u32 %v12878_v60, 16 }
  0x8c   : > { %v778_v39 = vrot.slane %v776_v16, 1  ;;  %v771_v54 = vsel %vm511_vm3, %v766_v45, %v770_v22  ;;  %v780_v53 = vshrl.u32 %v12393_v15, 16  ;;  %v788_v16 = vshrl.u32 %v12394_v1, 16  ;;  %v12396_v22 = vld [vmem:[%s12759_s25 + $0x120] sm:$0xff]  }
  0x8d   : > { %v4978_v42 = vor.u32 %v4977_v6, %v4976_v32  ;;  %v4982_v25 = vor.u32 %v4981_v4, %v4980_v63  ;;  %v4984_v6 = vrot.slane %v15518_v24, 2  ;;  %v786_v63 = vrot.slane %v784_v58, 1 }
  0x8e   : > { %v779_v47 = vsel %vm511_vm3, %v774_v38, %v778_v39  ;;  %v4988_v15 = vrot.slane %v15517_v62, 2  ;;  %v800_v62 = vshll.u32 %v12396_v22, 16 }
  0x8f   : > { %v4979_v32 = vsel %vm4931_vm4, %v4974_v46, %v4978_v42  ;;  %v4983_v4 = vsel %vm4931_vm4, %v4978_v42, %v4982_v25  ;;  %v782_v46 = vor.u32 %v780_v53, %v778_v39  ;;  %v790_v45 = vor.u32 %v788_v16, %v786_v63 }
  0x90   : > { %10753 = vmatmul.mubr.msk.bf16.gmra.mrb[56].mxu1 %vm895_vm1, %v755_v20  ;;  %v15516_v20 = vshll.u32 %v12872_v56, 16  ;;  %v15526_v42 = vshrl.u32 %v12888_v9, 16  ;;  %v796_v53 = vshrl.u32 %v12395_v31, 16 }
  0x91   : > { %10756 = vmatprep.mubr.msk.bf16.mxu1 %vm895_vm1, %v763_v3  ;;  %v15519_v3 = vshll.u32 %v12878_v60, 16  ;;  %v787_v39 = vsel %vm511_vm3, %v782_v46, %v786_v63  ;;  %v13155_v63 = vld [vmem:[%s12759_s25 + $0x130] sm:$0xff]   ;;  %v13729_v60 = vld [vmem:[%s12759_s25 + $0xb8] sm:$0xff]  }
  0x92   : > { %11199 = vmatmul.mubr.msk.bf16.gmra.mrb[12].mxu0 %vm895_vm1, %v4971_v14  ;;  %v792_v14 = vshll.u32 %v12395_v31, 16 }
  0x93   : > { %11202 = vmatprep.mubr.msk.bf16.mxu0 %vm895_vm1, %v4975_v17  ;;  %v4985_v17 = vrot.slane %v15516_v20, 3  ;;  %v4989_v1 = vrot.slane %v15519_v3, 3  ;;  %v12397_v20 = vld [vmem:[%s12759_s25 + $0x128] sm:$0xff]   ;;  %v15521_v3 = vshrl.u32 %v12896_v23, 16 }
  0x94   : > { %v794_v38 = vrot.slane %v792_v14, 1  ;;  %v804_v14 = vshrl.u32 %v12396_v22, 16 }
  0x95   : > { %v4986_v58 = vor.u32 %v4985_v17, %v4984_v6  ;;  %v4990_v24 = vor.u32 %v4989_v1, %v4988_v15  ;;  %v4992_v17 = vrot.slane %v15526_v42, 2  ;;  %v802_v15 = vrot.slane %v800_v62, 1 }
  0x96   : > { %v795_v16 = vsel %vm511_vm3, %v790_v45, %v794_v38  ;;  %v4996_v31 = vrot.slane %v15521_v3, 2  ;;  %v816_v3 = vshll.u32 %v13155_v63, 16 }
  0x97   : > { %v4987_v6 = vsel %vm4931_vm4, %v4982_v25, %v4986_v58  ;;  %v4991_v1 = vsel %vm4931_vm4, %v4986_v58, %v4990_v24  ;;  %v798_v25 = vor.u32 %v796_v53, %v794_v38  ;;  %v806_v46 = vor.u32 %v804_v14, %v802_v15 }
  0x98   : > { %10757 = vmatmul.mubr.msk.bf16.gmra.mrb[60].mxu1 %vm895_vm1, %v771_v54  ;;  %v15520_v54 = vshll.u32 %v12888_v9, 16  ;;  %v15523_v58 = vshrl.u32 %v12907_v37, 16  ;;  %v15527_v38 = vshll.u32 %v12912_v43, 16  ;;  %v812_v14 = vshrl.u32 %v12397_v20, 16  ;;  %v5801_v9 = vld [vmem:[%s12759_s25 + $0x38] sm:$0xf] }
  0x99   : > { %10760 = vmatprep.mubr.msk.bf16.mxu1 %vm895_vm1, %v779_v47  ;;  %v15522_v47 = vshll.u32 %v12896_v23, 16  ;;  %v803_v53 = vsel %vm511_vm3, %v798_v25, %v802_v15  ;;  %v13184_v15 = vld [vmem:[%s12759_s25 + $0x140] sm:$0xff]   ;;  %v5800_v23 = vld [vmem:[%s12759_s25 + $0x34] sm:$0xf] }
  0x9a   : > { %11203 = vmatmul.mubr.msk.bf16.gmra.mrb[16].mxu0 %vm895_vm1, %v4979_v32  ;;  %v808_v32 = vshll.u32 %v12397_v20, 16  ;;  %v832_v42 = vshll.u32 %v13184_v15, 16 }
  0x9b   : > { %11206 = vmatprep.mubr.msk.bf16.mxu0 %vm895_vm1, %v4983_v4  ;;  %v4993_v4 = vrot.slane %v15520_v54, 3  ;;  %v4997_v22 = vrot.slane %v15522_v47, 3  ;;  %v13164_v54 = vld [vmem:[%s12759_s25 + $0x138] sm:$0xff]  }
  0x9c   : > { %v810_v45 = vrot.slane %v808_v32, 1 }
  0x9d   : > { %v4994_v62 = vor.u32 %v4993_v4, %v4992_v17  ;;  %v4998_v47 = vor.u32 %v4997_v22, %v4996_v31  ;;  %v824_v17 = vshll.u32 %v13164_v54, 16  ;;  %v818_v22 = vrot.slane %v816_v3, 1 }
  0x9e   : > { %v811_v32 = vsel %vm511_vm3, %v806_v46, %v810_v45  ;;  %v5005_v46 = vrot.slane %v15527_v38, 3 }
  0x9f   : > { %v4995_v4 = vsel %vm4931_vm4, %v4990_v24, %v4994_v62  ;;  %v4999_v20 = vsel %vm4931_vm4, %v4994_v62, %v4998_v47  ;;  %v814_v24 = vor.u32 %v812_v14, %v810_v45  ;;  %v15529_v62 = vshrl.u32 %v12926_v0, 16 }
  0xa0   : > { %10761 = vmatmul.mubr.msk.bf16.gmra.mrb[64].mxu1 %vm895_vm1, %v787_v39  ;;  %v15524_v39 = vshll.u32 %v12907_v37, 16  ;;  %v15533_v45 = vshll.u32 %v12932_v5, 16  ;;  %v5793_v37 = vld [vmem:[%s12759_s25 + $0x18] sm:$0xf] }
  0xa1   : > { %10764 = vmatprep.mubr.msk.bf16.mxu1 %vm895_vm1, %v795_v16  ;;  %v15525_v16 = vshrl.u32 %v12912_v43, 16  ;;  %v819_v14 = vsel %vm511_vm3, %v814_v24, %v818_v22 }
  0xa2   : > { %11207 = vmatmul.mubr.msk.bf16.gmra.mrb[20].mxu0 %vm895_vm1, %v4987_v6  ;;  %v820_v6 = vshrl.u32 %v13155_v63, 16  ;;  %v5001_v31 = vrot.slane %v15524_v39, 3  ;;  %v826_v39 = vrot.slane %v824_v17, 1  ;;  %v5013_v34 = vrot.slane %v15533_v45, 3 }
  0xa3   : > { %11210 = vmatprep.mubr.msk.bf16.mxu0 %vm895_vm1, %v4991_v1  ;;  %v5000_v1 = vrot.slane %v15523_v58, 2  ;;  %v5004_v25 = vrot.slane %v15525_v16, 2  ;;  %v15531_v16 = vshll.u32 %v12926_v0, 16 }
  0xa4   : > { %v822_v58 = vor.u32 %v820_v6, %v818_v22  ;;  %v828_v6 = vshrl.u32 %v13164_v54, 16  ;;  %v834_v22 = vrot.slane %v832_v42, 1 }
  0xa5   : > { %v5002_v3 = vor.u32 %v5001_v31, %v5000_v1  ;;  %v5006_v38 = vor.u32 %v5005_v46, %v5004_v25  ;;  %v13207_v31 = vld [vmem:[%s12759_s25 + $0x150] sm:$0xff]   ;;  %v5008_v25 = vrot.slane %v15529_v62, 2  ;;  %v5009_v46 = vrot.slane %v15531_v16, 3 }
  0xa6   : > { %v827_v17 = vsel %vm511_vm3, %v822_v58, %v826_v39  ;;  %v848_v16 = vshll.u32 %v13207_v31, 16 }
  0xa7   : > { %v5007_v58 = vsel %vm4931_vm4, %v5002_v3, %v5006_v38  ;;  %v5010_v42 = vor.u32 %v5009_v46, %v5008_v25  ;;  %v852_v25 = vshrl.u32 %v13207_v31, 16  ;;  %v856_v46 = vshll.u32 %v13224_v44, 16 }
  0xa8   : > { %10765 = vmatmul.mubr.msk.bf16.gmra.mrb[68].mxu1 %vm895_vm1, %v803_v53  ;;  %v13193_v53 = vld [vmem:[%s12759_s25 + $0x148] sm:$0xff]  }
  0xa9   : > { %10768 = vmatprep.mubr.msk.bf16.mxu1 %vm895_vm1, %v811_v32  ;;  %v15534_v32 = vshrl.u32 %v12932_v5, 16  ;;  %v840_v1 = vshll.u32 %v13193_v53, 16  ;;  %v4925_v5 = vld [vmem:[%s12759_s25 + $0x184] sm:$0x7] }
  0xaa   : > { %11211 = vmatmul.mubr.msk.bf16.gmra.mrb[24].mxu0 %vm895_vm1, %v4995_v4  ;;  %v836_v4 = vshrl.u32 %v13184_v15, 16 }
  0xab   : > { %11214 = vmatprep.mubr.msk.bf16.mxu0 %vm895_vm1, %v4999_v20  ;;  %v5003_v20 = vsel %vm4931_vm4, %v4998_v47, %v5002_v3  ;;  %v5012_v24 = vrot.slane %v15534_v32, 2  ;;  %v830_v47 = vor.u32 %v828_v6, %v826_v39  ;;  %v842_v27 = vrot.slane %v840_v1, 1  ;;  %v13242_v32 = vld [vmem:[%s12759_s25 + $0x1c] sm:$0xf] }
  0xac   : > { %v838_v62 = vor.u32 %v836_v4, %v834_v22  ;;  %v15535_v3 = vshrl.u32 %v12944_v29, 16  ;;  %v15539_v39 = vshrl.u32 %v12950_v35, 16  ;;  %v15540_v6 = vshll.u32 %v12950_v35, 16  ;;  %15754 = vst [vmem:[#allocation27_spill] sm:$0xff] %v13242_v32 }
  0xad   : > { %v5014_v45 = vor.u32 %v5013_v34, %v5012_v24  ;;  %v844_v4 = vshrl.u32 %v13193_v53, 16 }
  0xae   : > { %v843_v1 = vsel %vm511_vm3, %v838_v62, %v842_v27  ;;  %v5016_v34 = vrot.slane %v15535_v3, 2  ;;  %v13250_v62 = vld [vmem:[%s12759_s25 + $0x160] sm:$0xff]  }
  0xaf   : > { %v864_v3 = vshll.u32 %v13250_v62, 16 }
  0xb0   : > { %10769 = vmatmul.mubr.msk.bf16.gmra.mrb[72].mxu1 %vm895_vm1, %v819_v14  ;;  %v15536_v14 = vshll.u32 %v12944_v29, 16  ;;  %v2831_v29 = vld [vmem:[%s12759_s25 + $0x180] sm:$0xf] }
  0xb1   : > { %10772 = vmatprep.mubr.msk.bf16.mxu1 %vm895_vm1, %v827_v17  ;;  %v835_v17 = vsel %vm511_vm3, %v830_v47, %v834_v22  ;;  %v13245_v22 = vld [vmem:[%s12759_s25 + $0x20] sm:$0xf]  ;;  %v5021_v47 = vrot.slane %v15540_v6, 3  ;;  %v15545_v6 = vshll.u32 %v12961_v50, 16  ;;  %v9767_v43 = vcombine.low %v2831_v29, %v4925_v5 }
  0xb2   : > { %11215 = vmatmul.mubr.msk.bf16.gmra.mrb[28].mxu0 %vm895_vm1, %v5003_v20  ;;  %v850_v20 = vrot.slane %v848_v16, 1  ;;  %v5017_v24 = vrot.slane %v15536_v14, 3  ;;  %15755 = vst [vmem:[#allocation28_spill] sm:$0xff] %v13245_v22  ;;  %v5015_v16 = vsel %vm4931_vm4, %v5010_v42, %v5014_v45  ;;  %v846_v14 = vor.u32 %v844_v4, %v842_v27 }
  0xb3   : > { %11218 = vmatprep.mubr.msk.bf16.mxu0 %vm895_vm1, %v5007_v58  ;;  %v5011_v58 = vsel %vm4931_vm4, %v5006_v38, %v5010_v42  ;;  %v5020_v38 = vrot.slane %v15539_v39, 2  ;;  %v15544_v39 = vshrl.u32 %v12961_v50, 16  ;;  %v15548_v27 = vshrl.u32 %v12968_v59, 16 }
  0xb4   : > { %v854_v41 = vor.u32 %v852_v25, %v850_v20  ;;  %v5018_v42 = vor.u32 %v5017_v24, %v5016_v34  ;;  %v15547_v4 = vshll.u32 %v12968_v59, 16  ;;  %v860_v25 = vshrl.u32 %v13224_v44, 16 }
  0xb5   : > { %v5022_v36 = vor.u32 %v5021_v47, %v5020_v38  ;;  %v872_v34 = vshll.u32 %v13261_v10, 16  ;;  %v5025_v38 = vrot.slane %v15545_v6, 3  ;;  %v13280_v47 = vld [vmem:[%s12759_s25 + $0x178] sm:$0xf]  ;;  %v5028_v55 = vrot.slane %v15548_v27, 2 }
  0xb6   : > { %v5019_v24 = vsel %vm4931_vm4, %v5014_v45, %v5018_v42  ;;  %v5029_v45 = vrot.slane %v15547_v4, 3  ;;  %v15552_v27 = vshrl.u32 %v12982_v21, 16 }
  0xb8   : > { %10773 = vmatmul.mubr.msk.bf16.gmra.mrb[76].mxu1 %vm895_vm1, %v835_v17  ;;  %v858_v17 = vrot.slane %v856_v46, 1 }
  0xb9   : > { %10776 = vmatprep.mubr.msk.bf16.mxu1 %vm895_vm1, %v843_v1  ;;  %v851_v1 = vsel %vm511_vm3, %v846_v14, %v850_v20  ;;  %v268_v14 = vld [vmem:[%s12759_s25 + $0x17c] sm:$0x1]  ;;  %v866_v20 = vrot.slane %v864_v3, 1 }
  0xba   : > { %11219 = vmatmul.mubr.msk.bf16.gmra.mrb[32].mxu0 %vm895_vm1, %v5011_v58  ;;  %v859_v46 = vsel %vm511_vm3, %v854_v41, %v858_v17  ;;  %v868_v58 = vshrl.u32 %v13250_v62, 16  ;;  %v5023_v41 = vsel %vm4931_vm4, %v5018_v42, %v5022_v36  ;;  %v862_v6 = vor.u32 %v860_v25, %v858_v17  ;;  %v13303_v42 = vld [vmem:[%s15502_s1 + $0xe] sm:$0x3] }
  0xbb   : > { %11222 = vmatprep.mubr.msk.bf16.mxu0 %vm895_vm1, %v5015_v16  ;;  %v5024_v16 = vrot.slane %v15544_v39, 2  ;;  %v13293_v39 = vld [vmem:[%s12759_s25 + $0xd0] sm:$0xff]   ;;  %v13298_v3 = vcombine.low %v13280_v47, %v268_v14  ;;  %v15553_v17 = vshll.u32 %v12982_v21, 16  ;;  %12322 = vmatprep.subr.msk.bf16.mxu0 %vm1040_vm0, %v13303_v42  ;;  %v880_v25 = vshll.u32 %v13286_v57, 16 }
  0xbc   : > { %15756 = vst [vmem:[#allocation29_spill] sm:$0xff] %v13293_v39  ;;  %v870_v52 = vor.u32 %v868_v58, %v866_v20  ;;  %v15556_v58 = vshrl.u32 %v13293_v39, 16  ;;  %v884_v14 = vshrl.u32 %v13286_v57, 16 }
  0xbd   : > { %15757 = vst [vmem:[#allocation30_spill] sm:$0xff] %v13298_v3  ;;  %v5026_v4 = vor.u32 %v5025_v38, %v5024_v16  ;;  %v876_v16 = vshrl.u32 %v13261_v10, 16 }
  0xbf   : > { %v5027_v49 = vsel %vm4931_vm4, %v5022_v36, %v5026_v4  ;;  %v13333_v36 = vld [vmem:[%s12759_s25 + $0xe0] sm:$0xff]  }
  0xc0   : > { %10777 = vmatmul.mubr.msk.bf16.gmra.mrb[80].mxu1 %vm895_vm1, %v851_v1  ;;  %v874_v1 = vrot.slane %v872_v34, 1  ;;  %v15557_v34 = vshll.u32 %v13293_v39, 16  ;;  %15759 = vst [vmem:[#allocation32_spill] sm:$0xff] %v13333_v36  ;;  %v15560_v39 = vshll.u32 %v13333_v36, 16 }
  0xc1   : > { %10780 = vmatprep.mubr.msk.bf16.mxu1 %vm895_vm1, %v859_v46  ;;  %v5030_v46 = vor.u32 %v5029_v45, %v5028_v55  ;;  %v5032_v55 = vrot.slane %v15552_v27, 2  ;;  %v5033_v45 = vrot.slane %v15553_v17, 3 }
  0xc2   : > { %11223 = vmatmul.mubr.msk.bf16.gmra.mrb[36].mxu0 %vm895_vm1, %v5019_v24  ;;  %v867_v24 = vsel %vm511_vm3, %v862_v6, %v866_v20  ;;  %v875_v38 = vsel %vm511_vm3, %v870_v52, %v874_v1  ;;  %v882_v6 = vrot.slane %v880_v25, 1  ;;  %v5036_v52 = vrot.slane %v15556_v58, 2 }
  0xc3   : > { %11226 = vmatprep.mubr.msk.bf16.mxu0 %vm895_vm1, %v5023_v41  ;;  %v888_v41 = vshll.u32 %v13298_v3, 16  ;;  %v5031_v20 = vsel %vm4931_vm4, %v5026_v4, %v5030_v46  ;;  %v5037_v8 = vrot.slane %v15557_v34, 3  ;;  %v878_v27 = vor.u32 %v876_v16, %v874_v1 }
  0xc4   : > { %v886_v17 = vor.u32 %v884_v14, %v882_v6  ;;  %v5034_v25 = vor.u32 %v5033_v45, %v5032_v55  ;;  %v15575_v4 = vshrl.u32 %v13324_v12, 16  ;;  %v15561_v34 = vshrl.u32 %v13333_v36, 16 }
  0xc5   : > { %v890_v21 = vrot.slane %v888_v41, 1  ;;  %v5038_v58 = vor.u32 %v5037_v8, %v5036_v52  ;;  %v883_v1 = vsel %vm511_vm3, %v878_v27, %v882_v6  ;;  %v13350_v41 = vld [vmem:[%s12759_s25 + $0xe8] sm:$0xff]   ;;  %v892_v8 = vshrl.u32 %v13298_v3, 16 }
  0xc6   : > { %15760 = vst [vmem:[#allocation33_spill] sm:$0xff] %v13350_v41  ;;  %v5044_v27 = vrot.slane %v15561_v34, 2  ;;  %v15569_v6 = vshrl.u32 %v13350_v41, 16 }
  0xc7   : > { %v891_v16 = vsel %vm511_vm3, %v886_v17, %v890_v21  ;;  %v5039_v55 = vsel %vm4931_vm4, %v5034_v25, %v5038_v58  ;;  %v5045_v17 = vrot.slane %v15560_v39, 3  ;;  %v894_v52 = vor.u32 %v892_v8, %v890_v21 }
  0xc8   : > { %10781 = vmatmul.mubr.msk.bf16.gmra.mrb[84].mxu1 %vm895_vm1, %v867_v24  ;;  %v15570_v24 = vshll.u32 %v13324_v12, 16 }
  0xc9   : > { %10784 = vmatprep.mubr.msk.bf16.mxu1 %vm895_vm1, %v875_v38  ;;  %v5040_v38 = vrot.slane %v15575_v4, 2 }
  0xca   : > { %11227 = vmatmul.mubr.msk.bf16.gmra.mrb[40].mxu0 %vm895_vm1, %v5027_v49  ;;  %v5035_v49 = vsel %vm4931_vm4, %v5030_v46, %v5034_v25  ;;  %v5041_v14 = vrot.slane %v15570_v24, 3  ;;  %v13360_v46 = vld [vmem:[%s12759_s25 + $0xf0] sm:$0xff]   ;;  %v5046_v25 = vor.u32 %v5045_v17, %v5044_v27 }
  0xcb   : > { %11230 = vmatprep.mubr.msk.bf16.mxu0 %vm895_vm1, %v5031_v20  ;;  %15761 = vst [vmem:[#allocation34_spill] sm:$0xff] %v13360_v46  ;;  %v15568_v20 = vshll.u32 %v13350_v41, 16  ;;  %v15562_v39 = vshll.u32 %v13360_v46, 16 }
  0xcc   : > { %v5042_v45 = vor.u32 %v5041_v14, %v5040_v38 }
  0xcd   : > { %v5053_v14 = vrot.slane %v15562_v39, 3 }
  0xce   : > { %v5043_v34 = vsel %vm4931_vm4, %v5038_v58, %v5042_v45  ;;  %v5047_v38 = vsel %vm4931_vm4, %v5042_v45, %v5046_v25  ;;  %v13384_v58 = vld [vmem:[%s12759_s25 + $0x100] sm:$0xff]  }
  0xcf   : > { %15763 = vst [vmem:[#allocation36_spill] sm:$0xff] %v13384_v58  ;;  %v15566_v39 = vshll.u32 %v13384_v58, 16 }
  0xd0   : > { %10785 = vmatmul.mubr.msk.bf16.gmra.mrb[88].mxu1 %vm895_vm1, %v883_v1  ;;  %v15563_v1 = vshrl.u32 %v13360_v46, 16 }
  0xd1   : > { %10788 = vmatprep.mubr.msk.bf16.mxu1 %vm895_vm1, %v891_v16  ;;  %v5048_v16 = vrot.slane %v15569_v6, 2 }
  0xd2   : > { %11231 = vmatmul.mubr.msk.bf16.gmra.mrb[44].mxu0 %vm895_vm1, %v5035_v49  ;;  %v5049_v49 = vrot.slane %v15568_v20, 3  ;;  %v5052_v21 = vrot.slane %v15563_v1, 2  ;;  %v2224_v1 = vsel %vm1040_vm0, %v13022_v26, 0 }
  0xd3   : > { %11234 = vmatprep.mubr.msk.bf16.mxu0 %vm895_vm1, %v5039_v55  ;;  %v13375_v55 = vld [vmem:[%s12759_s25 + $0xf8] sm:$0xff]  }
  0xd4   : > { %15762 = vst [vmem:[#allocation35_spill] sm:$0xff] %v13375_v55  ;;  %v5050_v8 = vor.u32 %v5049_v49, %v5048_v16  ;;  %v15567_v27 = vshrl.u32 %v13375_v55, 16  ;;  %v15564_v17 = vshll.u32 %v13375_v55, 16  ;;  %v5054_v45 = vor.u32 %v5053_v14, %v5052_v21  ;;  %v13402_v49 = vld [vmem:[%s12759_s25 + $0x108] sm:$0xff]   ;;  %v13415_v14 = vld [vmem:[%s12759_s25 + $0x110] sm:$0xff]  }
  0xd5   : > { %15764 = vst [vmem:[#allocation37_spill] sm:$0xff] %v13402_v49  ;;  %15765 = vst [vmem:[#allocation38_spill] sm:$0xff] %v13415_v14  ;;  %v15572_v20 = vshrl.u32 %v13415_v14, 16 }
  0xd6   : > { %v5057_v16 = vrot.slane %v15564_v17, 3  ;;  %v5055_v21 = vsel %vm4931_vm4, %v5050_v8, %v5054_v45  ;;  %v13418_v17 = vld [vmem:[%s12759_s25 + $0x10] sm:$0xff]  }
  0xd8   : > { %10789 = vmatmul.mubr.msk.bf16.gmra.mrb[92].mxu1 %vm895_vm1, %v894_v52  ;;  %v15565_v52 = vshrl.u32 %v13384_v58, 16 }
  0xd9   : > { %10794 = vmatprep.mubr.msk.bf16.mxu1 %vm895_vm1, %v12779_v19  ;;  %v5051_v19 = vsel %vm4931_vm4, %v5046_v25, %v5050_v8  ;;  %v5061_v25 = vrot.slane %v15566_v39, 3  ;;  %v15571_v39 = vshll.u32 %v13402_v49, 16 }
  0xda   : > { %11235 = vmatmul.mubr.msk.bf16.gmra.mrb[48].mxu0 %vm895_vm1, %v5043_v34  ;;  %v5056_v34 = vrot.slane %v15567_v27, 2  ;;  %v5060_v26 = vrot.slane %v15565_v52, 2  ;;  %v15573_v52 = vshrl.u32 %v13402_v49, 16 }
  0xdb   : > { %11238 = vmatprep.mubr.msk.bf16.mxu0 %vm895_vm1, %v5047_v38  ;;  %v13405_v38 = vld [vmem:[%s12759_s25 + $0x8] sm:$0xff]  }
  0xdc   : > { %v5058_v8 = vor.u32 %v5057_v16, %v5056_v34  ;;  %v5062_v27 = vor.u32 %v5061_v25, %v5060_v26  ;;  %v5064_v24 = vrot.slane %v15573_v52, 2  ;;  %v13437_v34 = vld [vmem:[%s12759_s25 + $0x18] sm:$0xff]   ;;  %v5068_v26 = vrot.slane %v15572_v20, 2  ;;  %v13447_v25 = vld [vmem:[%s12759_s25 + $0x120] sm:$0xff]  }
  0xdd   : > { %15767 = vst [vmem:[#allocation40_spill] sm:$0xff] %v13447_v25  ;;  %v15583_v4 = vshrl.u32 %v13447_v25, 16 }
  0xde   : > { %v5059_v6 = vsel %vm4931_vm4, %v5054_v45, %v5058_v8  ;;  %v5063_v16 = vsel %vm4931_vm4, %v5058_v8, %v5062_v27 }
  0xe0   : > { %10795 = vmatmul.mubr.msk.bf16.vlgmr.msra.gmra.mrb[0].mxu1 %vm895_vm1, %v13405_v38 }
  0xe1   : > { %10891 = vmatpush3.bf16.msra.mxu1 %v2224_v1  ;;  %10798 = vmatprep.mubr.msk.bf16.mxu1 %vm895_vm1, %v13418_v17  ;;  %v15574_v1 = vshll.u32 %v13415_v14, 16  ;;  %v15585_v14 = vshll.u32 %v13447_v25, 16 }
  0xe2   : > { %11239 = vmatmul.mubr.msk.bf16.gmra.mrb[52].mxu0 %vm895_vm1, %v5051_v19  ;;  %v5065_v19 = vrot.slane %v15571_v39, 3  ;;  %v13450_v39 = vld [vmem:[%s12759_s25 + $0x20] sm:$0xff]  }
  0xe3   : > { %11242 = vmatprep.mubr.msk.bf16.mxu0 %vm895_vm1, %v5055_v21  ;;  %v13434_v21 = vld [vmem:[%s12759_s25 + $0x118] sm:$0xff]   ;;  %v5069_v45 = vrot.slane %v15574_v1, 3 }
  0xe4   : > { %15766 = vst [vmem:[#allocation39_spill] sm:$0xff] %v13434_v21  ;;  %v5066_v8 = vor.u32 %v5065_v19, %v5064_v24  ;;  %v15584_v20 = vshrl.u32 %v13434_v21, 16  ;;  %v15582_v52 = vshll.u32 %v13434_v21, 16  ;;  %v13469_v24 = vld [vmem:[%s12759_s25 + $0x28] sm:$0xff]  }
  0xe5   : > { %v5070_v1 = vor.u32 %v5069_v45, %v5068_v26  ;;  %v5076_v26 = vrot.slane %v15583_v4, 2  ;;  %v13479_v45 = vld [vmem:[%s12759_s25 + $0x130] sm:$0xff]  }
  0xe6   : > { %v5067_v49 = vsel %vm4931_vm4, %v5062_v27, %v5066_v8  ;;  %v5072_v58 = vrot.slane %v15584_v20, 2  ;;  %v5077_v27 = vrot.slane %v15585_v14, 3  ;;  %15769 = vst [vmem:[#allocation42_spill] sm:$0xff] %v13479_v45  ;;  %v15595_v25 = vshrl.u32 %v13479_v45, 16 }
  0xe7   : > { %v5071_v19 = vsel %vm4931_vm4, %v5066_v8, %v5070_v1  ;;  %v15597_v21 = vshll.u32 %v13479_v45, 16 }
  0xe8   : > { %10799 = vmatmul.mubr.msk.bf16.gmra.mrb[4].mxu1 %vm895_vm1, %v13437_v34  ;;  %v5078_v14 = vor.u32 %v5077_v27, %v5076_v26  ;;  %v5084_v26 = vrot.slane %v15595_v25, 2  ;;  %v13511_v27 = vld [vmem:[%s12759_s25 + $0x140] sm:$0xff]  }
  0xe9   : > { %10802 = vmatprep.mubr.msk.bf16.mxu1 %vm895_vm1, %v13450_v39  ;;  %15771 = vst [vmem:[#allocation44_spill] sm:$0xff] %v13511_v27  ;;  %v15607_v45 = vshrl.u32 %v13511_v27, 16 }
  0xea   : > { %11243 = vmatmul.mubr.msk.bf16.gmra.mrb[56].mxu0 %vm895_vm1, %v5059_v6  ;;  %v5073_v6 = vrot.slane %v15582_v52, 3  ;;  %v13482_v52 = vld [vmem:[%s12759_s25 + $0x30] sm:$0xff]  }
  0xeb   : > { %11246 = vmatprep.mubr.msk.bf16.mxu0 %vm895_vm1, %v5063_v16  ;;  %v13466_v16 = vld [vmem:[%s12759_s25 + $0x128] sm:$0xff]  }
  0xec   : > { %15768 = vst [vmem:[#allocation41_spill] sm:$0xff] %v13466_v16  ;;  %v5074_v8 = vor.u32 %v5073_v6, %v5072_v58  ;;  %v15596_v4 = vshrl.u32 %v13466_v16, 16  ;;  %v15594_v20 = vshll.u32 %v13466_v16, 16  ;;  %v13501_v58 = vld [vmem:[%s12759_s25 + $0x38] sm:$0xff]   ;;  %v15609_v16 = vshll.u32 %v13511_v27, 16 }
  0xee   : > { %v5075_v55 = vsel %vm4931_vm4, %v5070_v1, %v5074_v8  ;;  %v5080_v46 = vrot.slane %v15596_v4, 2  ;;  %v5079_v6 = vsel %vm4931_vm4, %v5074_v8, %v5078_v14  ;;  %v5085_v1 = vrot.slane %v15597_v21, 3 }
  0xf0   : > { %10803 = vmatmul.mubr.msk.bf16.gmra.mrb[8].mxu1 %vm895_vm1, %v13469_v24  ;;  %v5086_v21 = vor.u32 %v5085_v1, %v5084_v26  ;;  %v5092_v26 = vrot.slane %v15607_v45, 2  ;;  %v13543_v1 = vld [vmem:[%s12759_s25 + $0x150] sm:$0xff]  }
  0xf1   : > { %10806 = vmatprep.mubr.msk.bf16.mxu1 %vm895_vm1, %v13482_v52  ;;  %15773 = vst [vmem:[#allocation46_spill] sm:$0xff] %v13543_v1  ;;  %v15619_v27 = vshrl.u32 %v13543_v1, 16 }
  0xf2   : > { %11247 = vmatmul.mubr.msk.bf16.gmra.mrb[60].mxu0 %vm895_vm1, %v5067_v49  ;;  %v5081_v49 = vrot.slane %v15594_v20, 3  ;;  %v13514_v20 = vld [vmem:[%s12759_s25 + $0x40] sm:$0xff]  }
  0xf3   : > { %11250 = vmatprep.mubr.msk.bf16.mxu0 %vm895_vm1, %v5071_v19  ;;  %v13498_v19 = vld [vmem:[%s12759_s25 + $0x138] sm:$0xff]  }
  0xf4   : > { %15770 = vst [vmem:[#allocation43_spill] sm:$0xff] %v13498_v19  ;;  %v5082_v8 = vor.u32 %v5081_v49, %v5080_v46  ;;  %v15608_v25 = vshrl.u32 %v13498_v19, 16  ;;  %v15606_v4 = vshll.u32 %v13498_v19, 16  ;;  %v13533_v46 = vld [vmem:[%s12759_s25 + $0x48] sm:$0xff]   ;;  %v15621_v19 = vshll.u32 %v13543_v1, 16 }
  0xf6   : > { %v5083_v41 = vsel %vm4931_vm4, %v5078_v14, %v5082_v8  ;;  %v5088_v36 = vrot.slane %v15608_v25, 2  ;;  %v5087_v49 = vsel %vm4931_vm4, %v5082_v8, %v5086_v21  ;;  %v5093_v14 = vrot.slane %v15609_v16, 3 }
  0xf8   : > { %10807 = vmatmul.mubr.msk.bf16.gmra.mrb[12].mxu1 %vm895_vm1, %v13501_v58  ;;  %v5094_v16 = vor.u32 %v5093_v14, %v5092_v26  ;;  %v5100_v26 = vrot.slane %v15619_v27, 2  ;;  %v13575_v14 = vld [vmem:[%s12759_s25 + $0x160] sm:$0xff]  }
  0xf9   : > { %10810 = vmatprep.mubr.msk.bf16.mxu1 %vm895_vm1, %v13514_v20  ;;  %15775 = vst [vmem:[#allocation48_spill] sm:$0xff] %v13575_v14  ;;  %v15632_v1 = vshrl.u32 %v13575_v14, 16 }
  0xfa   : > { %11251 = vmatmul.mubr.msk.bf16.gmra.mrb[64].mxu0 %vm895_vm1, %v5075_v55  ;;  %v5089_v55 = vrot.slane %v15606_v4, 3  ;;  %v13546_v4 = vld [vmem:[%s12759_s25 + $0x50] sm:$0xff]  }
  0xfb   : > { %11254 = vmatprep.mubr.msk.bf16.mxu0 %vm895_vm1, %v5079_v6  ;;  %v13530_v6 = vld [vmem:[%s12759_s25 + $0x148] sm:$0xff]  }
  0xfc   : > { %15772 = vst [vmem:[#allocation45_spill] sm:$0xff] %v13530_v6  ;;  %v5090_v8 = vor.u32 %v5089_v55, %v5088_v36  ;;  %v15620_v45 = vshrl.u32 %v13530_v6, 16  ;;  %v15618_v25 = vshll.u32 %v13530_v6, 16  ;;  %v13565_v36 = vld [vmem:[%s12759_s25 + $0x58] sm:$0xff]   ;;  %v15633_v6 = vshll.u32 %v13575_v14, 16 }
  0xfe   : > { %v5091_v12 = vsel %vm4931_vm4, %v5086_v21, %v5090_v8  ;;  %v5096_v59 = vrot.slane %v15620_v45, 2  ;;  %v5095_v55 = vsel %vm4931_vm4, %v5090_v8, %v5094_v16  ;;  %v5101_v21 = vrot.slane %v15621_v19, 3 }
 0x100   : > { %10811 = vmatmul.mubr.msk.bf16.gmra.mrb[16].mxu1 %vm895_vm1, %v13533_v46  ;;  %v5102_v19 = vor.u32 %v5101_v21, %v5100_v26  ;;  %v5109_v26 = vrot.slane %v15633_v6, 3  ;;  %v13607_v21 = vld [vmem:[%s12759_s25 + $0x170] sm:$0xff]  }
 0x101   : > { %10814 = vmatprep.mubr.msk.bf16.mxu1 %vm895_vm1, %v13546_v4  ;;  %15777 = vst [vmem:[#allocation50_spill] sm:$0xff] %v13607_v21  ;;  %v15649_v14 = vshrl.u32 %v13607_v21, 16 }
 0x102   : > { %11255 = vmatmul.mubr.msk.bf16.gmra.mrb[68].mxu0 %vm895_vm1, %v5083_v41  ;;  %v5097_v41 = vrot.slane %v15618_v25, 3  ;;  %v13578_v25 = vld [vmem:[%s12759_s25 + $0x60] sm:$0xff]  }
 0x103   : > { %11258 = vmatprep.mubr.msk.bf16.mxu0 %vm895_vm1, %v5087_v49  ;;  %v13562_v49 = vld [vmem:[%s12759_s25 + $0x158] sm:$0xff]  }
 0x104   : > { %15774 = vst [vmem:[#allocation47_spill] sm:$0xff] %v13562_v49  ;;  %v5098_v8 = vor.u32 %v5097_v41, %v5096_v59  ;;  %v15631_v27 = vshrl.u32 %v13562_v49, 16  ;;  %v15630_v45 = vshll.u32 %v13562_v49, 16  ;;  %v13597_v59 = vld [vmem:[%s12759_s25 + $0x68] sm:$0xff]   ;;  %v15648_v49 = vshll.u32 %v13607_v21, 16 }
 0x106   : > { %v5099_v50 = vsel %vm4931_vm4, %v5094_v16, %v5098_v8  ;;  %v5104_v35 = vrot.slane %v15631_v27, 2  ;;  %v5103_v41 = vsel %vm4931_vm4, %v5098_v8, %v5102_v19  ;;  %v5108_v16 = vrot.slane %v15632_v1, 2 }
 0x108   : > { %10815 = vmatmul.mubr.msk.bf16.gmra.mrb[20].mxu1 %vm895_vm1, %v13565_v36  ;;  %v5110_v6 = vor.u32 %v5109_v26, %v5108_v16  ;;  %v5116_v26 = vrot.slane %v15649_v14, 2  ;;  %v5125_v14 = vshrl.u32 %v9767_v43, 16 }
 0x109   : > { %10818 = vmatprep.mubr.msk.bf16.mxu1 %vm895_vm1, %v13578_v25 }
 0x10a   : > { %11259 = vmatmul.mubr.msk.bf16.gmra.mrb[72].mxu0 %vm895_vm1, %v5091_v12  ;;  %v5105_v12 = vrot.slane %v15630_v45, 3  ;;  %v13610_v45 = vld [vmem:[%s12759_s25 + $0x70] sm:$0xff]  }
 0x10b   : > { %11262 = vmatprep.mubr.msk.bf16.mxu0 %vm895_vm1, %v5095_v55  ;;  %v13594_v55 = vld [vmem:[%s12759_s25 + $0x168] sm:$0xff]  }
 0x10c   : > { %15776 = vst [vmem:[#allocation49_spill] sm:$0xff] %v13594_v55  ;;  %v5106_v8 = vor.u32 %v5105_v12, %v5104_v35  ;;  %v15646_v27 = vshrl.u32 %v13594_v55, 16  ;;  %v15647_v1 = vshll.u32 %v13594_v55, 16  ;;  %v13628_v12 = vld [vmem:[%s12759_s25 + $0x178] sm:$0xff]   ;;  %v13668_v55 = vld [vmem:[%s12759_s25 + $0x90] sm:$0xff]  }
 0x10d   : > { %15778 = vst [vmem:[#allocation51_spill] sm:$0xff] %v13628_v12  ;;  %v15654_v5 = vshll.u32 %v13628_v12, 16 }
 0x10e   : > { %v5107_v0 = vsel %vm4931_vm4, %v5102_v19, %v5106_v8  ;;  %v5113_v35 = vrot.slane %v15647_v1, 3  ;;  %v5111_v16 = vsel %vm4931_vm4, %v5106_v8, %v5110_v6  ;;  %v5117_v19 = vrot.slane %v15648_v49, 3  ;;  %v13649_v1 = vld [vmem:[%s15502_s1 + $0x6] sm:$0x3] }
 0x10f   : > { %v15655_v49 = vshrl.u32 %v13628_v12, 16  ;;  %12317 = vmatprep.subr.msk.bf16.mxu1 %vm1040_vm0, %v13649_v1  ;;  %v5792_v12 = vld [vmem:[%s12759_s25 + $0x14] sm:$0xf] }
 0x110   : > { %10819 = vmatmul.mubr.msk.bf16.gmra.mrb[24].mxu1 %vm895_vm1, %v13597_v59  ;;  %v5118_v29 = vor.u32 %v5117_v19, %v5116_v26  ;;  %v5127_v19 = vrot.slane %v5125_v14, 2 }
 0x111   : > { %10822 = vmatprep.mubr.msk.bf16.mxu1 %vm895_vm1, %v13610_v45 }
 0x112   : > { %11263 = vmatmul.mubr.msk.bf16.gmra.mrb[76].mxu0 %vm895_vm1, %v5099_v50  ;;  %v5112_v50 = vrot.slane %v15646_v27, 2  ;;  %v13641_v27 = vld [vmem:[%s12759_s25 + $0x80] sm:$0xff]  }
 0x113   : > { %11266 = vmatprep.mubr.msk.bf16.mxu0 %vm895_vm1, %v5103_v41  ;;  %v13631_v41 = vld [vmem:[%s12759_s25 + $0x78] sm:$0xff]  }
 0x114   : > { %v5114_v8 = vor.u32 %v5113_v35, %v5112_v50  ;;  %v5121_v50 = vrot.slane %v15654_v5, 3  ;;  %v13662_v35 = vld [vmem:[%s12759_s25 + $0x88] sm:$0xff]  }
 0x116   : > { %v5115_v21 = vsel %vm4931_vm4, %v5110_v6, %v5114_v8  ;;  %v5119_v26 = vsel %vm4931_vm4, %v5114_v8, %v5118_v29  ;;  %v13679_v8 = vld [vmem:[%s12759_s25 + $0x98] sm:$0xff]  }
 0x118   : > { %10823 = vmatmul.mubr.msk.bf16.gmra.mrb[28].mxu1 %vm895_vm1, %v13631_v41 }
 0x119   : > { %10826 = vmatprep.mubr.msk.bf16.mxu1 %vm895_vm1, %v13641_v27 }
 0x11a   : > { %11267 = vmatmul.mubr.msk.bf16.gmra.mrb[80].mxu0 %vm895_vm1, %v5107_v0  ;;  %v5128_v0 = vshll.u32 %v9767_v43, 16 }
 0x11b   : > { %11270 = vmatprep.mubr.msk.bf16.mxu0 %vm895_vm1, %v5111_v16  ;;  %v5120_v16 = vrot.slane %v15655_v49, 2  ;;  %v5791_v49 = vld [vmem:[%s12759_s25 + $0x10] sm:$0x8] }
 0x11c   : > { %v5130_v43 = vrot.slane %v5128_v0, 3  ;;  %v13684_v0 = vcombine.low %v5791_v49, %v5792_v12  ;;  %v5798_v12 = vld [vmem:[%s12759_s25 + $0x2c] sm:$0xf] }
 0x11d   : > { %v5122_v6 = vor.u32 %v5121_v50, %v5120_v16  ;;  %v13687_v16 = vcombine.low %v5793_v37, %v13242_v32  ;;  %v13690_v50 = vld [vmem:[%s12759_s25 + $0xa0] sm:$0xff]   ;;  %v5797_v37 = vld [vmem:[%s12759_s25 + $0x28] sm:$0xf]  ;;  %v5799_v32 = vld [vmem:[%s12759_s25 + $0x30] sm:$0xf] }
 0x11e   : > { %v5131_v5 = vor.u32 %v5130_v43, %v5127_v19  ;;  %v13705_v43 = vld [vmem:[%s12759_s25 + $0xa8] sm:$0xff]  }
 0x11f   : > { %v5123_v14 = vsel %vm4931_vm4, %v5118_v29, %v5122_v6  ;;  %v5796_v29 = vld [vmem:[%s12759_s25 + $0x24] sm:$0xf]  ;;  %v6131_v49 = vrot.slane %v13687_v16, 3 }
 0x120   : > { %10827 = vmatmul.mubr.msk.bf16.gmra.mrb[32].mxu1 %vm895_vm1, %v13662_v35  ;;  %v13702_v19 = vcombine.low %v13245_v22, %v5796_v29 }
 0x121   : > { %10830 = vmatprep.mubr.msk.bf16.mxu1 %vm895_vm1, %v13668_v55 }
 0x122   : > { %11271 = vmatmul.mubr.msk.bf16.gmra.mrb[84].mxu0 %vm895_vm1, %v5115_v21  ;;  %v5132_v21 = vsel %vm4931_vm4, %v5122_v6, %v5131_v5  ;;  %v6133_v29 = vrot.slane %v13702_v19, 3 }
 0x123   : > { %11274 = vmatprep.mubr.msk.bf16.mxu0 %vm895_vm1, %v5119_v26  ;;  %v6130_v26 = vrot.slane %v13684_v0, 3 }
 0x125   : > { %v6132_v6 = vsel %vm6129_vm5, %v6130_v26, %v6131_v49  ;;  %v5802_v26 = vld [vmem:[%s12759_s25 + $0x3c] sm:$0xf] }
 0x126   : > { %v13736_v56 = vcombine.low %v5801_v9, %v5802_v26  ;;  %v5805_v9 = vld [vmem:[%s12759_s25 + $0x48] sm:$0xf] }
 0x128   : > { %10831 = vmatmul.mubr.msk.bf16.gmra.mrb[36].mxu1 %vm895_vm1, %v13679_v8 }
 0x129   : > { %10834 = vmatprep.mubr.msk.bf16.mxu1 %vm895_vm1, %v13690_v50 }
 0x12a   : > { %11275 = vmatmul.mubr.msk.bf16.gmra.mrb[88].mxu0 %vm895_vm1, %v5123_v14  ;;  %v13710_v14 = vcombine.low %v5797_v37, %v5798_v12  ;;  %v6134_v37 = vsel %vm6129_vm5, %v6131_v49, %v6133_v29  ;;  %v13726_v12 = vcombine.low %v5799_v32, %v5800_v23  ;;  %v6139_v32 = vrot.slane %v13736_v56, 3  ;;  %v5803_v49 = vld [vmem:[%s12759_s25 + $0x40] sm:$0xf] }
 0x12b   : > { %11278 = vmatprep.mubr.msk.bf16.mxu0 %vm895_vm1, %v5132_v21  ;;  %v13713_v21 = vld [vmem:[%s12759_s25 + $0xb0] sm:$0xff]  }
 0x12c   : > { %v6135_v22 = vrot.slane %v13710_v14, 3  ;;  %v6137_v23 = vrot.slane %v13726_v12, 3 }
 0x12e   : > { %v6138_v26 = vsel %vm6129_vm5, %v6135_v22, %v6137_v23 }
 0x130   : > { %10835 = vmatmul.mubr.msk.bf16.gmra.mrb[40].mxu1 %vm895_vm1, %v13705_v43 }
 0x131   : > { %10838 = vmatprep.mubr.msk.bf16.mxu1 %vm895_vm1, %v13713_v21 }
 0x132   : > { %11279 = vmatmul.mubr.msk.bf16.gmra.mrb[92].mxu0 %vm895_vm1, %v5131_v5  ;;  %v6136_v5 = vsel %vm6129_vm5, %v6133_v29, %v6135_v22  ;;  %v5806_v29 = vld [vmem:[%s12759_s25 + $0x4c] sm:$0xf] }
 0x133   : > { %11284 = vmatprep.mubr.msk.bf16.mxu0 %vm895_vm1, %v6132_v6  ;;  %v7466_v6 = vsel %vm1040_vm0, %v13303_v42, 0  ;;  %v5804_v42 = vld [vmem:[%s12759_s25 + $0x44] sm:$0xf] }
 0x134   : > { %v13752_v33 = vcombine.low %v5803_v49, %v5804_v42  ;;  %v5807_v42 = vld [vmem:[%s12759_s25 + $0x50] sm:$0xf] }
 0x135   : > { %v13776_v61 = vcombine.low %v5807_v42, %v5808_v13  ;;  %v5811_v42 = vld [vmem:[%s12759_s25 + $0x60] sm:$0xf] }
 0x136   : > { %v6141_v22 = vrot.slane %v13752_v33, 3  ;;  %v13800_v30 = vcombine.low %v5811_v42, %v5812_v48  ;;  %v5815_v42 = vld [vmem:[%s12759_s25 + $0x70] sm:$0xf] }
 0x137   : > { %v6145_v13 = vrot.slane %v13776_v61, 3  ;;  %v13824_v3 = vcombine.low %v5815_v42, %v5816_v7  ;;  %v5819_v42 = vld [vmem:[%s12759_s25 + $0x80] sm:$0xf] }
 0x138   : > { %10839 = vmatmul.mubr.msk.bf16.gmra.mrb[44].mxu1 %vm895_vm1, %v13729_v60  ;;  %15779 = vst [vmem:[#allocation52_spill] sm:$0xff] %v13800_v30  ;;  %v6149_v48 = vrot.slane %v13800_v30, 3  ;;  %v5820_v30 = vld [vmem:[%s12759_s25 + $0x84] sm:$0xf] }
 0x139   : > { %10842 = vmatprep.mubr.msk.bf16.mxu1 %vm895_vm1, %v13739_v40  ;;  %15782 = vst [vmem:[#allocation55_spill] sm:$0xff] %v13824_v3  ;;  %v6153_v7 = vrot.slane %v13824_v3, 3  ;;  %v5824_v3 = vld [vmem:[%s12759_s25 + $0x94] sm:$0xf] }
 0x13a   : > { %11285 = vmatmul.mubr.msk.bf16.vlgmr.msra.gmra.mrb[0].mxu0 %vm895_vm1, %v6134_v37  ;;  %v13755_v37 = vld [vmem:[%s12759_s25 + $0xc8] sm:$0xff]  }
 0x13b   : > { %11288 = vmatprep.mubr.msk.bf16.mxu0 %vm895_vm1, %v6136_v5  ;;  %11381 = vmatpush3.bf16.msra.mxu0 %v7466_v6  ;;  %v6140_v5 = vsel %vm6129_vm5, %v6137_v23, %v6139_v32  ;;  %v13760_v6 = vcombine.low %v5805_v9, %v5806_v29  ;;  %v5809_v23 = vld [vmem:[%s12759_s25 + $0x58] sm:$0xf]  ;;  %v5810_v9 = vld [vmem:[%s12759_s25 + $0x5c] sm:$0xf]  ;;  %v6142_v29 = vsel %vm6129_vm5, %v6139_v32, %v6141_v22 }
 0x13d   : > { %v6143_v49 = vrot.slane %v13760_v6, 3 }
 0x140   : > { %10843 = vmatmul.mubr.msk.bf16.gmra.mrb[48].mxu1 %vm895_vm1, %v13755_v37 }
 0x141   : > { %10846 = vmatprep.mubr.msk.bf16.mxu1 %vm895_vm1, %v13763_v18 }
 0x142   : > { %11289 = vmatmul.mubr.msk.bf16.gmra.mrb[4].mxu0 %vm895_vm1, %v6138_v26  ;;  %v6144_v26 = vsel %vm6129_vm5, %v6141_v22, %v6143_v49  ;;  %v5813_v22 = vld [vmem:[%s12759_s25 + $0x68] sm:$0xf] }
 0x143   : > { %11292 = vmatprep.mubr.msk.bf16.mxu0 %vm895_vm1, %v6140_v5  ;;  %v13784_v5 = vcombine.low %v5809_v23, %v5810_v9  ;;  %v5814_v23 = vld [vmem:[%s12759_s25 + $0x6c] sm:$0xf]  ;;  %v6146_v9 = vsel %vm6129_vm5, %v6143_v49, %v6145_v13 }
 0x145   : > { %v6147_v32 = vrot.slane %v13784_v5, 3 }
 0x148   : > { %10847 = vmatmul.mubr.msk.bf16.gmra.mrb[52].mxu1 %vm895_vm1, %v13779_v51 }
 0x149   : > { %10850 = vmatprep.mubr.msk.bf16.mxu1 %vm895_vm1, %v13787_v2 }
 0x14a   : > { %11293 = vmatmul.mubr.msk.bf16.gmra.mrb[8].mxu0 %vm895_vm1, %v6142_v29  ;;  %v6148_v29 = vsel %vm6129_vm5, %v6145_v13, %v6147_v32  ;;  %v5817_v13 = vld [vmem:[%s12759_s25 + $0x78] sm:$0xf] }
 0x14b   : > { %11296 = vmatprep.mubr.msk.bf16.mxu0 %vm895_vm1, %v6144_v26  ;;  %v13808_v26 = vcombine.low %v5813_v22, %v5814_v23  ;;  %v5818_v22 = vld [vmem:[%s12759_s25 + $0x7c] sm:$0xf]  ;;  %v6150_v23 = vsel %vm6129_vm5, %v6147_v32, %v6149_v48 }
 0x14d   : > { %15780 = vst [vmem:[#allocation53_spill] sm:$0xff] %v13808_v26  ;;  %v6151_v49 = vrot.slane %v13808_v26, 3  ;;  %v13835_v26 = vld [vmem:[%s12759_s25 + $0x100] sm:$0xff]  }
 0x14e   : > { %15785 = vst [vmem:[#allocation58_spill] sm:$0xff] %v13835_v26 }
 0x150   : > { %10851 = vmatmul.mubr.msk.bf16.gmra.mrb[56].mxu1 %vm895_vm1, %v13803_v28 }
 0x151   : > { %10854 = vmatprep.mubr.msk.bf16.mxu1 %vm895_vm1, %v13811_v11  ;;  %v13827_v11 = vld [vmem:[%s12759_s25 + $0xf8] sm:$0xff]  }
 0x152   : > { %11297 = vmatmul.mubr.msk.bf16.gmra.mrb[12].mxu0 %vm895_vm1, %v6146_v9  ;;  %15783 = vst [vmem:[#allocation56_spill] sm:$0xff] %v13827_v11  ;;  %v6152_v9 = vsel %vm6129_vm5, %v6149_v48, %v6151_v49  ;;  %v5821_v48 = vld [vmem:[%s12759_s25 + $0x88] sm:$0xf] }
 0x153   : > { %11300 = vmatprep.mubr.msk.bf16.mxu0 %vm895_vm1, %v6148_v29  ;;  %v13832_v29 = vcombine.low %v5817_v13, %v5818_v22  ;;  %v5822_v13 = vld [vmem:[%s12759_s25 + $0x8c] sm:$0xf]  ;;  %v6154_v22 = vsel %vm6129_vm5, %v6151_v49, %v6153_v7 }
 0x155   : > { %15784 = vst [vmem:[#allocation57_spill] sm:$0xff] %v13832_v29  ;;  %v6155_v32 = vrot.slane %v13832_v29, 3  ;;  %v13859_v29 = vld [vmem:[%s12759_s25 + $0x110] sm:$0xff]  }
 0x156   : > { %15789 = vst [vmem:[#allocation62_spill] sm:$0xff] %v13859_v29 }
 0x158   : > { %10855 = vmatmul.mubr.msk.bf16.gmra.mrb[60].mxu1 %vm895_vm1, %v13827_v11  ;;  %v13848_v11 = vcombine.low %v5819_v42, %v5820_v30  ;;  %v5823_v42 = vld [vmem:[%s12759_s25 + $0x90] sm:$0xf] }
 0x159   : > { %10858 = vmatprep.mubr.msk.bf16.mxu1 %vm895_vm1, %v13835_v26  ;;  %v13851_v26 = vld [vmem:[%s12759_s25 + $0x108] sm:$0xff]  }
 0x15a   : > { %11301 = vmatmul.mubr.msk.bf16.gmra.mrb[16].mxu0 %vm895_vm1, %v6150_v23  ;;  %15786 = vst [vmem:[#allocation59_spill] sm:$0xff] %v13848_v11  ;;  %15787 = vst [vmem:[#allocation60_spill] sm:$0xff] %v13851_v26  ;;  %v6156_v23 = vsel %vm6129_vm5, %v6153_v7, %v6155_v32  ;;  %v6157_v30 = vrot.slane %v13848_v11, 3  ;;  %v5825_v7 = vld [vmem:[%s12759_s25 + $0x98] sm:$0xf] }
 0x15b   : > { %11304 = vmatprep.mubr.msk.bf16.mxu0 %vm895_vm1, %v6152_v9  ;;  %v13856_v9 = vcombine.low %v5821_v48, %v5822_v13  ;;  %v5826_v48 = vld [vmem:[%s12759_s25 + $0x9c] sm:$0xf]  ;;  %v5828_v11 = vld [vmem:[%s12759_s25 + $0xa4] sm:$0xf] }
 0x15c   : > { %v6158_v13 = vsel %vm6129_vm5, %v6155_v32, %v6157_v30 }
 0x15d   : > { %15788 = vst [vmem:[#allocation61_spill] sm:$0xff] %v13856_v9  ;;  %v6159_v49 = vrot.slane %v13856_v9, 3  ;;  %v13883_v9 = vld [vmem:[%s12759_s25 + $0x120] sm:$0xff]  }
 0x15e   : > { %15793 = vst [vmem:[#allocation66_spill] sm:$0xff] %v13883_v9 }
 0x160   : > { %10859 = vmatmul.mubr.msk.bf16.gmra.mrb[64].mxu1 %vm895_vm1, %v13851_v26  ;;  %v13872_v26 = vcombine.low %v5823_v42, %v5824_v3  ;;  %v5827_v42 = vld [vmem:[%s12759_s25 + $0xa0] sm:$0xf] }
 0x161   : > { %10862 = vmatprep.mubr.msk.bf16.mxu1 %vm895_vm1, %v13859_v29  ;;  %v13875_v29 = vld [vmem:[%s12759_s25 + $0x118] sm:$0xff]  }
 0x162   : > { %11305 = vmatmul.mubr.msk.bf16.gmra.mrb[20].mxu0 %vm895_vm1, %v6154_v22  ;;  %15790 = vst [vmem:[#allocation63_spill] sm:$0xff] %v13872_v26  ;;  %15791 = vst [vmem:[#allocation64_spill] sm:$0xff] %v13875_v29  ;;  %v6160_v22 = vsel %vm6129_vm5, %v6157_v30, %v6159_v49  ;;  %v6161_v3 = vrot.slane %v13872_v26, 3  ;;  %v5829_v30 = vld [vmem:[%s12759_s25 + $0xa8] sm:$0xf] }
 0x163   : > { %11308 = vmatprep.mubr.msk.bf16.mxu0 %vm895_vm1, %v6156_v23  ;;  %v13880_v23 = vcombine.low %v5825_v7, %v5826_v48  ;;  %v5830_v7 = vld [vmem:[%s12759_s25 + $0xac] sm:$0xf] }
 0x164   : > { %v6162_v48 = vsel %vm6129_vm5, %v6159_v49, %v6161_v3 }
 0x165   : > { %15792 = vst [vmem:[#allocation65_spill] sm:$0xff] %v13880_v23  ;;  %v6163_v32 = vrot.slane %v13880_v23, 3  ;;  %v5832_v23 = vld [vmem:[%s12759_s25 + $0xb4] sm:$0xf] }
 0x168   : > { %10863 = vmatmul.mubr.msk.bf16.gmra.mrb[68].mxu1 %vm895_vm1, %v13875_v29  ;;  %v13896_v29 = vcombine.low %v5827_v42, %v5828_v11  ;;  %v5831_v42 = vld [vmem:[%s12759_s25 + $0xb0] sm:$0xf] }
 0x169   : > { %10866 = vmatprep.mubr.msk.bf16.mxu1 %vm895_vm1, %v13883_v9  ;;  %v13899_v9 = vld [vmem:[%s12759_s25 + $0x128] sm:$0xff]   ;;  %v13917_v26 = vcombine.low %v5831_v42, %v5832_v23  ;;  %v5835_v23 = vld [vmem:[%s12759_s25 + $0xc0] sm:$0xf]  ;;  %v5836_v42 = vld [vmem:[%s12759_s25 + $0xc4] sm:$0xf] }
 0x16a   : > { %11309 = vmatmul.mubr.msk.bf16.gmra.mrb[24].mxu0 %vm895_vm1, %v6158_v13  ;;  %v6164_v13 = vsel %vm6129_vm5, %v6161_v3, %v6163_v32  ;;  %v6165_v49 = vrot.slane %v13896_v29, 3  ;;  %v5833_v3 = vld [vmem:[%s12759_s25 + $0xb8] sm:$0xf] }
 0x16b   : > { %11312 = vmatprep.mubr.msk.bf16.mxu0 %vm895_vm1, %v6160_v22  ;;  %v13904_v22 = vcombine.low %v5829_v30, %v5830_v7  ;;  %v5834_v30 = vld [vmem:[%s12759_s25 + $0xbc] sm:$0xf]  ;;  %15794 = vst [vmem:[#allocation67_spill] sm:$0xff] %v13917_v26 }
 0x16c   : > { %v6166_v7 = vsel %vm6129_vm5, %v6163_v32, %v6165_v49 }
 0x16d   : > { %v6167_v11 = vrot.slane %v13904_v22, 3 }
 0x170   : > { %10867 = vmatmul.mubr.msk.bf16.gmra.mrb[72].mxu1 %vm895_vm1, %v13899_v9 }
 0x171   : > { %10870 = vmatprep.mubr.msk.bf16.mxu1 %vm895_vm1, %v13155_v63  ;;  %v6168_v63 = vsel %vm6129_vm5, %v6165_v49, %v6167_v11  ;;  %v5838_v49 = vld [vmem:[%s12759_s25 + $0xcc] sm:$0xf] }
 0x172   : > { %11313 = vmatmul.mubr.msk.bf16.gmra.mrb[28].mxu0 %vm895_vm1, %v6162_v48  ;;  %v13922_v48 = vcombine.low %v5833_v3, %v5834_v30  ;;  %v13935_v30 = vcombine.low %v5835_v23, %v5836_v42  ;;  %v5841_v23 = vld [vmem:[%s12759_s25 + $0xd8] sm:$0xf]  ;;  %v5842_v42 = vld [vmem:[%s12759_s25 + $0xdc] sm:$0xf] }
 0x173   : > { %11316 = vmatprep.mubr.msk.bf16.mxu0 %vm895_vm1, %v6164_v13  ;;  %v6169_v13 = vrot.slane %v13917_v26, 3  ;;  %v12568_v26 = vld [vmem:[%s12759_s25 + $0x4] sm:$0xf] }
 0x174   : > { %15795 = vst [vmem:[#allocation68_spill] sm:$0xff] %v13922_v48  ;;  %v6171_v32 = vrot.slane %v13922_v48, 3  ;;  %15796 = vst [vmem:[#allocation69_spill] sm:$0xff] %v13935_v30  ;;  %v5845_v48 = vld [vmem:[%s12759_s25 + $0xe8] sm:$0xf] }
 0x175   : > { %v6170_v3 = vsel %vm6129_vm5, %v6167_v11, %v6169_v13  ;;  %v6173_v11 = vrot.slane %v13935_v30, 3  ;;  %v1977_v30 = vld [vmem:[%s12759_s25] sm:$0xe] }
 0x178   : > { %10871 = vmatmul.mubr.msk.bf16.gmra.mrb[76].mxu1 %vm895_vm1, %v13164_v54  ;;  %v5837_v54 = vld [vmem:[%s12759_s25 + $0xc8] sm:$0xf] }
 0x179   : > { %10874 = vmatprep.mubr.msk.bf16.mxu1 %vm895_vm1, %v13184_v15  ;;  %v6172_v15 = vsel %vm6129_vm5, %v6169_v13, %v6171_v32  ;;  %v5839_v13 = vld [vmem:[%s12759_s25 + $0xd0] sm:$0xf] }
 0x17a   : > { %11317 = vmatmul.mubr.msk.bf16.gmra.mrb[32].mxu0 %vm895_vm1, %v6166_v7  ;;  %v13940_v7 = vcombine.low %v5837_v54, %v5838_v49  ;;  %v6174_v54 = vsel %vm6129_vm5, %v6171_v32, %v6173_v11 }
 0x17b   : > { %11320 = vmatprep.mubr.msk.bf16.mxu0 %vm895_vm1, %v6168_v63  ;;  %v13948_v63 = vld [vmem:[%s15502_s1 + $0x10] sm:$0x3] }
 0x17c   : > { %15797 = vst [vmem:[#allocation70_spill] sm:$0xff] %v13940_v7  ;;  %12323 = vmatprep.subr.msk.bf16.mxu0 %vm1040_vm0, %v13948_v63 }
 0x180   : > { %10875 = vmatmul.mubr.msk.bf16.gmra.mrb[80].mxu1 %vm895_vm1, %v13193_v53  ;;  %v6175_v53 = vrot.slane %v13940_v7, 3 }
 0x181   : > { %10878 = vmatprep.mubr.msk.bf16.mxu1 %vm895_vm1, %v13207_v31  ;;  %v5840_v31 = vld [vmem:[%s12759_s25 + $0xd4] sm:$0xf] }
 0x182   : > { %11321 = vmatmul.mubr.msk.bf16.gmra.mrb[36].mxu0 %vm895_vm1, %v6170_v3  ;;  %v13960_v49 = vcombine.low %v5839_v13, %v5840_v31  ;;  %v6176_v3 = vsel %vm6129_vm5, %v6173_v11, %v6175_v53  ;;  %v5843_v13 = vld [vmem:[%s12759_s25 + $0xe0] sm:$0xf]  ;;  %v5844_v31 = vld [vmem:[%s12759_s25 + $0xe4] sm:$0xf]  ;;  %v9570_v11 = vcombine.low %v1977_v30, %v12568_v26  ;;  %v1985_v30 = vrot.slane %v13405_v38, 1 }
 0x183   : > { %11324 = vmatprep.mubr.msk.bf16.mxu0 %vm895_vm1, %v6172_v15  ;;  %v13965_v15 = vcombine.low %v5841_v23, %v5842_v42 }
 0x184   : > { %v6177_v7 = vrot.slane %v13960_v49, 3  ;;  %v1984_v26 = vrot.slane %v9570_v11, 1 }
 0x185   : > { %v6179_v32 = vrot.slane %v13965_v15, 3 }
 0x186   : > { %v6178_v23 = vsel %vm6129_vm5, %v6175_v53, %v6177_v7 }
 0x187   : > { %v6180_v42 = vsel %vm6129_vm5, %v6177_v7, %v6179_v32 }
 0x188   : > { %10879 = vmatmul.mubr.msk.bf16.gmra.mrb[84].mxu1 %vm895_vm1, %v13224_v44  ;;  %v5846_v44 = vld [vmem:[%s12759_s25 + $0xec] sm:$0xf] }
 0x189   : > { %10882 = vmatprep.mubr.msk.bf16.mxu1 %vm895_vm1, %v13250_v62  ;;  %v13980_v62 = vcombine.low %v5843_v13, %v5844_v31  ;;  %v5849_v13 = vld [vmem:[%s12759_s25 + $0xf8] sm:$0xf]  ;;  %v1986_v31 = vsel %vm1983_vm6, %v1984_v26, %v1985_v30 }
 0x18a   : > { %11325 = vmatmul.mubr.msk.bf16.gmra.mrb[40].mxu0 %vm895_vm1, %v6174_v54  ;;  %v13985_v54 = vcombine.low %v5845_v48, %v5846_v44  ;;  %v5847_v48 = vld [vmem:[%s12759_s25 + $0xf0] sm:$0xf] }
 0x18b   : > { %11328 = vmatprep.mubr.msk.bf16.mxu0 %vm895_vm1, %v6176_v3  ;;  %v6181_v53 = vrot.slane %v13980_v62, 3  ;;  %v5848_v3 = vld [vmem:[%s12759_s25 + $0xf4] sm:$0xf] }
 0x18c   : > { %v6183_v7 = vrot.slane %v13985_v54, 3  ;;  %v14002_v44 = vcombine.low %v5847_v48, %v5848_v3  ;;  %v5851_v48 = vld [vmem:[%s12759_s25 + $0x100] sm:$0xf]  ;;  %v5853_v3 = vld [vmem:[%s12759_s25 + $0x108] sm:$0xf] }
 0x18d   : > { %v6182_v38 = vsel %vm6129_vm5, %v6179_v32, %v6181_v53 }
 0x18e   : > { %v6185_v32 = vrot.slane %v14002_v44, 3 }
 0x190   : > { %10883 = vmatmul.mubr.msk.bf16.gmra.mrb[88].mxu1 %vm895_vm1, %v13261_v10  ;;  %v9520_v10 = vcombine.low %v13280_v47, %v13280_v47  ;;  %v6184_v47 = vsel %vm6129_vm5, %v6181_v53, %v6183_v7 }
 0x191   : > { %10886 = vmatprep.mubr.msk.bf16.mxu1 %vm895_vm1, %v13286_v57  ;;  %v5850_v57 = vld [vmem:[%s12759_s25 + $0xfc] sm:$0xf] }
 0x192   : > { %11329 = vmatmul.mubr.msk.bf16.gmra.mrb[44].mxu0 %vm895_vm1, %v6178_v23  ;;  %v14006_v11 = vcombine.low %v5849_v13, %v5850_v57  ;;  %v1987_v23 = vrot.slane %v13418_v17, 1  ;;  %v5854_v13 = vld [vmem:[%s12759_s25 + $0x10c] sm:$0xf]  ;;  %v3652_v57 = vsel %vm1040_vm0, %v13649_v1, 0  ;;  %v1991_v1 = vrot.slane %v13450_v39, 1 }
 0x193   : > { %11332 = vmatprep.mubr.msk.bf16.mxu0 %vm895_vm1, %v6180_v42  ;;  %v1989_v42 = vrot.slane %v13437_v34, 1  ;;  %v6186_v34 = vsel %vm6129_vm5, %v6183_v7, %v6185_v32  ;;  %v1993_v7 = vrot.slane %v13469_v24, 1 }
 0x194   : > { %v6187_v26 = vrot.slane %v14006_v11, 3  ;;  %v1988_v53 = vsel %vm1983_vm6, %v1985_v30, %v1987_v23  ;;  %v14028_v30 = vcombine.low %v5853_v3, %v5854_v13  ;;  %v5858_v3 = vld [vmem:[%s12759_s25 + $0x11c] sm:$0xf] }
 0x195   : > { %v1990_v17 = vsel %vm1983_vm6, %v1987_v23, %v1989_v42  ;;  %v1992_v39 = vsel %vm1983_vm6, %v1989_v42, %v1991_v1  ;;  %v1994_v24 = vsel %vm1983_vm6, %v1991_v1, %v1993_v7  ;;  %v1995_v42 = vrot.slane %v13482_v52, 1  ;;  %v5861_v52 = vld [vmem:[%s12759_s25 + $0x128] sm:$0xf] }
 0x198   : > { %10887 = vmatmul.mubr.msk.bf16.gmra.mrb[96].mxu1 %vm895_vm1, %v9520_v10  ;;  %v5852_v10 = vld [vmem:[%s12759_s25 + $0x104] sm:$0xf] }
 0x199   : > { %10892 = vmatprep.mubr.msk.bf16.mxu1 %vm895_vm1, %v1986_v31  ;;  %v14024_v31 = vcombine.low %v5851_v48, %v5852_v10  ;;  %v5855_v48 = vld [vmem:[%s12759_s25 + $0x110] sm:$0xf]  ;;  %v5856_v10 = vld [vmem:[%s12759_s25 + $0x114] sm:$0xf] }
 0x19a   : > { %11333 = vmatmul.mubr.msk.bf16.gmra.mrb[48].mxu0 %vm895_vm1, %v6182_v38  ;;  %v6188_v38 = vsel %vm6129_vm5, %v6185_v32, %v6187_v26  ;;  %v6191_v32 = vrot.slane %v14028_v30, 3 }
 0x19b   : > { %11336 = vmatprep.mubr.msk.bf16.mxu0 %vm895_vm1, %v6184_v47  ;;  %v12569_v47 = vld [vmem:[%s15502_s1 + $0x8] sm:$0x3]  ;;  %v6189_v23 = vrot.slane %v14024_v31, 3 }
 0x19d   : > { %v6190_v13 = vsel %vm6129_vm5, %v6187_v26, %v6189_v23 }
 0x1a0   : > { %10893 = vmatmul.mubr.msk.bf16.vlgmr.msra.gmra.mrb[0].mxu1 %vm895_vm1, %v1988_v53  ;;  %v5857_v53 = vld [vmem:[%s12759_s25 + $0x118] sm:$0xf] }
 0x1a1   : > { %10989 = vmatpush3.bf16.msra.mxu1 %v3652_v57  ;;  %10896 = vmatprep.mubr.msk.bf16.mxu1 %vm895_vm1, %v1990_v17  ;;  %v14048_v57 = vcombine.low %v5855_v48, %v5856_v10  ;;  %v6192_v17 = vsel %vm6129_vm5, %v6189_v23, %v6191_v32  ;;  %v5859_v48 = vld [vmem:[%s12759_s25 + $0x120] sm:$0xf]  ;;  %v5860_v10 = vld [vmem:[%s12759_s25 + $0x124] sm:$0xf] }
 0x1a2   : > { %11337 = vmatmul.mubr.msk.bf16.gmra.mrb[52].mxu0 %vm895_vm1, %v6186_v34  ;;  %12319 = vmatprep.subr.msk.bf16.mxu1 %vm1040_vm0, %v12569_v47  ;;  %v14052_v34 = vcombine.low %v5857_v53, %v5858_v3  ;;  %v1996_v53 = vsel %vm1983_vm6, %v1993_v7, %v1995_v42  ;;  %v5862_v3 = vld [vmem:[%s12759_s25 + $0x12c] sm:$0xf]  ;;  %v1999_v7 = vrot.slane %v13514_v20, 1 }
 0x1a3   : > { %11340 = vmatprep.mubr.msk.bf16.mxu0 %vm895_vm1, %v6188_v38  ;;  %v1997_v38 = vrot.slane %v13501_v58, 1  ;;  %v6193_v26 = vrot.slane %v14048_v57, 3 }
 0x1a4   : > { %v6195_v23 = vrot.slane %v14052_v34, 3 }
 0x1a8   : > { %10897 = vmatmul.mubr.msk.bf16.gmra.mrb[4].mxu1 %vm895_vm1, %v1992_v39 }
 0x1a9   : > { %10900 = vmatprep.mubr.msk.bf16.mxu1 %vm895_vm1, %v1994_v24  ;;  %v1998_v24 = vsel %vm1983_vm6, %v1995_v42, %v1997_v38  ;;  %v2001_v42 = vrot.slane %v13533_v46, 1 }
 0x1aa   : > { %11341 = vmatmul.mubr.msk.bf16.gmra.mrb[56].mxu0 %vm895_vm1, %v6190_v13  ;;  %v6194_v13 = vsel %vm6129_vm5, %v6191_v32, %v6193_v26 }
 0x1ab   : > { %v14058_v1 = vpop.f32.mrb[92].mxu1  ;;  %11344 = vmatprep.mubr.msk.bf16.mxu0 %vm895_vm1, %v6192_v17  ;;  %v14074_v17 = vcombine.low %v5859_v48, %v5860_v10  ;;  %v5863_v10 = vld [vmem:[%s12759_s25 + $0x130] sm:$0xf]  ;;  %v2002_v20 = vsel %vm1983_vm6, %v1999_v7, %v2001_v42 }
 0x1ac   : > { %v14062_v47 = vpop.f32.mrb[93].mxu1 }
 0x1ad   : > { %15798 = vst [vmem:[#allocation71_spill] sm:$0xff] %v14062_v47  ;;  %v10791_v39 = vpop.f32.mrb[94].mxu1  ;;  %v14078_v47 = vcombine.low %v5861_v52, %v5862_v3  ;;  %v6197_v32 = vrot.slane %v14074_v17, 3  ;;  %v5865_v52 = vld [vmem:[%s12759_s25 + $0x138] sm:$0xf] }
 0x1ae   : > { %v14070_v58 = vpop.f32.mrb[95].mxu1  ;;  %v6196_v39 = vsel %vm6129_vm5, %v6193_v26, %v6195_v23  ;;  %v2000_v26 = vsel %vm1983_vm6, %v1997_v38, %v1999_v7  ;;  %v5866_v3 = vld [vmem:[%s12759_s25 + $0x13c] sm:$0xf]  ;;  %v2003_v38 = vrot.slane %v13546_v4, 1  ;;  %v2005_v7 = vrot.slane %v13565_v36, 1 }
 0x1af   : > { %v6199_v48 = vrot.slane %v14078_v47, 3 }
 0x1b0   : > { %10901 = vmatmul.mubr.msk.bf16.gmra.mrb[8].mxu1 %vm895_vm1, %v1996_v53  ;;  %v5864_v53 = vld [vmem:[%s12759_s25 + $0x134] sm:$0xf]  ;;  %v2006_v4 = vsel %vm1983_vm6, %v2003_v38, %v2005_v7 }
 0x1b1   : > { %10904 = vmatprep.mubr.msk.bf16.mxu1 %vm895_vm1, %v1998_v24  ;;  %v6198_v24 = vsel %vm6129_vm5, %v6195_v23, %v6197_v32  ;;  %v14094_v46 = vcombine.low %v5863_v10, %v5864_v53  ;;  %v5867_v53 = vld [vmem:[%s12759_s25 + $0x140] sm:$0xf] }
 0x1b2   : > { %11345 = vmatmul.mubr.msk.bf16.gmra.mrb[60].mxu0 %vm895_vm1, %v6194_v13  ;;  %v6200_v13 = vsel %vm6129_vm5, %v6197_v32, %v6199_v48  ;;  %v2004_v32 = vsel %vm1983_vm6, %v2001_v42, %v2003_v38  ;;  %v2007_v42 = vrot.slane %v13578_v25, 1  ;;  %v2009_v38 = vrot.slane %v13597_v59, 1 }
 0x1b3   : > { %11348 = vmatprep.mubr.msk.bf16.mxu0 %vm895_vm1, %v6196_v39  ;;  %v14098_v39 = vcombine.low %v5865_v52, %v5866_v3  ;;  %v6201_v23 = vrot.slane %v14094_v46, 3  ;;  %v5869_v52 = vld [vmem:[%s12759_s25 + $0x148] sm:$0xf]  ;;  %v5870_v3 = vld [vmem:[%s12759_s25 + $0x14c] sm:$0xf] }
 0x1b4   : > { %v2010_v25 = vsel %vm1983_vm6, %v2007_v42, %v2009_v38 }
 0x1b5   : > { %v6203_v10 = vrot.slane %v14098_v39, 3 }
 0x1b8   : > { %10905 = vmatmul.mubr.msk.bf16.gmra.mrb[12].mxu1 %vm895_vm1, %v2000_v26  ;;  %v5868_v26 = vld [vmem:[%s12759_s25 + $0x144] sm:$0xf] }
 0x1b9   : > { %10908 = vmatprep.mubr.msk.bf16.mxu1 %vm895_vm1, %v2002_v20  ;;  %v6202_v20 = vsel %vm6129_vm5, %v6199_v48, %v6201_v23  ;;  %v14114_v36 = vcombine.low %v5867_v53, %v5868_v26  ;;  %v5871_v26 = vld [vmem:[%s12759_s25 + $0x150] sm:$0xf] }
 0x1ba   : > { %11349 = vmatmul.mubr.msk.bf16.gmra.mrb[64].mxu0 %vm895_vm1, %v6198_v24  ;;  %v6204_v24 = vsel %vm6129_vm5, %v6201_v23, %v6203_v10  ;;  %v2008_v23 = vsel %vm1983_vm6, %v2005_v7, %v2007_v42  ;;  %v2011_v7 = vrot.slane %v13610_v45, 1  ;;  %v2013_v42 = vrot.slane %v13631_v41, 1 }
 0x1bb   : > { %11352 = vmatprep.mubr.msk.bf16.mxu0 %vm895_vm1, %v6200_v13  ;;  %v14118_v13 = vcombine.low %v5869_v52, %v5870_v3  ;;  %v6205_v48 = vrot.slane %v14114_v36, 3  ;;  %v5873_v52 = vld [vmem:[%s12759_s25 + $0x158] sm:$0xf]  ;;  %v5874_v3 = vld [vmem:[%s12759_s25 + $0x15c] sm:$0xf] }
 0x1bc   : > { %v2014_v45 = vsel %vm1983_vm6, %v2011_v7, %v2013_v42 }
 0x1bd   : > { %v6207_v53 = vrot.slane %v14118_v13, 3 }
 0x1c0   : > { %10909 = vmatmul.mubr.msk.bf16.gmra.mrb[16].mxu1 %vm895_vm1, %v2004_v32  ;;  %v5872_v32 = vld [vmem:[%s12759_s25 + $0x154] sm:$0xf] }
 0x1c1   : > { %10912 = vmatprep.mubr.msk.bf16.mxu1 %vm895_vm1, %v2006_v4  ;;  %v6206_v4 = vsel %vm6129_vm5, %v6203_v10, %v6205_v48  ;;  %v14134_v59 = vcombine.low %v5871_v26, %v5872_v32  ;;  %v5875_v32 = vld [vmem:[%s12759_s25 + $0x160] sm:$0xf] }
 0x1c2   : > { %11353 = vmatmul.mubr.msk.bf16.gmra.mrb[68].mxu0 %vm895_vm1, %v6202_v20  ;;  %v6208_v20 = vsel %vm6129_vm5, %v6205_v48, %v6207_v53  ;;  %v2012_v48 = vsel %vm1983_vm6, %v2009_v38, %v2011_v7  ;;  %v2015_v38 = vrot.slane %v13641_v27, 1  ;;  %v2017_v7 = vrot.slane %v13662_v35, 1 }
 0x1c3   : > { %11356 = vmatprep.mubr.msk.bf16.mxu0 %vm895_vm1, %v6204_v24  ;;  %v14138_v24 = vcombine.low %v5873_v52, %v5874_v3  ;;  %v6209_v10 = vrot.slane %v14134_v59, 3  ;;  %v5877_v52 = vld [vmem:[%s12759_s25 + $0x168] sm:$0xf]  ;;  %v5878_v3 = vld [vmem:[%s12759_s25 + $0x16c] sm:$0xf] }
 0x1c4   : > { %v2018_v27 = vsel %vm1983_vm6, %v2015_v38, %v2017_v7 }
 0x1c5   : > { %v6211_v26 = vrot.slane %v14138_v24, 3 }
 0x1c8   : > { %10913 = vmatmul.mubr.msk.bf16.gmra.mrb[20].mxu1 %vm895_vm1, %v2008_v23  ;;  %v5876_v23 = vld [vmem:[%s12759_s25 + $0x164] sm:$0xf] }
 0x1c9   : > { %10916 = vmatprep.mubr.msk.bf16.mxu1 %vm895_vm1, %v2010_v25  ;;  %v6210_v25 = vsel %vm6129_vm5, %v6207_v53, %v6209_v10  ;;  %v14154_v41 = vcombine.low %v5875_v32, %v5876_v23  ;;  %v5879_v23 = vld [vmem:[%s12759_s25 + $0x170] sm:$0xf] }
 0x1ca   : > { %11357 = vmatmul.mubr.msk.bf16.gmra.mrb[72].mxu0 %vm895_vm1, %v6206_v4  ;;  %v6212_v4 = vsel %vm6129_vm5, %v6209_v10, %v6211_v26  ;;  %v2016_v10 = vsel %vm1983_vm6, %v2013_v42, %v2015_v38  ;;  %v2019_v42 = vrot.slane %v13668_v55, 1  ;;  %v5883_v38 = vld [vmem:[%s12759_s25 + $0x180] sm:$0xf] }
 0x1cb   : > { %11360 = vmatprep.mubr.msk.bf16.mxu0 %vm895_vm1, %v6208_v20  ;;  %v14158_v20 = vcombine.low %v5877_v52, %v5878_v3  ;;  %v6213_v53 = vrot.slane %v14154_v41, 3  ;;  %v5881_v52 = vld [vmem:[%s12759_s25 + $0x178] sm:$0xf]  ;;  %v5882_v3 = vld [vmem:[%s12759_s25 + $0x17c] sm:$0xf] }
 0x1cd   : > { %15799 = vst [vmem:[#allocation72_spill] sm:$0xff] %v14158_v20  ;;  %v6215_v32 = vrot.slane %v14158_v20, 3  ;;  %v6214_v35 = vsel %vm6129_vm5, %v6211_v26, %v6213_v53  ;;  %v2021_v20 = vrot.slane %v13679_v8, 1 }
 0x1d0   : > { %10917 = vmatmul.mubr.msk.bf16.gmra.mrb[24].mxu1 %vm895_vm1, %v2012_v48  ;;  %v5880_v48 = vld [vmem:[%s12759_s25 + $0x174] sm:$0xf] }
 0x1d1   : > { %10920 = vmatprep.mubr.msk.bf16.mxu1 %vm895_vm1, %v2014_v45  ;;  %v14174_v45 = vcombine.low %v5879_v23, %v5880_v48  ;;  %v5884_v23 = vld [vmem:[%s12759_s25 + $0x184] sm:$0xf] }
 0x1d2   : > { %11361 = vmatmul.mubr.msk.bf16.gmra.mrb[76].mxu0 %vm895_vm1, %v6210_v25  ;;  %v6216_v25 = vsel %vm6129_vm5, %v6213_v53, %v6215_v32  ;;  %v5886_v53 = vld [vmem:[%s12759_s25 + $0x18c] sm:$0x7] }
 0x1d3   : > { %11364 = vmatprep.mubr.msk.bf16.mxu0 %vm895_vm1, %v6212_v4  ;;  %v14178_v4 = vcombine.low %v5881_v52, %v5882_v3  ;;  %v6217_v26 = vrot.slane %v14174_v45, 3  ;;  %v2020_v52 = vsel %vm1983_vm6, %v2017_v7, %v2019_v42  ;;  %v2022_v3 = vsel %vm1983_vm6, %v2019_v42, %v2021_v20 }
 0x1d4   : > { %v6891_v42 = vshrl.u32 %v13684_v0, 16 }
 0x1d5   : > { %15800 = vst [vmem:[#allocation73_spill] sm:$0xff] %v14178_v4  ;;  %v6219_v48 = vrot.slane %v14178_v4, 3  ;;  %v6218_v55 = vsel %vm6129_vm5, %v6215_v32, %v6217_v26  ;;  %v2025_v4 = vrot.slane %v13705_v43, 1 }
 0x1d7   : > { %v6220_v8 = vsel %vm6129_vm5, %v6217_v26, %v6219_v48  ;;  %v6902_v26 = vshll.u32 %v13687_v16, 16 }
 0x1d8   : > { %10921 = vmatmul.mubr.msk.bf16.gmra.mrb[28].mxu1 %vm895_vm1, %v2016_v10  ;;  %v5885_v10 = vld [vmem:[%s12759_s25 + $0x188] sm:$0xf] }
 0x1d9   : > { %10924 = vmatprep.mubr.msk.bf16.mxu1 %vm895_vm1, %v2018_v27  ;;  %v14194_v27 = vcombine.low %v5883_v38, %v5884_v23  ;;  %v6894_v38 = vshll.u32 %v13684_v0, 16  ;;  %v6899_v23 = vshrl.u32 %v13687_v16, 16  ;;  %v2027_v0 = vrot.slane %v13713_v21, 1 }
 0x1da   : > { %11365 = vmatmul.mubr.msk.bf16.gmra.mrb[80].mxu0 %vm895_vm1, %v6214_v35  ;;  %v9864_v35 = vcombine.low %v5885_v10, %v5886_v53  ;;  %v2029_v16 = vrot.slane %v13729_v60, 1 }
 0x1db   : > { %11368 = vmatprep.mubr.msk.bf16.mxu0 %vm895_vm1, %v6216_v25  ;;  %v2023_v25 = vrot.slane %v13690_v50, 1  ;;  %v6221_v7 = vrot.slane %v14194_v27, 3 }
 0x1dc   : > { %v6223_v32 = vrot.slane %v9864_v35, 3  ;;  %v6904_v35 = vrot.slane %v6902_v26, 4  ;;  %v2030_v21 = vsel %vm1983_vm6, %v2027_v0, %v2029_v16 }
 0x1dd   : > { %v2024_v10 = vsel %vm1983_vm6, %v2021_v20, %v2023_v25  ;;  %v2026_v50 = vsel %vm1983_vm6, %v2023_v25, %v2025_v4  ;;  %v6222_v53 = vsel %vm6129_vm5, %v6219_v48, %v6221_v7  ;;  %v6908_v20 = vshrl.u32 %v13702_v19, 16 }
 0x1de   : > { %v6224_v43 = vsel %vm6129_vm5, %v6221_v7, %v6223_v32  ;;  %v6911_v48 = vshll.u32 %v13702_v19, 16  ;;  %v6917_v7 = vshrl.u32 %v13710_v14, 16  ;;  %v2031_v19 = vrot.slane %v13739_v40, 1 }
 0x1e0   : > { %10925 = vmatmul.mubr.msk.bf16.gmra.mrb[32].mxu1 %vm895_vm1, %v2020_v52  ;;  %v6893_v52 = vrot.slane %v6891_v42, 3  ;;  %v6920_v42 = vshll.u32 %v13710_v14, 16  ;;  %v6913_v26 = vrot.slane %v6911_v48, 4  ;;  %v2033_v14 = vrot.slane %v13755_v37, 1 }
 0x1e1   : > { %10928 = vmatprep.mubr.msk.bf16.mxu1 %vm895_vm1, %v2022_v3  ;;  %v6896_v3 = vrot.slane %v6894_v38, 4  ;;  %v2028_v38 = vsel %vm1983_vm6, %v2025_v4, %v2027_v0 }
 0x1e2   : > { %11369 = vmatmul.mubr.msk.bf16.gmra.mrb[84].mxu0 %vm895_vm1, %v6218_v55  ;;  %v6901_v55 = vrot.slane %v6899_v23, 3  ;;  %v6910_v23 = vrot.slane %v6908_v20, 3  ;;  %v2034_v40 = vsel %vm1983_vm6, %v2031_v19, %v2033_v14 }
 0x1e3   : > { %11372 = vmatprep.mubr.msk.bf16.mxu0 %vm895_vm1, %v6220_v8  ;;  %v6897_v8 = vor.u32 %v6896_v3, %v6893_v52  ;;  %v6935_v3 = vshrl.u32 %v13736_v56, 16 }
 0x1e4   : > { %v6905_v25 = vor.u32 %v6904_v35, %v6901_v55  ;;  %v6914_v4 = vor.u32 %v6913_v26, %v6910_v23  ;;  %v6938_v55 = vshll.u32 %v13736_v56, 16  ;;  %v2032_v35 = vsel %vm1983_vm6, %v2029_v16, %v2031_v19 }
 0x1e5   : > { %v6937_v48 = vrot.slane %v6935_v3, 3  ;;  %v2035_v56 = vrot.slane %v13763_v18, 1  ;;  %v2037_v16 = vrot.slane %v13779_v51, 1  ;;  %v6974_v3 = vshll.u32 %v13784_v5, 16 }
 0x1e6   : > { %v6906_v60 = vsel %vm6889_vm7, %v6897_v8, %v6905_v25  ;;  %v6940_v8 = vrot.slane %v6938_v55, 4 }
 0x1e7   : > { %v2036_v23 = vsel %vm1983_vm6, %v2033_v14, %v2035_v56  ;;  %v2038_v18 = vsel %vm1983_vm6, %v2035_v56, %v2037_v16  ;;  %v15805_v56 = vld [vmem:[#allocation56_spill] sm:$0xff] }
 0x1e8   : > { %10929 = vmatmul.mubr.msk.bf16.gmra.mrb[36].mxu1 %vm895_vm1, %v2024_v10  ;;  %v6919_v10 = vrot.slane %v6917_v7, 3  ;;  %v6944_v7 = vshrl.u32 %v13752_v33, 16 }
 0x1e9   : > { %10932 = vmatprep.mubr.msk.bf16.mxu1 %vm895_vm1, %v2026_v50  ;;  %v6922_v50 = vrot.slane %v6920_v42, 4  ;;  %v6947_v42 = vshll.u32 %v13752_v33, 16  ;;  %v2039_v33 = vrot.slane %v13787_v2, 1 }
 0x1ea   : > { %11373 = vmatmul.mubr.msk.bf16.gmra.mrb[88].mxu0 %vm895_vm1, %v6222_v53  ;;  %v6926_v53 = vshrl.u32 %v13726_v12, 16  ;;  %v6946_v51 = vrot.slane %v6944_v7, 3  ;;  %v15806_v7 = vld [vmem:[#allocation52_spill] sm:$0xff] }
 0x1eb   : > { %11376 = vmatprep.mubr.msk.bf16.mxu0 %vm895_vm1, %v6224_v43  ;;  %v6929_v43 = vshll.u32 %v13726_v12, 16  ;;  %v6923_v52 = vor.u32 %v6922_v50, %v6919_v10  ;;  %v8174_v12 = vsel %vm1040_vm0, %v13948_v63, 0  ;;  %v6953_v63 = vshrl.u32 %v13760_v6, 16 }
 0x1ec   : > { %v6928_v0 = vrot.slane %v6926_v53, 3  ;;  %v6965_v53 = vshll.u32 %v13776_v61, 16  ;;  %v2040_v55 = vsel %vm1983_vm6, %v2037_v16, %v2039_v33  ;;  %v2045_v16 = vrot.slane %v15805_v56, 1 }
 0x1ed   : > { %v6931_v37 = vrot.slane %v6929_v43, 4  ;;  %v6924_v20 = vsel %vm6889_vm7, %v6914_v4, %v6923_v52  ;;  %v6955_v50 = vrot.slane %v6953_v63, 3 }
 0x1f0   : > { %10933 = vmatmul.mubr.msk.bf16.gmra.mrb[40].mxu1 %vm895_vm1, %v2028_v38  ;;  %v6941_v38 = vor.u32 %v6940_v8, %v6937_v48  ;;  %v15804_v48 = vld [vmem:[#allocation54_spill] sm:$0xff] }
 0x1f1   : > { %10936 = vmatprep.mubr.msk.bf16.mxu1 %vm895_vm1, %v2030_v21  ;;  %v6956_v21 = vshll.u32 %v13760_v6, 16  ;;  %v2041_v6 = vrot.slane %v13803_v28, 1  ;;  %v2043_v8 = vrot.slane %v15804_v48, 1 }
 0x1f2   : > { %11377 = vmatmul.mubr.msk.bf16.gmra.mrb[96].mxu0 %vm895_vm1, %v6223_v32  ;;  %v6915_v32 = vsel %vm6889_vm7, %v6905_v25, %v6914_v4  ;;  %v6932_v25 = vor.u32 %v6931_v37, %v6928_v0  ;;  %v6962_v4 = vshrl.u32 %v13776_v61, 16  ;;  %v6967_v37 = vrot.slane %v6965_v53, 4 }
 0x1f3   : > { %11382 = vmatprep.mubr.msk.bf16.mxu0 %vm895_vm1, %v6906_v60  ;;  %v6949_v60 = vrot.slane %v6947_v42, 4  ;;  %v6958_v19 = vrot.slane %v6956_v21, 4  ;;  %v2042_v2 = vsel %vm1983_vm6, %v2039_v33, %v2041_v6  ;;  %v6980_v42 = vshrl.u32 %v15806_v7, 16  ;;  %v15807_v21 = vld [vmem:[#allocation53_spill] sm:$0xff] }
 0x1f4   : > { %v6933_v26 = vsel %vm6889_vm7, %v6923_v52, %v6932_v25  ;;  %v6942_v10 = vsel %vm6889_vm7, %v6932_v25, %v6941_v38  ;;  %v6971_v52 = vshrl.u32 %v13784_v5, 16  ;;  %v6964_v0 = vrot.slane %v6962_v4, 3  ;;  %v15808_v4 = vld [vmem:[#allocation58_spill] sm:$0xff] }
 0x1f5   : > { %v6950_v14 = vor.u32 %v6949_v60, %v6946_v51  ;;  %v6959_v43 = vor.u32 %v6958_v19, %v6955_v50  ;;  %v2046_v51 = vsel %vm1983_vm6, %v2043_v8, %v2045_v16  ;;  %v2047_v53 = vrot.slane %v15808_v4, 1 }
 0x1f6   : > { %v6973_v5 = vrot.slane %v6971_v52, 3  ;;  %v6968_v25 = vor.u32 %v6967_v37, %v6964_v0  ;;  %v15809_v52 = vld [vmem:[#allocation60_spill] sm:$0xff] }
 0x1f7   : > { %v6951_v28 = vsel %vm6889_vm7, %v6941_v38, %v6950_v14  ;;  %v6983_v38 = vshll.u32 %v15806_v7, 16 }
 0x1f8   : > { %10937 = vmatmul.mubr.msk.bf16.gmra.mrb[44].mxu1 %vm895_vm1, %v2032_v35  ;;  %v6969_v60 = vsel %vm6889_vm7, %v6959_v43, %v6968_v25 }
 0x1f9   : > { %10940 = vmatprep.mubr.msk.bf16.mxu1 %vm895_vm1, %v2034_v40  ;;  %v6985_v50 = vrot.slane %v6983_v38, 4 }
 0x1fa   : > { %11383 = vmatmul.mubr.msk.bf16.vlgmr.msra.gmra.mrb[0].mxu0 %vm895_vm1, %v6915_v32 }
 0x1fb   : > { %11386 = vmatprep.mubr.msk.bf16.mxu0 %vm895_vm1, %v6924_v20  ;;  %11479 = vmatpush3.bf16.msra.mxu0 %v8174_v12  ;;  %v6960_v20 = vsel %vm6889_vm7, %v6950_v14, %v6959_v43  ;;  %v6976_v12 = vrot.slane %v6974_v3, 4  ;;  %v15810_v43 = vld [vmem:[#allocation55_spill] sm:$0xff] }
 0x1fd   : > { %v6977_v63 = vor.u32 %v6976_v12, %v6973_v5 }
 0x1ff   : > { %v6978_v19 = vsel %vm6889_vm7, %v6968_v25, %v6977_v63 }
 0x200   : > { %10941 = vmatmul.mubr.msk.bf16.gmra.mrb[48].mxu1 %vm895_vm1, %v2036_v23  ;;  %v6989_v23 = vshrl.u32 %v15807_v21, 16 }
 0x201   : > { %10944 = vmatprep.mubr.msk.bf16.mxu1 %vm895_vm1, %v2038_v18  ;;  %v6992_v18 = vshll.u32 %v15807_v21, 16  ;;  %v15813_v21 = vld [vmem:[#allocation64_spill] sm:$0xff] }
 0x202   : > { %11387 = vmatmul.mubr.msk.bf16.gmra.mrb[4].mxu0 %vm895_vm1, %v6933_v26  ;;  %v2044_v26 = vsel %vm1983_vm6, %v2041_v6, %v2043_v8  ;;  %v6991_v33 = vrot.slane %v6989_v23, 3  ;;  %v2049_v6 = vrot.slane %v15809_v52, 1 }
 0x203   : > { %11390 = vmatprep.mubr.msk.bf16.mxu0 %vm895_vm1, %v6942_v10  ;;  %v6982_v10 = vrot.slane %v6980_v42, 3  ;;  %v6994_v14 = vrot.slane %v6992_v18, 4  ;;  %v15812_v42 = vld [vmem:[#allocation62_spill] sm:$0xff] }
 0x204   : > { %v2050_v5 = vsel %vm1983_vm6, %v2047_v53, %v2049_v6  ;;  %v2051_v38 = vrot.slane %v15812_v42, 1 }
 0x205   : > { %v14266_v35 = vpop.f32.mrb[92].mxu0  ;;  %v6986_v3 = vor.u32 %v6985_v50, %v6982_v10 }
 0x206   : > { %15801 = vst [vmem:[#allocation74_spill] sm:$0xff] %v14266_v35  ;;  %v14269_v40 = vpop.f32.mrb[93].mxu0 }
 0x207   : > { %15802 = vst [vmem:[#allocation75_spill] sm:$0xff] %v14269_v40  ;;  %v11281_v32 = vpop.f32.mrb[94].mxu0  ;;  %v6987_v12 = vsel %vm6889_vm7, %v6977_v63, %v6986_v3  ;;  %v15814_v63 = vld [vmem:[#allocation59_spill] sm:$0xff] }
 0x208   : > { %10945 = vmatmul.mubr.msk.bf16.gmra.mrb[52].mxu1 %vm895_vm1, %v2040_v55  ;;  %v14273_v61 = vpop.f32.mrb[95].mxu0  ;;  %v6998_v55 = vshrl.u32 %v15810_v43, 16  ;;  %v15811_v32 = vld [vmem:[#allocation57_spill] sm:$0xff]  ;;  %v7016_v18 = vshrl.u32 %v15814_v63, 16 }
 0x209   : > { %15803 = vst [vmem:[#allocation76_spill] sm:$0xff] %v14273_v61  ;;  %10948 = vmatprep.mubr.msk.bf16.mxu1 %vm895_vm1, %v2042_v2  ;;  %v7001_v2 = vshll.u32 %v15810_v43, 16  ;;  %v7007_v0 = vshrl.u32 %v15811_v32, 16  ;;  %v7010_v37 = vshll.u32 %v15811_v32, 16 }
 0x20a   : > { %11391 = vmatmul.mubr.msk.bf16.gmra.mrb[8].mxu0 %vm895_vm1, %v6951_v28  ;;  %v6995_v28 = vor.u32 %v6994_v14, %v6991_v33  ;;  %v7000_v48 = vrot.slane %v6998_v55, 3  ;;  %v7018_v4 = vrot.slane %v7016_v18, 3  ;;  %v15816_v55 = vld [vmem:[#allocation66_spill] sm:$0xff]  ;;  %v12571_v18 = vld [vmem:[%s12759_s25 + $0x138] sm:$0xff]  }
 0x20b   : > { %11394 = vmatprep.mubr.msk.bf16.mxu0 %vm895_vm1, %v6960_v20  ;;  %v2048_v20 = vsel %vm1983_vm6, %v2045_v16, %v2047_v53  ;;  %v7003_v8 = vrot.slane %v7001_v2, 4  ;;  %v7009_v25 = vrot.slane %v7007_v0, 3  ;;  %v7012_v7 = vrot.slane %v7010_v37, 4 }
 0x20c   : > { %v6996_v56 = vsel %vm6889_vm7, %v6986_v3, %v6995_v28  ;;  %v2053_v16 = vrot.slane %v15813_v21, 1  ;;  %v2055_v2 = vrot.slane %v15816_v55, 1  ;;  %v12572_v55 = vld [vmem:[%s12759_s25 + $0x140] sm:$0xff]  }
 0x20d   : > { %v7004_v23 = vor.u32 %v7003_v8, %v7000_v48 }
 0x20e   : > { %v2054_v33 = vsel %vm1983_vm6, %v2051_v38, %v2053_v16  ;;  %v2056_v8 = vsel %vm1983_vm6, %v2053_v16, %v2055_v2  ;;  %v2061_v16 = vrot.slane %v12571_v18, 1  ;;  %v12575_v18 = vld [vmem:[%s12759_s25 + $0x158] sm:$0xff]  }
 0x20f   : > { %v7005_v14 = vsel %vm6889_vm7, %v6995_v28, %v7004_v23  ;;  %v15817_v28 = vld [vmem:[#allocation63_spill] sm:$0xff] }
 0x210   : > { %10949 = vmatmul.mubr.msk.bf16.gmra.mrb[56].mxu1 %vm895_vm1, %v2044_v26  ;;  %v7019_v26 = vshll.u32 %v15814_v63, 16  ;;  %v7034_v0 = vshrl.u32 %v15817_v28, 16  ;;  %v7037_v37 = vshll.u32 %v15817_v28, 16  ;;  %v15819_v28 = vld [vmem:[#allocation67_spill] sm:$0xff] }
 0x211   : > { %10952 = vmatprep.mubr.msk.bf16.mxu1 %vm895_vm1, %v2046_v51  ;;  %v7013_v51 = vor.u32 %v7012_v7, %v7009_v25 }
 0x212   : > { %11395 = vmatmul.mubr.msk.bf16.gmra.mrb[12].mxu0 %vm895_vm1, %v6969_v60  ;;  %v15815_v60 = vld [vmem:[#allocation61_spill] sm:$0xff]  ;;  %v7021_v53 = vrot.slane %v7019_v26, 4  ;;  %v7036_v25 = vrot.slane %v7034_v0, 3  ;;  %v7039_v7 = vrot.slane %v7037_v37, 4  ;;  %v7070_v0 = vshrl.u32 %v15819_v28, 16 }
 0x213   : > { %11398 = vmatprep.mubr.msk.bf16.mxu0 %vm895_vm1, %v6978_v19  ;;  %v7025_v10 = vshrl.u32 %v15815_v60, 16  ;;  %v7028_v50 = vshll.u32 %v15815_v60, 16  ;;  %v2052_v19 = vsel %vm1983_vm6, %v2049_v6, %v2051_v38  ;;  %v7014_v52 = vsel %vm6889_vm7, %v7004_v23, %v7013_v51  ;;  %v12570_v23 = vld [vmem:[%s12759_s25 + $0x130] sm:$0xff]  }
 0x214   : > { %v2057_v6 = vrot.slane %v13899_v9, 1  ;;  %v7022_v32 = vor.u32 %v7021_v53, %v7018_v4  ;;  %v2059_v63 = vrot.slane %v12570_v23, 1  ;;  %v7040_v26 = vor.u32 %v7039_v7, %v7036_v25  ;;  %v12574_v23 = vld [vmem:[%s12759_s25 + $0x150] sm:$0xff]  }
 0x215   : > { %v7027_v3 = vrot.slane %v7025_v10, 3  ;;  %v7030_v43 = vrot.slane %v7028_v50, 4  ;;  %v7055_v60 = vshll.u32 %v13896_v29, 16  ;;  %v7061_v50 = vshrl.u32 %v13904_v22, 16 }
 0x216   : > { %v7023_v9 = vsel %vm6889_vm7, %v7013_v51, %v7022_v32  ;;  %v7052_v51 = vshrl.u32 %v13896_v29, 16  ;;  %v7073_v37 = vshll.u32 %v15819_v28, 16  ;;  %v7072_v25 = vrot.slane %v7070_v0, 3  ;;  %v2737_v0 = vld [vmem:[%s12759_s25 + $0x8] sm:$0xe] }
 0x218   : > { %10953 = vmatmul.mubr.msk.bf16.gmra.mrb[60].mxu1 %vm895_vm1, %v2048_v20  ;;  %v7031_v20 = vor.u32 %v7030_v43, %v7027_v3  ;;  %v7054_v53 = vrot.slane %v7052_v51, 3  ;;  %v7063_v43 = vrot.slane %v7061_v50, 3  ;;  %v7075_v7 = vrot.slane %v7073_v37, 4  ;;  %v15821_v51 = vld [vmem:[#allocation69_spill] sm:$0xff] }
 0x219   : > { %10956 = vmatprep.mubr.msk.bf16.mxu1 %vm895_vm1, %v2050_v5  ;;  %v15818_v5 = vld [vmem:[#allocation65_spill] sm:$0xff] }
 0x21a   : > { %11399 = vmatmul.mubr.msk.bf16.gmra.mrb[16].mxu0 %vm895_vm1, %v6987_v12  ;;  %v7043_v12 = vshrl.u32 %v15818_v5, 16  ;;  %v7046_v48 = vshll.u32 %v15818_v5, 16  ;;  %v7032_v42 = vsel %vm6889_vm7, %v7022_v32, %v7031_v20  ;;  %v7041_v4 = vsel %vm6889_vm7, %v7031_v20, %v7040_v26  ;;  %v15820_v5 = vld [vmem:[#allocation68_spill] sm:$0xff] }
 0x21b   : > { %11402 = vmatprep.mubr.msk.bf16.mxu0 %vm895_vm1, %v6996_v56  ;;  %v2058_v56 = vsel %vm1983_vm6, %v2055_v2, %v2057_v6  ;;  %v2063_v2 = vrot.slane %v12572_v55, 1 }
 0x21c   : > { %v7045_v38 = vrot.slane %v7043_v12, 3  ;;  %v7048_v21 = vrot.slane %v7046_v48, 4  ;;  %v7079_v12 = vshrl.u32 %v15820_v5, 16  ;;  %v7082_v48 = vshll.u32 %v15820_v5, 16 }
 0x21d   : > { %v7109_v5 = vshll.u32 %v13960_v49, 16 }
 0x21e   : > { %v7049_v10 = vor.u32 %v7048_v21, %v7045_v38  ;;  %v7081_v38 = vrot.slane %v7079_v12, 3  ;;  %v7084_v21 = vrot.slane %v7082_v48, 4  ;;  %v7115_v48 = vshrl.u32 %v13965_v15, 16 }
 0x220   : > { %10957 = vmatmul.mubr.msk.bf16.gmra.mrb[64].mxu1 %vm895_vm1, %v2052_v19  ;;  %v7064_v19 = vshll.u32 %v13904_v22, 16  ;;  %v7050_v3 = vsel %vm6889_vm7, %v7040_v26, %v7049_v10  ;;  %v12573_v22 = vld [vmem:[%s12759_s25 + $0x148] sm:$0xff]   ;;  %v7076_v26 = vor.u32 %v7075_v7, %v7072_v25  ;;  %v7085_v50 = vor.u32 %v7084_v21, %v7081_v38 }
 0x221   : > { %10960 = vmatprep.mubr.msk.bf16.mxu1 %vm895_vm1, %v2054_v33  ;;  %v2060_v33 = vsel %vm1983_vm6, %v2057_v6, %v2059_v63  ;;  %v2065_v6 = vrot.slane %v12573_v22, 1  ;;  %v12576_v22 = vld [vmem:[%s12759_s25 + $0x160] sm:$0xff]   ;;  %v7111_v21 = vrot.slane %v7109_v5, 4 }
 0x222   : > { %11403 = vmatmul.mubr.msk.bf16.gmra.mrb[20].mxu0 %vm895_vm1, %v7005_v14  ;;  %v2062_v14 = vsel %vm1983_vm6, %v2059_v63, %v2061_v16  ;;  %v7066_v29 = vrot.slane %v7064_v19, 4  ;;  %v2067_v63 = vrot.slane %v12574_v23, 1  ;;  %v15822_v19 = vld [vmem:[#allocation70_spill] sm:$0xff]  ;;  %v7117_v23 = vrot.slane %v7115_v48, 3 }
 0x223   : > { %11406 = vmatprep.mubr.msk.bf16.mxu0 %vm895_vm1, %v7014_v52  ;;  %v7057_v52 = vrot.slane %v7055_v60, 4  ;;  %v7088_v60 = vshrl.u32 %v15821_v51, 16 }
 0x224   : > { %v7067_v20 = vor.u32 %v7066_v29, %v7063_v43  ;;  %v7086_v29 = vsel %vm6889_vm7, %v7076_v26, %v7085_v50 }
 0x225   : > { %v7058_v32 = vor.u32 %v7057_v52, %v7054_v53 }
 0x226   : > { %v7077_v52 = vsel %vm6889_vm7, %v7067_v20, %v7076_v26  ;;  %v15823_v26 = vld [vmem:[#allocation30_spill] sm:$0xff] }
 0x228   : > { %10961 = vmatmul.mubr.msk.bf16.gmra.mrb[68].mxu1 %vm895_vm1, %v2056_v8  ;;  %v2064_v8 = vsel %vm1983_vm6, %v2061_v16, %v2063_v2  ;;  %v2069_v16 = vrot.slane %v12575_v18, 1  ;;  %v12579_v18 = vld [vmem:[%s12759_s25 + $0x170] sm:$0xff]  }
 0x229   : > { %10964 = vmatprep.mubr.msk.bf16.mxu1 %vm895_vm1, %v2058_v56  ;;  %v2066_v56 = vsel %vm1983_vm6, %v2063_v2, %v2065_v6 }
 0x22a   : > { %11407 = vmatmul.mubr.msk.bf16.gmra.mrb[24].mxu0 %vm895_vm1, %v7023_v9  ;;  %v7059_v9 = vsel %vm6889_vm7, %v7049_v10, %v7058_v32  ;;  %v7091_v10 = vshll.u32 %v15821_v51, 16  ;;  %v2070_v53 = vsel %vm1983_vm6, %v2067_v63, %v2069_v16 }
 0x22b   : > { %11410 = vmatprep.mubr.msk.bf16.mxu0 %vm895_vm1, %v7032_v42  ;;  %v7068_v42 = vsel %vm6889_vm7, %v7058_v32, %v7067_v20  ;;  %v2071_v32 = vrot.slane %v12576_v22, 1  ;;  %v7106_v20 = vshrl.u32 %v13960_v49, 16 }
 0x22c   : > { %v7093_v43 = vrot.slane %v7091_v10, 4 }
 0x22d   : > { %v7108_v38 = vrot.slane %v7106_v20, 3 }
 0x22f   : > { %v7112_v10 = vor.u32 %v7111_v21, %v7108_v38 }
 0x230   : > { %10965 = vmatmul.mubr.msk.bf16.gmra.mrb[72].mxu1 %vm895_vm1, %v2060_v33  ;;  %v7097_v33 = vshrl.u32 %v15822_v19, 16 }
 0x231   : > { %10968 = vmatprep.mubr.msk.bf16.mxu1 %vm895_vm1, %v2062_v14  ;;  %v7100_v14 = vshll.u32 %v15822_v19, 16  ;;  %v7127_v19 = vshll.u32 %v13980_v62, 16 }
 0x232   : > { %11411 = vmatmul.mubr.msk.bf16.gmra.mrb[28].mxu0 %vm895_vm1, %v7041_v4  ;;  %v2068_v4 = vsel %vm1983_vm6, %v2065_v6, %v2067_v63  ;;  %v7099_v55 = vrot.slane %v7097_v33, 3  ;;  %v12577_v6 = vld [vmem:[%s12759_s25 + $0x168] sm:$0xff]  }
 0x233   : > { %11414 = vmatprep.mubr.msk.bf16.mxu0 %vm895_vm1, %v7050_v3  ;;  %v7090_v3 = vrot.slane %v7088_v60, 3  ;;  %v7102_v2 = vrot.slane %v7100_v14, 4  ;;  %v2073_v28 = vrot.slane %v12577_v6, 1  ;;  %v7133_v14 = vshrl.u32 %v13985_v54, 16 }
 0x235   : > { %v7094_v37 = vor.u32 %v7093_v43, %v7090_v3  ;;  %v7103_v12 = vor.u32 %v7102_v2, %v7099_v55  ;;  %v2074_v7 = vsel %vm1983_vm6, %v2071_v32, %v2073_v28 }
 0x237   : > { %v7104_v49 = vsel %vm6889_vm7, %v7094_v37, %v7103_v12  ;;  %v7113_v6 = vsel %vm6889_vm7, %v7103_v12, %v7112_v10  ;;  %v7142_v12 = vshrl.u32 %v14002_v44, 16 }
 0x238   : > { %10969 = vmatmul.mubr.msk.bf16.gmra.mrb[76].mxu1 %vm895_vm1, %v2064_v8  ;;  %v7118_v8 = vshll.u32 %v13965_v15, 16  ;;  %v2075_v15 = vrot.slane %v12579_v18, 1 }
 0x239   : > { %10972 = vmatprep.mubr.msk.bf16.mxu1 %vm895_vm1, %v2066_v56  ;;  %v2072_v56 = vsel %vm1983_vm6, %v2069_v16, %v2071_v32  ;;  %v2077_v16 = vrot.slane %v15823_v26, 1 }
 0x23a   : > { %11415 = vmatmul.mubr.msk.bf16.gmra.mrb[32].mxu0 %vm895_vm1, %v7059_v9  ;;  %v12578_v9 = vld [vmem:[%s12759_s25 + $0xc] sm:$0xf]  ;;  %v7120_v63 = vrot.slane %v7118_v8, 4  ;;  %v7145_v8 = vshll.u32 %v14002_v44, 16 }
 0x23b   : > { %11418 = vmatprep.mubr.msk.bf16.mxu0 %vm895_vm1, %v7068_v42  ;;  %v9620_v25 = vcombine.low %v2737_v0, %v12578_v9  ;;  %v7095_v42 = vsel %vm6889_vm7, %v7085_v50, %v7094_v37  ;;  %v7124_v50 = vshrl.u32 %v13980_v62, 16  ;;  %v7129_v0 = vrot.slane %v7127_v19, 4 }
 0x23c   : > { %v7121_v33 = vor.u32 %v7120_v63, %v7117_v23  ;;  %v7135_v37 = vrot.slane %v7133_v14, 3  ;;  %v7151_v9 = vshrl.u32 %v14006_v11, 16  ;;  %v15830_v63 = vld [vmem:[#allocation5_spill] sm:$0xff] }
 0x23d   : > { %v3077_v51 = vshrl.u32 %v9620_v25, 16  ;;  %v3080_v60 = vshll.u32 %v9620_v25, 16  ;;  %v7126_v62 = vrot.slane %v7124_v50, 3  ;;  %v7154_v25 = vshll.u32 %v14006_v11, 16 }
 0x23e   : > { %v15831_v18 = vshrl.u32 %v15830_v63, 16  ;;  %v15832_v26 = vshll.u32 %v15830_v63, 16  ;;  %v7153_v50 = vrot.slane %v7151_v9, 3  ;;  %v15839_v9 = vld [vmem:[#allocation2_spill] sm:$0xff] }
 0x23f   : > { %v3079_v3 = vrot.slane %v3077_v51, 1  ;;  %v3082_v43 = vrot.slane %v3080_v60, 2  ;;  %v7130_v48 = vor.u32 %v7129_v0, %v7126_v62  ;;  %v7144_v60 = vrot.slane %v7142_v12, 3  ;;  %v15836_v0 = vld [vmem:[#allocation7_spill] sm:$0xff] }
 0x240   : > { %10973 = vmatmul.mubr.msk.bf16.gmra.mrb[80].mxu1 %vm895_vm1, %v2068_v4  ;;  %v7136_v4 = vshll.u32 %v13985_v54, 16  ;;  %v7122_v54 = vsel %vm6889_vm7, %v7112_v10, %v7121_v33  ;;  %v3108_v51 = vrot.slane %v15832_v26, 2  ;;  %v7147_v10 = vrot.slane %v7145_v8, 4 }
 0x241   : > { %10976 = vmatprep.mubr.msk.bf16.mxu1 %vm895_vm1, %v2070_v53  ;;  %v2076_v53 = vsel %vm1983_vm6, %v2073_v28, %v2075_v15  ;;  %v3083_v20 = vor.u32 %v3082_v43, %v3079_v3  ;;  %v7131_v44 = vsel %vm6889_vm7, %v7121_v33, %v7130_v48  ;;  %v7156_v19 = vrot.slane %v7154_v25, 4 }
 0x242   : > { %11419 = vmatmul.mubr.msk.bf16.gmra.mrb[36].mxu0 %vm895_vm1, %v7077_v52  ;;  %v2078_v52 = vsel %vm1983_vm6, %v2075_v15, %v2077_v16  ;;  %v7138_v28 = vrot.slane %v7136_v4, 4  ;;  %v3105_v15 = vrot.slane %v15831_v18, 1  ;;  %v7163_v33 = vshll.u32 %v14024_v31, 16  ;;  %v15840_v18 = vld [vmem:[#allocation8_spill] sm:$0xff] }
 0x243   : > { %11422 = vmatprep.mubr.msk.bf16.mxu0 %vm895_vm1, %v7086_v29  ;;  %v15824_v29 = vld [vmem:[#allocation3_spill] sm:$0xff]  ;;  %v7157_v3 = vor.u32 %v7156_v19, %v7153_v50  ;;  %v7172_v43 = vshll.u32 %v14028_v30, 16 }
 0x244   : > { %v15825_v55 = vshrl.u32 %v15824_v29, 16  ;;  %v15826_v22 = vshll.u32 %v15824_v29, 16  ;;  %v3109_v4 = vor.u32 %v3108_v51, %v3105_v15  ;;  %v15841_v15 = vshrl.u32 %v15840_v18, 16 }
 0x245   : > { %v7174_v8 = vrot.slane %v7172_v43, 4  ;;  %v15842_v51 = vshll.u32 %v15840_v18, 16 }
 0x246   : > { %v3087_v2 = vrot.slane %v15825_v55, 1  ;;  %v3090_v32 = vrot.slane %v15826_v22, 2  ;;  %v15833_v55 = vld [vmem:[#allocation6_spill] sm:$0xff]  ;;  %v3132_v26 = vrot.slane %v15841_v15, 1 }
 0x248   : > { %10977 = vmatmul.mubr.msk.bf16.gmra.mrb[84].mxu1 %vm895_vm1, %v2072_v56  ;;  %v3091_v5 = vor.u32 %v3090_v32, %v3087_v2  ;;  %v7139_v56 = vor.u32 %v7138_v28, %v7135_v37  ;;  %v15834_v2 = vshrl.u32 %v15833_v55, 16  ;;  %v15835_v32 = vshll.u32 %v15833_v55, 16 }
 0x249   : > { %10980 = vmatprep.mubr.msk.bf16.mxu1 %vm895_vm1, %v2074_v7  ;;  %v15827_v7 = vld [vmem:[#allocation4_spill] sm:$0xff] }
 0x24a   : > { %11423 = vmatmul.mubr.msk.bf16.gmra.mrb[40].mxu0 %vm895_vm1, %v7095_v42  ;;  %v15828_v42 = vshrl.u32 %v15827_v7, 16  ;;  %v15829_v21 = vshll.u32 %v15827_v7, 16  ;;  %v3092_v23 = vsel %vm3075_vm8, %v3083_v20, %v3091_v5  ;;  %v7140_v11 = vsel %vm6889_vm7, %v7130_v48, %v7139_v56 }
 0x24b   : > { %11426 = vmatprep.mubr.msk.bf16.mxu0 %vm895_vm1, %v7104_v49  ;;  %v3114_v22 = vrot.slane %v15834_v2, 1  ;;  %v7199_v2 = vshll.u32 %v14074_v17, 16 }
 0x24c   : > { %v3096_v38 = vrot.slane %v15828_v42, 1  ;;  %v3099_v49 = vrot.slane %v15829_v21, 2 }
 0x24e   : > { %v3100_v14 = vor.u32 %v3099_v49, %v3096_v38  ;;  %v7181_v38 = vshll.u32 %v14048_v57, 16  ;;  %v7187_v49 = vshrl.u32 %v14052_v34, 16 }
 0x250   : > { %10981 = vmatmul.mubr.msk.bf16.gmra.mrb[88].mxu1 %vm895_vm1, %v2076_v53  ;;  %v7148_v53 = vor.u32 %v7147_v10, %v7144_v60  ;;  %v3101_v29 = vsel %vm3075_vm8, %v3091_v5, %v3100_v14  ;;  %v3110_v62 = vsel %vm3075_vm8, %v3100_v14, %v3109_v4  ;;  %v15843_v10 = vld [vmem:[#allocation9_spill] sm:$0xff] }
 0x251   : > { %10984 = vmatprep.mubr.msk.bf16.mxu1 %vm895_vm1, %v2078_v52  ;;  %v7160_v52 = vshrl.u32 %v14024_v31, 16  ;;  %v15838_v31 = vshll.u32 %v15836_v0, 16 }
 0x252   : > { %11427 = vmatmul.mubr.msk.bf16.gmra.mrb[44].mxu0 %vm895_vm1, %v7113_v6  ;;  %v3117_v6 = vrot.slane %v15835_v32, 2  ;;  %v7149_v20 = vsel %vm6889_vm7, %v7139_v56, %v7148_v53  ;;  %v7158_v5 = vsel %vm6889_vm7, %v7148_v53, %v7157_v3  ;;  %v7178_v56 = vshrl.u32 %v14048_v57, 16 }
 0x253   : > { %11430 = vmatprep.mubr.msk.bf16.mxu0 %vm895_vm1, %v7122_v54  ;;  %v15837_v54 = vshrl.u32 %v15836_v0, 16  ;;  %v3126_v28 = vrot.slane %v15838_v31, 2  ;;  %v7162_v48 = vrot.slane %v7160_v52, 3  ;;  %v15845_v57 = vshll.u32 %v15843_v10, 16 }
 0x254   : > { %v3118_v25 = vor.u32 %v3117_v6, %v3114_v22  ;;  %v7180_v53 = vrot.slane %v7178_v56, 3  ;;  %v7189_v52 = vrot.slane %v7187_v49, 3  ;;  %v7208_v0 = vshll.u32 %v14078_v47, 16 }
 0x255   : > { %v3123_v37 = vrot.slane %v15837_v54, 1  ;;  %v3144_v19 = vrot.slane %v15845_v57, 2  ;;  %v15846_v54 = vld [vmem:[#allocation71_spill] sm:$0xff]  ;;  %v7201_v49 = vrot.slane %v7199_v2, 4 }
 0x256   : > { %v3119_v63 = vsel %vm3075_vm8, %v3109_v4, %v3118_v25  ;;  %v7210_v18 = vrot.slane %v7208_v0, 4 }
 0x257   : > { %v3127_v7 = vor.u32 %v3126_v28, %v3123_v37 }
 0x258   : > { %10985 = vmatmul.mubr.msk.bf16.gmra.mrb[100].mxu1 %vm895_vm1, %v2077_v16  ;;  %v7169_v16 = vshrl.u32 %v14028_v30, 16  ;;  %v7165_v30 = vrot.slane %v7163_v33, 4 }
 0x259   : > { %10990 = vmatprep.mubr.msk.bf16.mxu1 %vm895_vm1, %v3092_v23  ;;  %v7190_v23 = vshll.u32 %v14052_v34, 16  ;;  %v3128_v60 = vsel %vm3075_vm8, %v3118_v25, %v3127_v7  ;;  %v7183_v34 = vrot.slane %v7181_v38, 4 }
 0x25a   : > { %11431 = vmatmul.mubr.msk.bf16.gmra.mrb[48].mxu0 %vm895_vm1, %v7131_v44  ;;  %v7171_v12 = vrot.slane %v7169_v16, 3  ;;  %v7166_v42 = vor.u32 %v7165_v30, %v7162_v48  ;;  %v3135_v44 = vrot.slane %v15842_v51, 2  ;;  %v7214_v51 = vshrl.u32 %v14094_v46, 16 }
 0x25b   : > { %11434 = vmatprep.mubr.msk.bf16.mxu0 %vm895_vm1, %v7140_v11  ;;  %v15844_v11 = vshrl.u32 %v15843_v10, 16  ;;  %v7192_v33 = vrot.slane %v7190_v23, 4  ;;  %v7184_v55 = vor.u32 %v7183_v34, %v7180_v53  ;;  %v7226_v10 = vshll.u32 %v14098_v39, 16 }
 0x25c   : > { %v7175_v21 = vor.u32 %v7174_v8, %v7171_v12  ;;  %v7167_v14 = vsel %vm6889_vm7, %v7157_v3, %v7166_v42  ;;  %v3136_v16 = vor.u32 %v3135_v44, %v3132_v26  ;;  %v7196_v3 = vshrl.u32 %v14074_v17, 16  ;;  %v15850_v8 = vld [vmem:[#allocation11_spill] sm:$0xff] }
 0x25d   : > { %v3141_v50 = vrot.slane %v15844_v11, 1  ;;  %v7193_v6 = vor.u32 %v7192_v33, %v7189_v52  ;;  %v7228_v2 = vrot.slane %v7226_v10, 4 }
 0x25e   : > { %v7176_v4 = vsel %vm6889_vm7, %v7166_v42, %v7175_v21  ;;  %v3137_v28 = vsel %vm3075_vm8, %v3127_v7, %v3136_v16  ;;  %v7185_v7 = vsel %vm6889_vm7, %v7175_v21, %v7184_v55  ;;  %v7198_v38 = vrot.slane %v7196_v3, 3 }
 0x25f   : > { %v3145_v43 = vor.u32 %v3144_v19, %v3141_v50  ;;  %v7194_v23 = vsel %vm6889_vm7, %v7184_v55, %v7193_v6  ;;  %v7217_v21 = vshll.u32 %v14094_v46, 16  ;;  %v15853_v50 = vld [vmem:[#allocation12_spill] sm:$0xff]  ;;  %v7216_v55 = vrot.slane %v7214_v51, 3 }
 0x260   : > { %10991 = vmatmul.mubr.msk.bf16.vlgmr.msra.gmra.mrb[0].mxu1 %vm895_vm1, %v3101_v29  ;;  %v15854_v57 = vshrl.u32 %v15853_v50, 16  ;;  %v7253_v51 = vshll.u32 %v14134_v59, 16 }
 0x261   : > { %11577 = vmatpush3.bf16.msra.mxu1 %v15839_v9  ;;  %10994 = vmatprep.mubr.msk.bf16.mxu1 %vm895_vm1, %v3110_v62  ;;  %v7205_v62 = vshrl.u32 %v14078_v47, 16  ;;  %v3146_v12 = vsel %vm3075_vm8, %v3136_v16, %v3145_v43  ;;  %v15851_v9 = vshrl.u32 %v15850_v8, 16  ;;  %v15852_v47 = vshll.u32 %v15850_v8, 16 }
 0x262   : > { %11435 = vmatmul.mubr.msk.bf16.gmra.mrb[52].mxu0 %vm895_vm1, %v7149_v20  ;;  %v15847_v20 = vld [vmem:[#allocation10_spill] sm:$0xff]  ;;  %v3168_v19 = vrot.slane %v15854_v57, 1 }
 0x263   : > { %11438 = vmatprep.mubr.msk.bf16.mxu0 %vm895_vm1, %v7158_v5  ;;  %v15848_v48 = vshrl.u32 %v15847_v20, 16  ;;  %v15849_v17 = vshll.u32 %v15847_v20, 16  ;;  %v3159_v25 = vrot.slane %v15851_v9, 1  ;;  %v3162_v42 = vrot.slane %v15852_v47, 2  ;;  %v15862_v9 = vld [vmem:[#allocation15_spill] sm:$0xff] }
 0x264   : > { %v7244_v20 = vshll.u32 %v14118_v13, 16 }
 0x265   : > { %v3150_v30 = vrot.slane %v15848_v48, 1  ;;  %v3153_v5 = vrot.slane %v15849_v17, 2  ;;  %v3163_v26 = vor.u32 %v3162_v42, %v3159_v25  ;;  %v15863_v25 = vshrl.u32 %v15862_v9, 16 }
 0x267   : > { %v3154_v15 = vor.u32 %v3153_v5, %v3150_v30  ;;  %v15859_v30 = vld [vmem:[#allocation14_spill] sm:$0xff]  ;;  %v3195_v47 = vrot.slane %v15863_v25, 1 }
 0x268   : > { %10995 = vmatmul.mubr.msk.bf16.gmra.mrb[4].mxu1 %vm895_vm1, %v3119_v63  ;;  %v7207_v63 = vrot.slane %v7205_v62, 3  ;;  %v15860_v17 = vshrl.u32 %v15859_v30, 16 }
 0x269   : > { %10998 = vmatprep.mubr.msk.bf16.mxu1 %vm895_vm1, %v3128_v60  ;;  %v7223_v60 = vshrl.u32 %v14098_v39, 16  ;;  %v3155_v11 = vsel %vm3075_vm8, %v3145_v43, %v3154_v15  ;;  %v3164_v34 = vsel %vm3075_vm8, %v3154_v15, %v3163_v26  ;;  %v7219_v39 = vrot.slane %v7217_v21, 4 }
 0x26a   : > { %11439 = vmatmul.mubr.msk.bf16.gmra.mrb[56].mxu0 %vm895_vm1, %v7167_v14  ;;  %v7211_v44 = vor.u32 %v7210_v18, %v7207_v63  ;;  %v15855_v14 = vshll.u32 %v15853_v50, 16  ;;  %v3186_v5 = vrot.slane %v15860_v17, 1  ;;  %v7246_v63 = vrot.slane %v7244_v20, 4  ;;  %v15872_v20 = vld [vmem:[#allocation18_spill] sm:$0xff] }
 0x26b   : > { %v10888_v29 = vpop.f32.mrb[96].mxu1  ;;  %11442 = vmatprep.mubr.msk.bf16.mxu0 %vm895_vm1, %v7176_v4  ;;  %v15856_v4 = vld [vmem:[#allocation13_spill] sm:$0xff]  ;;  %v7225_v3 = vrot.slane %v7223_v60, 3  ;;  %v7220_v0 = vor.u32 %v7219_v39, %v7216_v55  ;;  %v7262_v60 = vshll.u32 %v14138_v24, 16  ;;  %v15874_v17 = vshll.u32 %v15872_v20, 16 }
 0x26c   : > { %v14474_v22 = vadd.f32 %v10888_v29, %v14058_v1  ;;  %v1963_v32 = vpop.f32.mrb[97].mxu1  ;;  %v3171_v53 = vrot.slane %v15855_v14, 2  ;;  %v15857_v52 = vshrl.u32 %v15856_v4, 16  ;;  %v15858_v46 = vshll.u32 %v15856_v4, 16 }
 0x26d   : > { %v14479_v37 = vadd.f32 %v1963_v32, %v15846_v54  ;;  %v10889_v31 = vpop.f32.mrb[98].mxu1  ;;  %v7232_v54 = vshrl.u32 %v14114_v36, 16  ;;  %v7264_v39 = vrot.slane %v7262_v60, 4  ;;  %v15879_v60 = vld [vmem:[#allocation20_spill] sm:$0xff] }
 0x26e   : > { %v1966_v1 = vpop.f32.mrb[99].mxu1  ;;  %v3177_v33 = vrot.slane %v15857_v52, 1  ;;  %v3180_v16 = vrot.slane %v15858_v46, 2  ;;  %v3172_v32 = vor.u32 %v3171_v53, %v3168_v19  ;;  %v7229_v31 = vor.u32 %v7228_v2, %v7225_v3 }
 0x26f   : > { %v14492_v56 = vadd.f32 %v1966_v1, %v14070_v58  ;;  %v7202_v58 = vor.u32 %v7201_v49, %v7198_v38  ;;  %v15861_v1 = vshll.u32 %v15859_v30, 16  ;;  %v7234_v38 = vrot.slane %v7232_v54, 3  ;;  %v15871_v54 = vld [vmem:[#allocation72_spill] sm:$0xff] }
 0x270   : > { %10999 = vmatmul.mubr.msk.bf16.gmra.mrb[8].mxu1 %vm895_vm1, %v3137_v28  ;;  %v3181_v62 = vor.u32 %v3180_v16, %v3177_v33  ;;  %v7241_v28 = vshrl.u32 %v14118_v13, 16  ;;  %v3173_v48 = vsel %vm3075_vm8, %v3163_v26, %v3172_v32  ;;  %v7230_v49 = vsel %vm6889_vm7, %v7220_v0, %v7229_v31 }
 0x271   : > { %11002 = vmatprep.mubr.msk.bf16.mxu1 %vm895_vm1, %v3146_v12  ;;  %v7203_v29 = vsel %vm6889_vm7, %v7193_v6, %v7202_v58  ;;  %v7212_v43 = vsel %vm6889_vm7, %v7202_v58, %v7211_v44  ;;  %v7235_v6 = vshll.u32 %v14114_v36, 16  ;;  %v3189_v12 = vrot.slane %v15861_v1, 2 }
 0x272   : > { %11443 = vmatmul.mubr.msk.bf16.gmra.mrb[60].mxu0 %vm895_vm1, %v7185_v7  ;;  %v3182_v8 = vsel %vm3075_vm8, %v3172_v32, %v3181_v62  ;;  %v15864_v36 = vshll.u32 %v15862_v9, 16  ;;  %v7221_v7 = vsel %vm6889_vm7, %v7211_v44, %v7220_v0  ;;  %v7250_v58 = vshrl.u32 %v14134_v59, 16 }
 0x273   : > { %11446 = vmatprep.mubr.msk.bf16.mxu0 %vm895_vm1, %v7194_v23  ;;  %v7237_v13 = vrot.slane %v7235_v6, 4  ;;  %v7243_v23 = vrot.slane %v7241_v28, 3  ;;  %v3190_v18 = vor.u32 %v3189_v12, %v3186_v5  ;;  %v7259_v44 = vshrl.u32 %v14138_v24, 16  ;;  %v15875_v12 = vld [vmem:[#allocation19_spill] sm:$0xff] }
 0x274   : > { %v3198_v42 = vrot.slane %v15864_v36, 2  ;;  %v7252_v16 = vrot.slane %v7250_v58, 3  ;;  %v7255_v24 = vrot.slane %v7253_v51, 4  ;;  %v7268_v32 = vshrl.u32 %v14154_v41, 16  ;;  %v15878_v58 = vld [vmem:[#allocation73_spill] sm:$0xff] }
 0x275   : > { %v7238_v26 = vor.u32 %v7237_v13, %v7234_v38  ;;  %v7247_v21 = vor.u32 %v7246_v63, %v7243_v23  ;;  %v3191_v10 = vsel %vm3075_vm8, %v3181_v62, %v3190_v18  ;;  %v7261_v55 = vrot.slane %v7259_v44, 3 }
 0x276   : > { %v3199_v15 = vor.u32 %v3198_v42, %v3195_v47  ;;  %v7256_v2 = vor.u32 %v7255_v24, %v7252_v16  ;;  %v7271_v62 = vshll.u32 %v14154_v41, 16  ;;  %v7277_v6 = vshrl.u32 %v15871_v54, 16 }
 0x277   : > { %v7239_v46 = vsel %vm6889_vm7, %v7229_v31, %v7238_v26  ;;  %v7265_v0 = vor.u32 %v7264_v39, %v7261_v55  ;;  %v7280_v31 = vshll.u32 %v15871_v54, 16  ;;  %v3225_v5 = vrot.slane %v15874_v17, 2  ;;  %v14601_v55 = vld [vmem:[%s12759_s25 + $0x188] sm:$0xf] }
 0x278   : > { %11003 = vmatmul.mubr.msk.bf16.gmra.mrb[12].mxu1 %vm895_vm1, %v3155_v11  ;;  %v15865_v11 = vld [vmem:[#allocation16_spill] sm:$0xff]  ;;  %v3200_v53 = vsel %vm3075_vm8, %v3190_v18, %v3199_v15  ;;  %v15877_v41 = vshll.u32 %v15875_v12, 16  ;;  %v7257_v47 = vsel %vm6889_vm7, %v7247_v21, %v7256_v2  ;;  %v7270_v36 = vrot.slane %v7268_v32, 3 }
 0x279   : > { %11006 = vmatprep.mubr.msk.bf16.mxu1 %vm895_vm1, %v3164_v34  ;;  %v15866_v50 = vshrl.u32 %v15865_v11, 16  ;;  %v15867_v19 = vshll.u32 %v15865_v11, 16  ;;  %v15868_v34 = vld [vmem:[#allocation17_spill] sm:$0xff]  ;;  %v7273_v42 = vrot.slane %v7271_v62, 4  ;;  %v7279_v38 = vrot.slane %v7277_v6, 3 }
 0x27a   : > { %11447 = vmatmul.mubr.msk.bf16.gmra.mrb[64].mxu0 %vm895_vm1, %v7203_v29  ;;  %v15869_v4 = vshrl.u32 %v15868_v34, 16  ;;  %v15870_v59 = vshll.u32 %v15868_v34, 16  ;;  %v7248_v29 = vsel %vm6889_vm7, %v7238_v26, %v7247_v21  ;;  %v3234_v25 = vrot.slane %v15877_v41, 2 }
 0x27b   : > { %11450 = vmatprep.mubr.msk.bf16.mxu0 %vm895_vm1, %v7212_v43  ;;  %v3204_v57 = vrot.slane %v15866_v50, 1  ;;  %v3207_v14 = vrot.slane %v15867_v19, 2  ;;  %v7282_v13 = vrot.slane %v7280_v31, 4  ;;  %v7274_v63 = vor.u32 %v7273_v42, %v7270_v36  ;;  %v14590_v19 = vld [vmem:[%s12759_s25 + $0x18c] sm:$0xf] }
 0x27c   : > { %v3213_v52 = vrot.slane %v15869_v4, 1  ;;  %v3216_v33 = vrot.slane %v15870_v59, 2  ;;  %v7286_v18 = vshrl.u32 %v14174_v45, 16  ;;  %v7295_v51 = vshrl.u32 %v15878_v58, 16 }
 0x27d   : > { %v3208_v43 = vor.u32 %v3207_v14, %v3204_v57  ;;  %v7283_v26 = vor.u32 %v7282_v13, %v7279_v38  ;;  %v7298_v21 = vshll.u32 %v15878_v58, 16  ;;  %v15881_v50 = vshll.u32 %v15879_v60, 16 }
 0x27e   : > { %v3217_v3 = vor.u32 %v3216_v33, %v3213_v52  ;;  %v7275_v59 = vsel %vm6889_vm7, %v7265_v0, %v7274_v63  ;;  %v7288_v33 = vrot.slane %v7286_v18, 3  ;;  %v7297_v24 = vrot.slane %v7295_v51, 3  ;;  %v15891_v18 = vld [vmem:[#allocation24_spill] sm:$0xff] }
 0x27f   : > { %v3209_v28 = vsel %vm3075_vm8, %v3199_v15, %v3208_v43  ;;  %v7289_v15 = vshll.u32 %v14174_v45, 16  ;;  %v3243_v57 = vrot.slane %v15881_v50, 2  ;;  %v7284_v16 = vsel %vm6889_vm7, %v7274_v63, %v7283_v26 }
 0x280   : > { %11007 = vmatmul.mubr.msk.bf16.gmra.mrb[16].mxu1 %vm895_vm1, %v3173_v48  ;;  %v15873_v48 = vshrl.u32 %v15872_v20, 16  ;;  %v3218_v1 = vsel %vm3075_vm8, %v3208_v43, %v3217_v3  ;;  %v9914_v39 = vcombine.low %v14601_v55, %v14590_v19  ;;  %v7304_v32 = vshrl.u32 %v14194_v27, 16 }
 0x281   : > { %11010 = vmatprep.mubr.msk.bf16.mxu1 %vm895_vm1, %v3182_v8  ;;  %v15876_v8 = vshrl.u32 %v15875_v12, 16  ;;  %v7307_v62 = vshll.u32 %v14194_v27, 16  ;;  %v15893_v58 = vshll.u32 %v15891_v18, 16 }
 0x282   : > { %11451 = vmatmul.mubr.msk.bf16.gmra.mrb[68].mxu0 %vm895_vm1, %v7221_v7  ;;  %v3222_v30 = vrot.slane %v15873_v48, 1  ;;  %v7266_v7 = vsel %vm6889_vm7, %v7256_v2, %v7265_v0  ;;  %v7313_v54 = vshrl.u32 %v9914_v39, 16  ;;  %v7316_v6 = vshll.u32 %v9914_v39, 16 }
 0x283   : > { %11454 = vmatprep.mubr.msk.bf16.mxu0 %vm895_vm1, %v7230_v49  ;;  %v3231_v9 = vrot.slane %v15876_v8, 1  ;;  %v3279_v51 = vrot.slane %v15893_v58, 2  ;;  %v12586_v58 = vld [vmem:[%s12759_s25 + $0x30] sm:$0xf] }
 0x284   : > { %v3226_v49 = vor.u32 %v3225_v5, %v3222_v30  ;;  %v7315_v42 = vrot.slane %v7313_v54, 3 }
 0x285   : > { %v3235_v23 = vor.u32 %v3234_v25, %v3231_v9  ;;  %v7306_v25 = vrot.slane %v7304_v32, 3  ;;  %v12582_v32 = vld [vmem:[%s12759_s25 + $0x18] sm:$0xf] }
 0x286   : > { %v3227_v44 = vsel %vm3075_vm8, %v3217_v3, %v3226_v49 }
 0x287   : > { %v3236_v14 = vsel %vm3075_vm8, %v3226_v49, %v3235_v23 }
 0x288   : > { %11011 = vmatmul.mubr.msk.bf16.gmra.mrb[20].mxu1 %vm895_vm1, %v3191_v10  ;;  %v15880_v10 = vshrl.u32 %v15879_v60, 16 }
 0x289   : > { %11014 = vmatprep.mubr.msk.bf16.mxu1 %vm895_vm1, %v3200_v53  ;;  %v15882_v53 = vld [vmem:[#allocation21_spill] sm:$0xff] }
 0x28a   : > { %11455 = vmatmul.mubr.msk.bf16.gmra.mrb[72].mxu0 %vm895_vm1, %v7239_v46  ;;  %v3240_v11 = vrot.slane %v15880_v10, 1  ;;  %v15883_v45 = vshrl.u32 %v15882_v53, 16  ;;  %v15884_v4 = vshll.u32 %v15882_v53, 16  ;;  %v7291_v46 = vrot.slane %v7289_v15, 4 }
 0x28b   : > { %11458 = vmatprep.mubr.msk.bf16.mxu0 %vm895_vm1, %v7248_v29  ;;  %v7300_v29 = vrot.slane %v7298_v21, 4  ;;  %v15892_v15 = vshrl.u32 %v15891_v18, 16 }
 0x28c   : > { %v3249_v34 = vrot.slane %v15883_v45, 1  ;;  %v3252_v52 = vrot.slane %v15884_v4, 2  ;;  %v3244_v43 = vor.u32 %v3243_v57, %v3240_v11  ;;  %v7292_v2 = vor.u32 %v7291_v46, %v7288_v33  ;;  %v15897_v4 = vld [vmem:[#allocation26_spill] sm:$0xff] }
 0x28d   : > { %v7301_v0 = vor.u32 %v7300_v29, %v7297_v24  ;;  %v15899_v33 = vshll.u32 %v15897_v4, 16  ;;  %v15900_v24 = vld [vmem:[#allocation29_spill] sm:$0xff] }
 0x28e   : > { %v3253_v3 = vor.u32 %v3252_v52, %v3249_v34  ;;  %v3245_v31 = vsel %vm3075_vm8, %v3235_v23, %v3244_v43  ;;  %v7293_v27 = vsel %vm6889_vm7, %v7283_v26, %v7292_v2  ;;  %v3276_v26 = vrot.slane %v15892_v15, 1 }
 0x28f   : > { %v7302_v36 = vsel %vm6889_vm7, %v7292_v2, %v7301_v0  ;;  %v15898_v52 = vshrl.u32 %v15897_v4, 16  ;;  %v3297_v46 = vrot.slane %v15899_v33, 2  ;;  %v15901_v29 = vshrl.u32 %v15900_v24, 16  ;;  %v12581_v2 = vld [vmem:[%s12759_s25 + $0x14] sm:$0xf] }
 0x290   : > { %11015 = vmatmul.mubr.msk.bf16.gmra.mrb[24].mxu1 %vm895_vm1, %v3209_v28  ;;  %v15885_v28 = vld [vmem:[#allocation22_spill] sm:$0xff]  ;;  %v3254_v5 = vsel %vm3075_vm8, %v3244_v43, %v3253_v3  ;;  %v3280_v53 = vor.u32 %v3279_v51, %v3276_v26  ;;  %v15902_v43 = vshll.u32 %v15900_v24, 16  ;;  %v12585_v26 = vld [vmem:[%s12759_s25 + $0x2c] sm:$0xf] }
 0x291   : > { %11018 = vmatprep.mubr.msk.bf16.mxu1 %vm895_vm1, %v3218_v1  ;;  %v15886_v20 = vshrl.u32 %v15885_v28, 16  ;;  %v15887_v30 = vshll.u32 %v15885_v28, 16  ;;  %v15888_v1 = vld [vmem:[#allocation23_spill] sm:$0xff]  ;;  %v3303_v39 = vrot.slane %v15901_v29, 1  ;;  %v9967_v51 = vcombine.low %v12585_v26, %v12586_v58 }
 0x292   : > { %11459 = vmatmul.mubr.msk.bf16.gmra.mrb[76].mxu0 %vm895_vm1, %v7257_v47  ;;  %v15889_v12 = vshrl.u32 %v15888_v1, 16  ;;  %v15890_v9 = vshll.u32 %v15888_v1, 16  ;;  %v7309_v47 = vrot.slane %v7307_v62, 4  ;;  %v9964_v62 = vcombine.low %v12581_v2, %v12582_v32 }
 0x293   : > { %11462 = vmatprep.mubr.msk.bf16.mxu0 %vm895_vm1, %v7266_v7  ;;  %v3258_v48 = vrot.slane %v15886_v20, 1  ;;  %v3261_v17 = vrot.slane %v15887_v30, 2  ;;  %v7318_v7 = vrot.slane %v7316_v6, 4 }
 0x294   : > { %v3267_v8 = vrot.slane %v15889_v12, 1  ;;  %v3270_v41 = vrot.slane %v15890_v9, 2  ;;  %v7310_v49 = vor.u32 %v7309_v47, %v7306_v25 }
 0x295   : > { %v3262_v38 = vor.u32 %v3261_v17, %v3258_v48  ;;  %v7319_v23 = vor.u32 %v7318_v7, %v7315_v42  ;;  %v15910_v42 = vld [vmem:[#allocation28_spill] sm:$0xff] }
 0x296   : > { %v3271_v13 = vor.u32 %v3270_v41, %v3267_v8  ;;  %v7311_v57 = vsel %vm6889_vm7, %v7301_v0, %v7310_v49  ;;  %v12583_v41 = vld [vmem:[%s12759_s25 + $0x24] sm:$0xf] }
 0x297   : > { %v3263_v63 = vsel %vm3075_vm8, %v3253_v3, %v3262_v38  ;;  %v3306_v3 = vrot.slane %v15902_v43, 2  ;;  %v12590_v43 = vld [vmem:[%s12759_s25 + $0x40] sm:$0xf] }
 0x298   : > { %11019 = vmatmul.mubr.msk.bf16.gmra.mrb[28].mxu1 %vm895_vm1, %v3227_v44  ;;  %v3272_v21 = vsel %vm3075_vm8, %v3262_v38, %v3271_v13  ;;  %v15894_v44 = vld [vmem:[#allocation25_spill] sm:$0xff]  ;;  %v3281_v34 = vsel %vm3075_vm8, %v3271_v13, %v3280_v53 }
 0x299   : > { %11022 = vmatprep.mubr.msk.bf16.mxu1 %vm895_vm1, %v3236_v14  ;;  %v15895_v60 = vshrl.u32 %v15894_v44, 16  ;;  %v15896_v11 = vshll.u32 %v15894_v44, 16  ;;  %v7320_v14 = vsel %vm6889_vm7, %v7310_v49, %v7319_v23  ;;  %v3307_v54 = vor.u32 %v3306_v3, %v3303_v39  ;;  %v15912_v49 = vld [vmem:[#allocation33_spill] sm:$0xff]  ;;  %v15915_v44 = vld [vmem:[#allocation34_spill] sm:$0xff] }
 0x29a   : > { %11463 = vmatmul.mubr.msk.bf16.gmra.mrb[80].mxu0 %vm895_vm1, %v7275_v59  ;;  %v3294_v59 = vrot.slane %v15898_v52, 1  ;;  %v15914_v18 = vshll.u32 %v15912_v49, 16  ;;  %v12589_v39 = vld [vmem:[%s12759_s25 + $0x3c] sm:$0xf] }
 0x29b   : > { %11466 = vmatprep.mubr.msk.bf16.mxu0 %vm895_vm1, %v7284_v16  ;;  %v3285_v10 = vrot.slane %v15895_v60, 1  ;;  %v3288_v50 = vrot.slane %v15896_v11, 2  ;;  %v15916_v60 = vshrl.u32 %v15915_v44, 16  ;;  %v15917_v11 = vshll.u32 %v15915_v44, 16  ;;  %v15933_v44 = vld [vmem:[#allocation39_spill] sm:$0xff] }
 0x29c   : > { %v3298_v0 = vor.u32 %v3297_v46, %v3294_v59  ;;  %v3333_v15 = vrot.slane %v15914_v18, 2  ;;  %v15918_v59 = vld [vmem:[#allocation35_spill] sm:$0xff]  ;;  %v9969_v3 = vcombine.low %v12589_v39, %v12590_v43  ;;  %v12595_v18 = vld [vmem:[%s12759_s25 + $0x54] sm:$0xf] }
 0x29d   : > { %v3289_v45 = vor.u32 %v3288_v50, %v3285_v10  ;;  %v3339_v10 = vrot.slane %v15916_v60, 1  ;;  %v3342_v50 = vrot.slane %v15917_v11, 2  ;;  %v15919_v33 = vshrl.u32 %v15918_v59, 16 }
 0x29e   : > { %v3308_v17 = vsel %vm3075_vm8, %v3298_v0, %v3307_v54  ;;  %v15934_v60 = vshrl.u32 %v15933_v44, 16  ;;  %v15935_v11 = vshll.u32 %v15933_v44, 16 }
 0x29f   : > { %v3290_v16 = vsel %vm3075_vm8, %v3280_v53, %v3289_v45  ;;  %v3299_v6 = vsel %vm3075_vm8, %v3289_v45, %v3298_v0  ;;  %v3348_v46 = vrot.slane %v15919_v33, 1 }
 0x2a0   : > { %11023 = vmatmul.mubr.msk.bf16.gmra.mrb[32].mxu1 %vm895_vm1, %v3245_v31  ;;  %v15903_v31 = vld [vmem:[#allocation31_spill] sm:$0xff] }
 0x2a1   : > { %11026 = vmatprep.mubr.msk.bf16.mxu1 %vm895_vm1, %v3254_v5  ;;  %v15904_v28 = vshrl.u32 %v15903_v31, 16  ;;  %v15905_v48 = vshll.u32 %v15903_v31, 16  ;;  %v15906_v5 = vld [vmem:[#allocation32_spill] sm:$0xff] }
 0x2a2   : > { %11467 = vmatmul.mubr.msk.bf16.gmra.mrb[84].mxu0 %vm895_vm1, %v7293_v27  ;;  %v15907_v1 = vshrl.u32 %v15906_v5, 16  ;;  %v15908_v8 = vshll.u32 %v15906_v5, 16  ;;  %v12584_v27 = vld [vmem:[%s12759_s25 + $0x28] sm:$0xf] }
 0x2a3   : > { %11470 = vmatprep.mubr.msk.bf16.mxu0 %vm895_vm1, %v7302_v36  ;;  %v3312_v20 = vrot.slane %v15904_v28, 1  ;;  %v3315_v30 = vrot.slane %v15905_v48, 2  ;;  %v9966_v25 = vcombine.low %v12583_v41, %v12584_v27  ;;  %v15909_v36 = vld [vmem:[#allocation27_spill] sm:$0xff] }
 0x2a4   : > { %v3321_v12 = vrot.slane %v15907_v1, 1  ;;  %v3324_v9 = vrot.slane %v15908_v8, 2  ;;  %v15911_v7 = vcombine.low %v15909_v36, %v15910_v42  ;;  %v12592_v48 = vld [vmem:[%s12759_s25 + $0x48] sm:$0xf]  ;;  %v15927_v8 = vld [vmem:[#allocation37_spill] sm:$0xff] }
 0x2a5   : > { %v3316_v47 = vor.u32 %v3315_v30, %v3312_v20  ;;  %v12591_v20 = vld [vmem:[%s12759_s25 + $0x44] sm:$0xf]  ;;  %v15929_v27 = vshll.u32 %v15927_v8, 16  ;;  %v12594_v36 = vld [vmem:[%s12759_s25 + $0x50] sm:$0xf] }
 0x2a6   : > { %v3325_v38 = vor.u32 %v3324_v9, %v3321_v12  ;;  %v9970_v30 = vcombine.low %v12591_v20, %v12592_v48  ;;  %v15928_v9 = vshrl.u32 %v15927_v8, 16  ;;  %v12602_v20 = vld [vmem:[%s12759_s25 + $0x70] sm:$0xf] }
 0x2a7   : > { %v3317_v13 = vsel %vm3075_vm8, %v3307_v54, %v3316_v47 }
 0x2a8   : > { %11027 = vmatmul.mubr.msk.bf16.gmra.mrb[36].mxu1 %vm895_vm1, %v3263_v63  ;;  %v3366_v41 = vrot.slane %v15928_v9, 1 }
 0x2a9   : > { %11030 = vmatprep.mubr.msk.bf16.mxu1 %vm895_vm1, %v3272_v21  ;;  %v3326_v21 = vsel %vm3075_vm8, %v3316_v47, %v3325_v38  ;;  %v12593_v47 = vld [vmem:[%s12759_s25 + $0x4c] sm:$0xf] }
 0x2aa   : > { %11471 = vmatmul.mubr.msk.bf16.gmra.mrb[88].mxu0 %vm895_vm1, %v7311_v57  ;;  %v12587_v57 = vld [vmem:[%s12759_s25 + $0x34] sm:$0xf]  ;;  %v9971_v42 = vcombine.low %v12593_v47, %v12594_v36 }
 0x2ab   : > { %11474 = vmatprep.mubr.msk.bf16.mxu0 %vm895_vm1, %v7320_v14  ;;  %v12588_v14 = vld [vmem:[%s12759_s25 + $0x38] sm:$0xf] }
 0x2ac   : > { %v9968_v53 = vcombine.low %v12587_v57, %v12588_v14  ;;  %v12597_v57 = vld [vmem:[%s12759_s25 + $0x5c] sm:$0xf]  ;;  %v12598_v14 = vld [vmem:[%s12759_s25 + $0x60] sm:$0xf] }
 0x2b0   : > { %11031 = vmatmul.mubr.msk.bf16.gmra.mrb[40].mxu1 %vm895_vm1, %v3281_v34  ;;  %v3343_v34 = vor.u32 %v3342_v50, %v3339_v10  ;;  %v3384_v10 = vrot.slane %v15934_v60, 1  ;;  %v3387_v50 = vrot.slane %v15935_v11, 2  ;;  %v12608_v11 = vld [vmem:[%s12759_s25 + $0x88] sm:$0xf] }
 0x2b1   : > { %11034 = vmatprep.mubr.msk.bf16.mxu1 %vm895_vm1, %v3290_v16  ;;  %v15920_v16 = vshll.u32 %v15918_v59, 16 }
 0x2b2   : > { %11475 = vmatmul.mubr.msk.bf16.gmra.mrb[100].mxu0 %vm895_vm1, %v7319_v23  ;;  %v15913_v23 = vshrl.u32 %v15912_v49, 16  ;;  %v3388_v43 = vor.u32 %v3387_v50, %v3384_v10  ;;  %v12607_v10 = vld [vmem:[%s12759_s25 + $0x84] sm:$0xf] }
 0x2b3   : > { %11480 = vmatprep.mubr.msk.bf16.mxu0 %vm895_vm1, %v9964_v62  ;;  %v3351_v24 = vrot.slane %v15920_v16, 2  ;;  %v15923_v62 = vld [vmem:[#allocation36_spill] sm:$0xff]  ;;  %v12599_v16 = vld [vmem:[%s12759_s25 + $0x64] sm:$0xf]  ;;  %v9978_v50 = vcombine.low %v12607_v10, %v12608_v11 }
 0x2b4   : > { %v3330_v63 = vrot.slane %v15913_v23, 1  ;;  %v15924_v0 = vshrl.u32 %v15923_v62, 16 }
 0x2b5   : > { %v3352_v5 = vor.u32 %v3351_v24, %v3348_v46  ;;  %v12600_v24 = vld [vmem:[%s12759_s25 + $0x68] sm:$0xf] }
 0x2b6   : > { %v3334_v45 = vor.u32 %v3333_v15, %v3330_v63  ;;  %v3357_v54 = vrot.slane %v15924_v0, 1  ;;  %v12596_v15 = vld [vmem:[%s12759_s25 + $0x58] sm:$0xf]  ;;  %v9974_v39 = vcombine.low %v12599_v16, %v12600_v24  ;;  %v12610_v16 = vld [vmem:[%s12759_s25 + $0x90] sm:$0xf] }
 0x2b7   : > { %v3353_v12 = vsel %vm3075_vm8, %v3343_v34, %v3352_v5  ;;  %v9972_v26 = vcombine.low %v12595_v18, %v12596_v15  ;;  %v12606_v18 = vld [vmem:[%s12759_s25 + $0x80] sm:$0xf] }
 0x2b8   : > { %11035 = vmatmul.mubr.msk.bf16.gmra.mrb[44].mxu1 %vm895_vm1, %v3299_v6  ;;  %v3335_v52 = vsel %vm3075_vm8, %v3325_v38, %v3334_v45  ;;  %v3344_v2 = vsel %vm3075_vm8, %v3334_v45, %v3343_v34  ;;  %v15925_v6 = vshll.u32 %v15923_v62, 16  ;;  %v15930_v38 = vld [vmem:[#allocation38_spill] sm:$0xff]  ;;  %v15936_v34 = vld [vmem:[#allocation40_spill] sm:$0xff]  ;;  %v15939_v62 = vld [vmem:[#allocation41_spill] sm:$0xff] }
 0x2b9   : > { %11038 = vmatprep.mubr.msk.bf16.mxu1 %vm895_vm1, %v3308_v17  ;;  %v15932_v23 = vshll.u32 %v15930_v38, 16  ;;  %v15938_v33 = vshll.u32 %v15936_v34, 16  ;;  %v15940_v0 = vshrl.u32 %v15939_v62, 16 }
 0x2ba   : > { %11481 = vmatmul.mubr.msk.bf16.vlgmr.msra.gmra.mrb[0].mxu0 %vm895_vm1, %v15911_v7  ;;  %v3360_v31 = vrot.slane %v15925_v6, 2  ;;  %v15941_v6 = vshll.u32 %v15939_v62, 16 }
 0x2bb   : > { %11484 = vmatprep.mubr.msk.bf16.mxu0 %vm895_vm1, %v9966_v25  ;;  %v3369_v25 = vrot.slane %v15929_v27, 2  ;;  %v3378_v63 = vrot.slane %v15932_v23, 2  ;;  %v3396_v46 = vrot.slane %v15938_v33, 2  ;;  %v12604_v27 = vld [vmem:[%s12759_s25 + $0x78] sm:$0xf] }
 0x2bc   : > { %v3361_v1 = vor.u32 %v3360_v31, %v3357_v54  ;;  %v3402_v54 = vrot.slane %v15940_v0, 1  ;;  %v3405_v31 = vrot.slane %v15941_v6, 2  ;;  %v12612_v6 = vld [vmem:[%s12759_s25 + $0x98] sm:$0xf] }
 0x2bd   : > { %v3370_v58 = vor.u32 %v3369_v25, %v3366_v41  ;;  %v12603_v41 = vld [vmem:[%s12759_s25 + $0x74] sm:$0xf] }
 0x2be   : > { %v3362_v7 = vsel %vm3075_vm8, %v3352_v5, %v3361_v1  ;;  %v15942_v5 = vld [vmem:[#allocation42_spill] sm:$0xff]  ;;  %v9976_v25 = vcombine.low %v12603_v41, %v12604_v27  ;;  %v3406_v47 = vor.u32 %v3405_v31, %v3402_v54  ;;  %v12611_v54 = vld [vmem:[%s12759_s25 + $0x94] sm:$0xf] }
 0x2bf   : > { %v15944_v8 = vshll.u32 %v15942_v5, 16  ;;  %v9980_v31 = vcombine.low %v12611_v54, %v12612_v6  ;;  %v12614_v41 = vld [vmem:[%s12759_s25 + $0xa0] sm:$0xf] }
 0x2c0   : > { %11039 = vmatmul.mubr.msk.bf16.gmra.mrb[48].mxu1 %vm895_vm1, %v3317_v13  ;;  %v15931_v13 = vshrl.u32 %v15930_v38, 16 }
 0x2c1   : > { %11042 = vmatprep.mubr.msk.bf16.mxu1 %vm895_vm1, %v3326_v21  ;;  %v3371_v21 = vsel %vm3075_vm8, %v3361_v1, %v3370_v58  ;;  %v15943_v1 = vshrl.u32 %v15942_v5, 16  ;;  %v3414_v9 = vrot.slane %v15944_v8, 2 }
 0x2c2   : > { %11485 = vmatmul.mubr.msk.bf16.gmra.mrb[4].mxu0 %vm895_vm1, %v9967_v51  ;;  %v3375_v49 = vrot.slane %v15931_v13, 1 }
 0x2c3   : > { %11488 = vmatprep.mubr.msk.bf16.mxu0 %vm895_vm1, %v9968_v53  ;;  %v9973_v53 = vcombine.low %v12597_v57, %v12598_v14 }
 0x2c4   : > { %v3379_v51 = vor.u32 %v3378_v63, %v3375_v49  ;;  %v12605_v63 = vld [vmem:[%s12759_s25 + $0x7c] sm:$0xf] }
 0x2c5   : > { %v14700_v29 = vpop.f32.mrb[96].mxu0  ;;  %v9977_v15 = vcombine.low %v12605_v63, %v12606_v18  ;;  %v2832_v18 = vld [vmem:[%s12759_s25 + $0x184] sm:$0x3] }
 0x2c6   : > { %15921 = vst [vmem:[#allocation54_spill] sm:$0xff] %v14700_v29  ;;  %v14705_v32 = vpop.f32.mrb[97].mxu0  ;;  %v3380_v45 = vsel %vm3075_vm8, %v3370_v58, %v3379_v51  ;;  %v15948_v58 = vld [vmem:[#allocation44_spill] sm:$0xff] }
 0x2c7   : > { %15922 = vst [vmem:[#allocation56_spill] sm:$0xff] %v14705_v32  ;;  %v11379_v28 = vpop.f32.mrb[98].mxu0  ;;  %v15950_v44 = vshll.u32 %v15948_v58, 16 }
 0x2c8   : > { %11043 = vmatmul.mubr.msk.bf16.gmra.mrb[52].mxu1 %vm895_vm1, %v3335_v52  ;;  %v14714_v17 = vpop.f32.mrb[99].mxu0  ;;  %v15937_v52 = vshrl.u32 %v15936_v34, 16  ;;  %v12601_v28 = vld [vmem:[%s12759_s25 + $0x6c] sm:$0xf] }
 0x2c9   : > { %15926 = vst [vmem:[#allocation52_spill] sm:$0xff] %v14714_v17  ;;  %11046 = vmatprep.mubr.msk.bf16.mxu1 %vm895_vm1, %v3344_v2  ;;  %v3389_v2 = vsel %vm3075_vm8, %v3379_v51, %v3388_v43  ;;  %v9975_v48 = vcombine.low %v12601_v28, %v12602_v20  ;;  %v15949_v51 = vshrl.u32 %v15948_v58, 16  ;;  %v3432_v60 = vrot.slane %v15950_v44, 2 }
 0x2ca   : > { %11489 = vmatmul.mubr.msk.bf16.gmra.mrb[8].mxu0 %vm895_vm1, %v9969_v3  ;;  %v3393_v59 = vrot.slane %v15937_v52, 1 }
 0x2cb   : > { %11492 = vmatprep.mubr.msk.bf16.mxu0 %vm895_vm1, %v9970_v30 }
 0x2cc   : > { %v3397_v3 = vor.u32 %v3396_v46, %v3393_v59  ;;  %v12609_v46 = vld [vmem:[%s12759_s25 + $0x8c] sm:$0xf] }
 0x2cd   : > { %v9979_v24 = vcombine.low %v12609_v46, %v12610_v16  ;;  %v12620_v46 = vld [vmem:[%s12759_s25 + $0xb4] sm:$0xf]  ;;  %v12621_v16 = vld [vmem:[%s12759_s25 + $0xb8] sm:$0xf] }
 0x2ce   : > { %v3398_v30 = vsel %vm3075_vm8, %v3388_v43, %v3397_v3  ;;  %v15954_v43 = vld [vmem:[#allocation46_spill] sm:$0xff] }
 0x2cf   : > { %v15956_v62 = vshll.u32 %v15954_v43, 16 }
 0x2d0   : > { %11047 = vmatmul.mubr.msk.bf16.gmra.mrb[56].mxu1 %vm895_vm1, %v3353_v12  ;;  %v3411_v12 = vrot.slane %v15943_v1, 1 }
 0x2d1   : > { %11050 = vmatprep.mubr.msk.bf16.mxu1 %vm895_vm1, %v3362_v7  ;;  %v15945_v7 = vld [vmem:[#allocation43_spill] sm:$0xff]  ;;  %v3450_v0 = vrot.slane %v15956_v62, 2 }
 0x2d2   : > { %11493 = vmatmul.mubr.msk.bf16.gmra.mrb[12].mxu0 %vm895_vm1, %v9971_v42  ;;  %v3415_v36 = vor.u32 %v3414_v9, %v3411_v12  ;;  %v3407_v42 = vsel %vm3075_vm8, %v3397_v3, %v3406_v47  ;;  %v15946_v38 = vshrl.u32 %v15945_v7, 16  ;;  %v15947_v49 = vshll.u32 %v15945_v7, 16  ;;  %v12613_v9 = vld [vmem:[%s12759_s25 + $0x9c] sm:$0xf] }
 0x2d3   : > { %11496 = vmatprep.mubr.msk.bf16.mxu0 %vm895_vm1, %v9972_v26  ;;  %v15955_v3 = vshrl.u32 %v15954_v43, 16  ;;  %v9981_v27 = vcombine.low %v12613_v9, %v12614_v41  ;;  %v12625_v9 = vld [vmem:[%s12759_s25 + $0xc8] sm:$0xf] }
 0x2d4   : > { %v3420_v13 = vrot.slane %v15946_v38, 1  ;;  %v3423_v23 = vrot.slane %v15947_v49, 2  ;;  %v3416_v26 = vsel %vm3075_vm8, %v3406_v47, %v3415_v36  ;;  %v15960_v47 = vld [vmem:[#allocation48_spill] sm:$0xff]  ;;  %v12616_v49 = vld [vmem:[%s12759_s25 + $0xa8] sm:$0xf] }
 0x2d5   : > { %v15962_v7 = vshll.u32 %v15960_v47, 16 }
 0x2d6   : > { %v3424_v57 = vor.u32 %v3423_v23, %v3420_v13  ;;  %v12615_v13 = vld [vmem:[%s12759_s25 + $0xa4] sm:$0xf] }
 0x2d7   : > { %v3468_v38 = vrot.slane %v15962_v7, 2  ;;  %v9982_v23 = vcombine.low %v12615_v13, %v12616_v49  ;;  %v12628_v13 = vld [vmem:[%s12759_s25 + $0xd4] sm:$0xf]  ;;  %v12629_v49 = vld [vmem:[%s12759_s25 + $0xd8] sm:$0xf] }
 0x2d8   : > { %11051 = vmatmul.mubr.msk.bf16.gmra.mrb[60].mxu1 %vm895_vm1, %v3371_v21  ;;  %v3429_v21 = vrot.slane %v15949_v51, 1 }
 0x2d9   : > { %11054 = vmatprep.mubr.msk.bf16.mxu1 %vm895_vm1, %v3380_v45  ;;  %v15951_v45 = vld [vmem:[#allocation45_spill] sm:$0xff] }
 0x2da   : > { %11497 = vmatmul.mubr.msk.bf16.gmra.mrb[16].mxu0 %vm895_vm1, %v9973_v53  ;;  %v3433_v14 = vor.u32 %v3432_v60, %v3429_v21  ;;  %v3425_v53 = vsel %vm3075_vm8, %v3415_v36, %v3424_v57  ;;  %v15952_v34 = vshrl.u32 %v15951_v45, 16  ;;  %v15953_v59 = vshll.u32 %v15951_v45, 16  ;;  %v15963_v21 = vld [vmem:[#allocation49_spill] sm:$0xff]  ;;  %v15966_v45 = vld [vmem:[#allocation50_spill] sm:$0xff] }
 0x2db   : > { %11500 = vmatprep.mubr.msk.bf16.mxu0 %vm895_vm1, %v9974_v39  ;;  %v15961_v36 = vshrl.u32 %v15960_v47, 16  ;;  %v15964_v44 = vshrl.u32 %v15963_v21, 16  ;;  %v15965_v10 = vshll.u32 %v15963_v21, 16  ;;  %v15972_v21 = vrot.slane %v15897_v4, 2 }
 0x2dc   : > { %v3438_v52 = vrot.slane %v15952_v34, 1  ;;  %v3441_v33 = vrot.slane %v15953_v59, 2  ;;  %v3434_v39 = vsel %vm3075_vm8, %v3424_v57, %v3433_v14  ;;  %v12619_v57 = vld [vmem:[%s12759_s25 + $0xb0] sm:$0xf]  ;;  %v15967_v34 = vshrl.u32 %v15966_v45, 16 }
 0x2dd   : > { %v3474_v60 = vrot.slane %v15964_v44, 1  ;;  %v3477_v11 = vrot.slane %v15965_v10, 2  ;;  %v15968_v59 = vshll.u32 %v15966_v45, 16  ;;  %v12634_v10 = vld [vmem:[%s12759_s25 + $0xe8] sm:$0xf] }
 0x2de   : > { %v3442_v28 = vor.u32 %v3441_v33, %v3438_v52  ;;  %v3483_v52 = vrot.slane %v15967_v34, 1  ;;  %v12637_v45 = vld [vmem:[%s12759_s25 + $0xec] sm:$0xf]  ;;  %v12638_v34 = vld [vmem:[%s12759_s25 + $0xf0] sm:$0xf] }
 0x2df   : > { %v3486_v33 = vrot.slane %v15968_v59, 2 }
 0x2e0   : > { %11055 = vmatmul.mubr.msk.bf16.gmra.mrb[64].mxu1 %vm895_vm1, %v3389_v2  ;;  %v3447_v2 = vrot.slane %v15955_v3, 1 }
 0x2e1   : > { %11058 = vmatprep.mubr.msk.bf16.mxu1 %vm895_vm1, %v3398_v30  ;;  %v15957_v30 = vld [vmem:[#allocation47_spill] sm:$0xff]  ;;  %v3487_v43 = vor.u32 %v3486_v33, %v3483_v52  ;;  %v9991_v52 = vcombine.low %v12637_v45, %v12638_v34  ;;  %v12639_v33 = vld [vmem:[%s12759_s25 + $0xf4] sm:$0xf]  ;;  %v12660_v34 = vld [vmem:[%s12759_s25 + $0x120] sm:$0xff]  }
 0x2e2   : > { %11501 = vmatmul.mubr.msk.bf16.gmra.mrb[20].mxu0 %vm895_vm1, %v9975_v48  ;;  %v3451_v20 = vor.u32 %v3450_v0, %v3447_v2  ;;  %v3443_v48 = vsel %vm3075_vm8, %v3433_v14, %v3442_v28  ;;  %v15958_v5 = vshrl.u32 %v15957_v30, 16  ;;  %v15959_v12 = vshll.u32 %v15957_v30, 16  ;;  %v15969_v0 = vld [vmem:[#allocation51_spill] sm:$0xff] }
 0x2e3   : > { %11504 = vmatprep.mubr.msk.bf16.mxu0 %vm895_vm1, %v9976_v25  ;;  %v15970_v54 = vshrl.u32 %v15969_v0, 16 }
 0x2e4   : > { %v3456_v1 = vrot.slane %v15958_v5, 1  ;;  %v3459_v8 = vrot.slane %v15959_v12, 2  ;;  %v3452_v25 = vsel %vm3075_vm8, %v3442_v28, %v3451_v20 }
 0x2e5   : > { %v3492_v6 = vrot.slane %v15970_v54, 1 }
 0x2e6   : > { %v3460_v63 = vor.u32 %v3459_v8, %v3456_v1  ;;  %v12624_v8 = vld [vmem:[%s12759_s25 + $0xc4] sm:$0xf] }
 0x2e7   : > { %v9986_v41 = vcombine.low %v12624_v8, %v12625_v9 }
 0x2e8   : > { %11059 = vmatmul.mubr.msk.bf16.gmra.mrb[68].mxu1 %vm895_vm1, %v3407_v42  ;;  %v3465_v42 = vrot.slane %v15961_v36, 1  ;;  %v3461_v51 = vsel %vm3075_vm8, %v3451_v20, %v3460_v63  ;;  %v12622_v20 = vld [vmem:[%s12759_s25 + $0xbc] sm:$0xf]  ;;  %v12626_v36 = vld [vmem:[%s12759_s25 + $0xcc] sm:$0xf] }
 0x2e9   : > { %11062 = vmatprep.mubr.msk.bf16.mxu1 %vm895_vm1, %v3416_v26  ;;  %v12617_v26 = vld [vmem:[%s12759_s25 + $0x180] sm:$0xf] }
 0x2ea   : > { %11505 = vmatmul.mubr.msk.bf16.gmra.mrb[24].mxu0 %vm895_vm1, %v9977_v15  ;;  %v3469_v15 = vor.u32 %v3468_v38, %v3465_v42  ;;  %v14829_v58 = vcombine.low %v12617_v26, %v2832_v18  ;;  %v12627_v42 = vld [vmem:[%s12759_s25 + $0xd0] sm:$0xf]  ;;  %v12632_v26 = vld [vmem:[%s12759_s25 + $0xe0] sm:$0xf] }
 0x2eb   : > { %11508 = vmatprep.mubr.msk.bf16.mxu0 %vm895_vm1, %v9978_v50  ;;  %v12618_v50 = vld [vmem:[%s12759_s25 + $0xac] sm:$0xf]  ;;  %v9987_v7 = vcombine.low %v12626_v36, %v12627_v42  ;;  %v12650_v42 = vld [vmem:[%s12759_s25 + $0x110] sm:$0xf] }
 0x2ec   : > { %v9983_v14 = vcombine.low %v12618_v50, %v12619_v57  ;;  %v3499_v3 = vshrl.u32 %v14829_v58, 16  ;;  %v3502_v2 = vshll.u32 %v14829_v58, 16  ;;  %v12635_v50 = vld [vmem:[%s12759_s25 + $0xd8] sm:$0xff]   ;;  %v12649_v36 = vld [vmem:[%s12759_s25 + $0x10c] sm:$0xf] }
 0x2ed   : > { %v4223_v57 = vrot.slane %v12635_v50, 2 }
 0x2ee   : > { %v3501_v1 = vrot.slane %v3499_v3, 1  ;;  %v3504_v12 = vrot.slane %v3502_v2, 2 }
 0x2f0   : > { %11063 = vmatmul.mubr.msk.bf16.gmra.mrb[72].mxu1 %vm895_vm1, %v3425_v53  ;;  %v3470_v53 = vsel %vm3075_vm8, %v3460_v63, %v3469_v15  ;;  %v12630_v63 = vld [vmem:[%s12759_s25 + $0xd0] sm:$0xff]  }
 0x2f1   : > { %11066 = vmatprep.mubr.msk.bf16.mxu1 %vm895_vm1, %v3434_v39  ;;  %v3478_v39 = vor.u32 %v3477_v11, %v3474_v60  ;;  %v4221_v18 = vrot.slane %v12630_v63, 2  ;;  %v12633_v60 = vld [vmem:[%s12759_s25 + $0xe4] sm:$0xf] }
 0x2f2   : > { %11509 = vmatmul.mubr.msk.bf16.gmra.mrb[28].mxu0 %vm895_vm1, %v9979_v24  ;;  %v9984_v24 = vcombine.low %v12620_v46, %v12621_v16  ;;  %v9990_v11 = vcombine.low %v12633_v60, %v12634_v10  ;;  %v12640_v46 = vld [vmem:[%s12759_s25 + $0xf8] sm:$0xf]  ;;  %v12655_v60 = vld [vmem:[%s12759_s25 + $0x11c] sm:$0xf]  ;;  %v12656_v10 = vld [vmem:[%s12759_s25 + $0x120] sm:$0xf] }
 0x2f3   : > { %11512 = vmatprep.mubr.msk.bf16.mxu0 %vm895_vm1, %v9980_v31  ;;  %v3479_v62 = vsel %vm3075_vm8, %v3469_v15, %v3478_v39  ;;  %v15971_v31 = vshll.u32 %v15969_v0, 16  ;;  %v3488_v5 = vsel %vm3075_vm8, %v3478_v39, %v3487_v43  ;;  %v12631_v15 = vld [vmem:[%s12759_s25 + $0xdc] sm:$0xf]  ;;  %v4222_v44 = vsel %vm4171_vm2, %v15972_v21, %v4221_v18  ;;  %v12644_v0 = vld [vmem:[%s12759_s25 + $0x100] sm:$0xf] }
 0x2f4   : > { %v4224_v4 = vsel %vm4171_vm2, %v4221_v18, %v4223_v57  ;;  %v9992_v16 = vcombine.low %v12639_v33, %v12640_v46  ;;  %v12654_v18 = vld [vmem:[%s12759_s25 + $0x110] sm:$0xff]  }
 0x2f5   : > { %v3495_v28 = vrot.slane %v15971_v31, 2  ;;  %v12645_v31 = vld [vmem:[%s12759_s25 + $0x104] sm:$0xf] }
 0x2f8   : > { %11067 = vmatmul.mubr.msk.bf16.gmra.mrb[76].mxu1 %vm895_vm1, %v3443_v48  ;;  %v12623_v48 = vld [vmem:[%s12759_s25 + $0xc0] sm:$0xf] }
 0x2f9   : > { %11070 = vmatprep.mubr.msk.bf16.mxu1 %vm895_vm1, %v3452_v25  ;;  %v9985_v30 = vcombine.low %v12622_v20, %v12623_v48  ;;  %v3505_v25 = vor.u32 %v3504_v12, %v3501_v1  ;;  %v12647_v48 = vld [vmem:[%s12759_s25 + $0xf8] sm:$0xff]  }
 0x2fa   : > { %11513 = vmatmul.mubr.msk.bf16.gmra.mrb[32].mxu0 %vm895_vm1, %v9981_v27  ;;  %v3496_v27 = vor.u32 %v3495_v28, %v3492_v6  ;;  %v12646_v28 = vld [vmem:[%s12759_s25 + $0x108] sm:$0xf] }
 0x2fb   : > { %11516 = vmatprep.mubr.msk.bf16.mxu0 %vm895_vm1, %v9982_v23  ;;  %v9988_v23 = vcombine.low %v12628_v13, %v12629_v49  ;;  %v9994_v20 = vcombine.low %v12645_v31, %v12646_v28  ;;  %v12652_v49 = vld [vmem:[%s12759_s25 + $0x118] sm:$0xf]  ;;  %v12666_v28 = vld [vmem:[%s12759_s25 + $0x130] sm:$0xff]  }
 0x2fc   : > { %v3497_v47 = vsel %vm3075_vm8, %v3487_v43, %v3496_v27  ;;  %v3506_v38 = vsel %vm3075_vm8, %v3496_v27, %v3505_v25  ;;  %v12642_v43 = vld [vmem:[%s12759_s25 + $0xf0] sm:$0xff]  }
 0x2fd   : > { %v4229_v3 = vrot.slane %v12642_v43, 2  ;;  %v12662_v43 = vld [vmem:[%s12759_s25 + $0x130] sm:$0xf] }
 0x300   : > { %11071 = vmatmul.mubr.msk.bf16.gmra.mrb[80].mxu1 %vm895_vm1, %v3461_v51  ;;  %v9989_v51 = vcombine.low %v12631_v15, %v12632_v26  ;;  %v4237_v15 = vrot.slane %v12654_v18, 2 }
 0x301   : > { %11074 = vmatprep.mubr.msk.bf16.mxu1 %vm895_vm1, %v3470_v53 }
 0x302   : > { %11517 = vmatmul.mubr.msk.bf16.gmra.mrb[36].mxu0 %vm895_vm1, %v9983_v14  ;;  %v12636_v14 = vld [vmem:[%s12759_s25 + $0xe0] sm:$0xff]  }
 0x303   : > { %11520 = vmatprep.mubr.msk.bf16.mxu0 %vm895_vm1, %v9984_v24  ;;  %v4225_v53 = vrot.slane %v12636_v14, 2  ;;  %v12641_v24 = vld [vmem:[%s12759_s25 + $0xe8] sm:$0xff]  }
 0x304   : > { %v4227_v39 = vrot.slane %v12641_v24, 2  ;;  %v12658_v14 = vld [vmem:[%s12759_s25 + $0x128] sm:$0xf] }
 0x305   : > { %v4226_v59 = vsel %vm4171_vm2, %v4223_v57, %v4225_v53  ;;  %v12657_v57 = vld [vmem:[%s12759_s25 + $0x124] sm:$0xf] }
 0x306   : > { %v4228_v2 = vsel %vm4171_vm2, %v4225_v53, %v4227_v39  ;;  %v4230_v6 = vsel %vm4171_vm2, %v4227_v39, %v4229_v3  ;;  %v9998_v53 = vcombine.low %v12657_v57, %v12658_v14  ;;  %v12661_v39 = vld [vmem:[%s12759_s25 + $0x12c] sm:$0xf]  ;;  %v12675_v57 = vld [vmem:[%s12759_s25 + $0x154] sm:$0xf]  ;;  %v12676_v14 = vld [vmem:[%s12759_s25 + $0x158] sm:$0xf] }
 0x308   : > { %11075 = vmatmul.mubr.msk.bf16.gmra.mrb[84].mxu1 %vm895_vm1, %v3479_v62  ;;  %v12643_v62 = vld [vmem:[%s12759_s25 + $0xfc] sm:$0xf] }
 0x309   : > { %11078 = vmatprep.mubr.msk.bf16.mxu1 %vm895_vm1, %v3488_v5  ;;  %v9993_v54 = vcombine.low %v12643_v62, %v12644_v0  ;;  %v12648_v5 = vld [vmem:[%s12759_s25 + $0x100] sm:$0xff]   ;;  %v12663_v62 = vld [vmem:[%s12759_s25 + $0x134] sm:$0xf]  ;;  %v12664_v0 = vld [vmem:[%s12759_s25 + $0x138] sm:$0xf] }
 0x30a   : > { %11521 = vmatmul.mubr.msk.bf16.gmra.mrb[40].mxu0 %vm895_vm1, %v9985_v30  ;;  %v4231_v30 = vrot.slane %v12647_v48, 2  ;;  %v4233_v1 = vrot.slane %v12648_v5, 2 }
 0x30b   : > { %11524 = vmatprep.mubr.msk.bf16.mxu0 %vm895_vm1, %v9986_v41 }
 0x310   : > { %11079 = vmatmul.mubr.msk.bf16.gmra.mrb[88].mxu1 %vm895_vm1, %v3497_v47 }
 0x311   : > { %11082 = vmatprep.mubr.msk.bf16.mxu1 %vm895_vm1, %v3506_v38  ;;  %v4234_v38 = vsel %vm4171_vm2, %v4231_v30, %v4233_v1 }
 0x312   : > { %11525 = vmatmul.mubr.msk.bf16.gmra.mrb[44].mxu0 %vm895_vm1, %v9987_v7  ;;  %v9995_v7 = vcombine.low %v12649_v36, %v12650_v42  ;;  %v12669_v36 = vld [vmem:[%s12759_s25 + $0x144] sm:$0xf]  ;;  %v12670_v42 = vld [vmem:[%s12759_s25 + $0x148] sm:$0xf] }
 0x313   : > { %11528 = vmatprep.mubr.msk.bf16.mxu0 %vm895_vm1, %v9988_v23 }
 0x318   : > { %11083 = vmatmul.mubr.msk.bf16.gmra.mrb[104].mxu1 %vm895_vm1, %v3505_v25  ;;  %v4232_v25 = vsel %vm4171_vm2, %v4229_v3, %v4231_v30  ;;  %v9999_v3 = vcombine.low %v12661_v39, %v12662_v43 }
 0x319   : > { %11136 = vmatprep.mubr.msk.bf16.mxu1 %vm895_vm1, %v4222_v44 }
 0x31a   : > { %11529 = vmatmul.mubr.msk.bf16.gmra.mrb[48].mxu0 %vm895_vm1, %v9989_v51 }
 0x31b   : > { %11532 = vmatprep.mubr.msk.bf16.mxu0 %vm895_vm1, %v9990_v11  ;;  %v9997_v11 = vcombine.low %v12655_v60, %v12656_v10  ;;  %v12673_v60 = vld [vmem:[%s12759_s25 + $0x14c] sm:$0xf]  ;;  %v12674_v10 = vld [vmem:[%s12759_s25 + $0x150] sm:$0xf] }
 0x320   : > { %11137 = vmatmul.mubr.msk.bf16.vlgmr.msra.gmra.mrb[48].mxu1 %vm895_vm1, %v4224_v4  ;;  %v12659_v4 = vld [vmem:[%s12759_s25 + $0x118] sm:$0xff]  }
 0x321   : > { %11140 = vmatprep.mubr.msk.bf16.mxu1 %vm895_vm1, %v4226_v59  ;;  %v4239_v45 = vrot.slane %v12659_v4, 2  ;;  %v12677_v4 = vld [vmem:[%s12759_s25 + $0x148] sm:$0xff]  }
 0x322   : > { %11533 = vmatmul.mubr.msk.bf16.gmra.mrb[52].mxu0 %vm895_vm1, %v9991_v52  ;;  %v4241_v52 = vrot.slane %v12660_v34, 2  ;;  %v12678_v34 = vld [vmem:[%s12759_s25 + $0x150] sm:$0xff]  }
 0x323   : > { %11536 = vmatprep.mubr.msk.bf16.mxu0 %vm895_vm1, %v9992_v16  ;;  %v4240_v16 = vsel %vm4171_vm2, %v4237_v15, %v4239_v45 }
 0x328   : > { %11141 = vmatmul.mubr.msk.bf16.gmra.mrb[52].mxu1 %vm895_vm1, %v4228_v2  ;;  %v4242_v2 = vsel %vm4171_vm2, %v4239_v45, %v4241_v52  ;;  %v4251_v45 = vrot.slane %v12677_v4, 2 }
 0x329   : > { %11144 = vmatprep.mubr.msk.bf16.mxu1 %vm895_vm1, %v4230_v6  ;;  %v12665_v6 = vld [vmem:[%s12759_s25 + $0x128] sm:$0xff]  }
 0x32a   : > { %11537 = vmatmul.mubr.msk.bf16.gmra.mrb[56].mxu0 %vm895_vm1, %v9993_v54  ;;  %v10000_v54 = vcombine.low %v12663_v62, %v12664_v0  ;;  %v4243_v31 = vrot.slane %v12665_v6, 2  ;;  %v12679_v62 = vld [vmem:[%s12759_s25 + $0x15c] sm:$0xf]  ;;  %v12680_v0 = vld [vmem:[%s12759_s25 + $0x160] sm:$0xf] }
 0x32b   : > { %v10986_v12 = vpop.f32.mrb[100].mxu1  ;;  %11540 = vmatprep.mubr.msk.bf16.mxu0 %vm895_vm1, %v9994_v20  ;;  %v4245_v20 = vrot.slane %v12666_v28, 2  ;;  %v12682_v28 = vld [vmem:[%s12759_s25 + $0x168] sm:$0xf] }
 0x32c   : > { %v14914_v8 = vadd.f32 %v10986_v12, %v14474_v22  ;;  %v2628_v9 = vpop.f32.mrb[101].mxu1  ;;  %v12651_v22 = vld [vmem:[%s12759_s25 + $0x114] sm:$0xf] }
 0x32d   : > { %v14917_v41 = vadd.f32 %v2628_v9, %v14479_v37  ;;  %v10987_v27 = vpop.f32.mrb[102].mxu1  ;;  %v9996_v23 = vcombine.low %v12651_v22, %v12652_v49  ;;  %v12653_v37 = vld [vmem:[%s12759_s25 + $0x108] sm:$0xff]   ;;  %v12667_v9 = vld [vmem:[%s12759_s25 + $0x13c] sm:$0xf]  ;;  %v12672_v49 = vld [vmem:[%s12759_s25 + $0x140] sm:$0xff]  }
 0x32e   : > { %v2631_v47 = vpop.f32.mrb[103].mxu1  ;;  %v4235_v63 = vrot.slane %v12653_v37, 2  ;;  %v12668_v27 = vld [vmem:[%s12759_s25 + $0x140] sm:$0xf] }
 0x32f   : > { %v14924_v13 = vadd.f32 %v2631_v47, %v14492_v56  ;;  %v4246_v47 = vsel %vm4171_vm2, %v4243_v31, %v4245_v20 }
 0x330   : > { %11145 = vmatmul.mubr.msk.bf16.gmra.mrb[56].mxu1 %vm895_vm1, %v4232_v25  ;;  %v4236_v21 = vsel %vm4171_vm2, %v4233_v1, %v4235_v63  ;;  %v4238_v50 = vsel %vm4171_vm2, %v4235_v63, %v4237_v15  ;;  %v4244_v1 = vsel %vm4171_vm2, %v4241_v52, %v4243_v31  ;;  %v10001_v25 = vcombine.low %v12667_v9, %v12668_v27  ;;  %v12681_v31 = vld [vmem:[%s12759_s25 + $0x164] sm:$0xf] }
 0x331   : > { %11148 = vmatprep.mubr.msk.bf16.mxu1 %vm895_vm1, %v4234_v38  ;;  %v12671_v38 = vld [vmem:[%s12759_s25 + $0x138] sm:$0xff]   ;;  %v4253_v52 = vrot.slane %v12678_v34, 2  ;;  %v12684_v27 = vld [vmem:[%s12759_s25 + $0x160] sm:$0xff]  }
 0x332   : > { %11541 = vmatmul.mubr.msk.bf16.gmra.mrb[60].mxu0 %vm895_vm1, %v9995_v7  ;;  %v10002_v7 = vcombine.low %v12669_v36, %v12670_v42  ;;  %v4247_v22 = vrot.slane %v12671_v38, 2 }
 0x333   : > { %v14933_v56 = vpop.f32.mrb[0].mxu1  ;;  %11544 = vmatprep.mubr.msk.bf16.mxu0 %vm895_vm1, %v9996_v23  ;;  %v4249_v23 = vrot.slane %v12672_v49, 2  ;;  %v4254_v6 = vsel %vm4171_vm2, %v4251_v45, %v4253_v52  ;;  %v12686_v49 = vld [vmem:[%s12759_s25 + $0x170] sm:$0xf] }
 0x334   : > { %v14936_v26 = vpop.f32.mrb[1].mxu1  ;;  %v4248_v15 = vsel %vm4171_vm2, %v4245_v20, %v4247_v22  ;;  %v10006_v20 = vcombine.low %v12681_v31, %v12682_v28  ;;  %v12693_v31 = vld [vmem:[%s12759_s25 + $0x184] sm:$0xf] }
 0x335   : > { %v14938_v51 = vpop.f32.mrb[2].mxu1  ;;  %v10010_v28 = vcombine.low %v12693_v31, %v14601_v55 }
 0x336   : > { %v14941_v44 = vpop.f32.mrb[3].mxu1 }
 0x338   : > { %11149 = vmatmul.mubr.msk.bf16.gmra.mrb[60].mxu1 %vm895_vm1, %v4236_v21 }
 0x339   : > { %11152 = vmatprep.mubr.msk.bf16.mxu1 %vm895_vm1, %v4238_v50  ;;  %v4250_v50 = vsel %vm4171_vm2, %v4247_v22, %v4249_v23  ;;  %v12685_v22 = vld [vmem:[%s12759_s25 + $0x16c] sm:$0xf] }
 0x33a   : > { %11545 = vmatmul.mubr.msk.bf16.gmra.mrb[64].mxu0 %vm895_vm1, %v9997_v11  ;;  %v10003_v11 = vcombine.low %v12673_v60, %v12674_v10  ;;  %v12687_v60 = vld [vmem:[%s12759_s25 + $0x174] sm:$0xf]  ;;  %v12688_v10 = vld [vmem:[%s12759_s25 + $0x178] sm:$0xf] }
 0x33b   : > { %v14953_v59 = vpop.f32.mrb[4].mxu1  ;;  %11548 = vmatprep.mubr.msk.bf16.mxu0 %vm895_vm1, %v9998_v53  ;;  %v10004_v53 = vcombine.low %v12675_v57, %v12676_v14  ;;  %v12690_v14 = vld [vmem:[%s12759_s25 + $0x170] sm:$0xff]  }
 0x33c   : > { %v14956_v33 = vpop.f32.mrb[5].mxu1 }
 0x33d   : > { %v14958_v46 = vpop.f32.mrb[6].mxu1 }
 0x33e   : > { %v14961_v24 = vpop.f32.mrb[7].mxu1 }
 0x340   : > { %11153 = vmatmul.mubr.msk.bf16.gmra.mrb[64].mxu1 %vm895_vm1, %v4240_v16 }
 0x341   : > { %11156 = vmatprep.mubr.msk.bf16.mxu1 %vm895_vm1, %v4242_v2 }
 0x342   : > { %11549 = vmatmul.mubr.msk.bf16.gmra.mrb[68].mxu0 %vm895_vm1, %v9999_v3  ;;  %v4252_v3 = vsel %vm4171_vm2, %v4249_v23, %v4251_v45  ;;  %v10007_v23 = vcombine.low %v12685_v22, %v12686_v49 }
 0x343   : > { %v14973_v48 = vpop.f32.mrb[8].mxu1  ;;  %11552 = vmatprep.mubr.msk.bf16.mxu0 %vm895_vm1, %v10000_v54  ;;  %v10005_v54 = vcombine.low %v12679_v62, %v12680_v0  ;;  %v12691_v62 = vld [vmem:[%s12759_s25 + $0x17c] sm:$0xf]  ;;  %v12692_v0 = vld [vmem:[%s12759_s25 + $0x180] sm:$0xf] }
 0x344   : > { %v14976_v30 = vpop.f32.mrb[9].mxu1 }
 0x345   : > { %v14978_v5 = vpop.f32.mrb[10].mxu1 }
 0x346   : > { %v14981_v12 = vpop.f32.mrb[11].mxu1 }
 0x348   : > { %11157 = vmatmul.mubr.msk.bf16.gmra.mrb[68].mxu1 %vm895_vm1, %v4244_v1  ;;  %v12683_v1 = vld [vmem:[%s12759_s25 + $0x158] sm:$0xff]  }
 0x349   : > { %11160 = vmatprep.mubr.msk.bf16.mxu1 %vm895_vm1, %v4246_v47  ;;  %v4255_v9 = vrot.slane %v12683_v1, 2 }
 0x34a   : > { %11553 = vmatmul.mubr.msk.bf16.gmra.mrb[72].mxu0 %vm895_vm1, %v10001_v25  ;;  %v4257_v25 = vrot.slane %v12684_v27, 2 }
 0x34b   : > { %v14993_v37 = vpop.f32.mrb[12].mxu1  ;;  %11556 = vmatprep.mubr.msk.bf16.mxu0 %vm895_vm1, %v10002_v7  ;;  %v4256_v7 = vsel %vm4171_vm2, %v4253_v52, %v4255_v9 }
 0x34c   : > { %v14996_v63 = vpop.f32.mrb[13].mxu1 }
 0x34d   : > { %v14998_v18 = vpop.f32.mrb[14].mxu1 }
 0x34e   : > { %v15001_v21 = vpop.f32.mrb[15].mxu1 }
 0x350   : > { %11161 = vmatmul.mubr.msk.bf16.gmra.mrb[72].mxu1 %vm895_vm1, %v4248_v15  ;;  %v4258_v15 = vsel %vm4171_vm2, %v4255_v9, %v4257_v25  ;;  %v4265_v9 = vrot.slane %v14829_v58, 2 }
 0x351   : > { %11164 = vmatprep.mubr.msk.bf16.mxu1 %vm895_vm1, %v4250_v50  ;;  %v12689_v50 = vld [vmem:[%s12759_s25 + $0x168] sm:$0xff]  }
 0x352   : > { %11557 = vmatmul.mubr.msk.bf16.gmra.mrb[76].mxu0 %vm895_vm1, %v10003_v11  ;;  %v10008_v11 = vcombine.low %v12687_v60, %v12688_v10  ;;  %v4259_v57 = vrot.slane %v12689_v50, 2 }
 0x353   : > { %v15013_v16 = vpop.f32.mrb[16].mxu1  ;;  %11560 = vmatprep.mubr.msk.bf16.mxu0 %vm895_vm1, %v10004_v53  ;;  %v4261_v53 = vrot.slane %v12690_v14, 2 }
 0x354   : > { %v15016_v39 = vpop.f32.mrb[17].mxu1  ;;  %v4260_v52 = vsel %vm4171_vm2, %v4257_v25, %v4259_v57 }
 0x355   : > { %v15018_v43 = vpop.f32.mrb[18].mxu1 }
 0x356   : > { %v15021_v2 = vpop.f32.mrb[19].mxu1 }
 0x358   : > { %11165 = vmatmul.mubr.msk.bf16.gmra.mrb[76].mxu1 %vm895_vm1, %v4252_v3 }
 0x359   : > { %11168 = vmatprep.mubr.msk.bf16.mxu1 %vm895_vm1, %v4254_v6  ;;  %v4262_v6 = vsel %vm4171_vm2, %v4259_v57, %v4261_v53 }
 0x35a   : > { %11561 = vmatmul.mubr.msk.bf16.gmra.mrb[80].mxu0 %vm895_vm1, %v10005_v54  ;;  %v10009_v54 = vcombine.low %v12691_v62, %v12692_v0 }
 0x35b   : > { %v15033_v47 = vpop.f32.mrb[20].mxu1  ;;  %11564 = vmatprep.mubr.msk.bf16.mxu0 %vm895_vm1, %v10006_v20  ;;  %v12694_v20 = vld [vmem:[%s12759_s25 + $0x178] sm:$0xff]  }
 0x35c   : > { %v15036_v36 = vpop.f32.mrb[21].mxu1  ;;  %v4263_v1 = vrot.slane %v12694_v20, 2 }
 0x35d   : > { %v15038_v42 = vpop.f32.mrb[22].mxu1 }
 0x35e   : > { %v15041_v38 = vpop.f32.mrb[23].mxu1  ;;  %v4264_v55 = vsel %vm4171_vm2, %v4261_v53, %v4263_v1  ;;  %v4266_v49 = vsel %vm4171_vm2, %v4263_v1, %v4265_v9 }
 0x360   : > { %11169 = vmatmul.mubr.msk.bf16.gmra.mrb[80].mxu1 %vm895_vm1, %v4256_v7 }
 0x361   : > { %11172 = vmatprep.mubr.msk.bf16.mxu1 %vm895_vm1, %v4258_v15 }
 0x362   : > { %11565 = vmatmul.mubr.msk.bf16.gmra.mrb[84].mxu0 %vm895_vm1, %v10007_v23  ;;  %v10011_v23 = vcombine.low %v14590_v19, %v14590_v19 }
 0x363   : > { %v15053_v4 = vpop.f32.mrb[24].mxu1  ;;  %11568 = vmatprep.mubr.msk.bf16.mxu0 %vm895_vm1, %v10008_v11 }
 0x364   : > { %v15056_v45 = vpop.f32.mrb[25].mxu1 }
 0x365   : > { %v15058_v34 = vpop.f32.mrb[26].mxu1 }
 0x366   : > { %v15061_v3 = vpop.f32.mrb[27].mxu1 }
 0x368   : > { %11173 = vmatmul.mubr.msk.bf16.gmra.mrb[84].mxu1 %vm895_vm1, %v4260_v52 }
 0x369   : > { %11176 = vmatprep.mubr.msk.bf16.mxu1 %vm895_vm1, %v4262_v6 }
 0x36a   : > { %11569 = vmatmul.mubr.msk.bf16.gmra.mrb[88].mxu0 %vm895_vm1, %v10009_v54 }
 0x36b   : > { %v15073_v27 = vpop.f32.mrb[28].mxu1  ;;  %11572 = vmatprep.mubr.msk.bf16.mxu0 %vm895_vm1, %v10010_v28 }
 0x36c   : > { %v15076_v25 = vpop.f32.mrb[29].mxu1 }
 0x36d   : > { %v15078_v7 = vpop.f32.mrb[30].mxu1 }
 0x36e   : > { %v15081_v22 = vpop.f32.mrb[31].mxu1 }
 0x370   : > { %11177 = vmatmul.mubr.msk.bf16.gmra.mrb[88].mxu1 %vm895_vm1, %v4264_v55  ;;  %v15129_v55 = vld [vmem:[%s15503_s2] ss:$0 sm:$0xff] }
 0x371   : > { %11180 = vmatprep.mubr.msk.bf16.mxu1 %vm895_vm1, %v4266_v49 }
 0x372   : > { %11573 = vmatmul.mubr.msk.bf16.gmra.mrb[104].mxu0 %vm895_vm1, %v10011_v23 }
 0x373   : > { %v15089_v58 = vpop.f32.mrb[32].mxu1 }
 0x374   : > { %v15091_v15 = vpop.f32.mrb[33].mxu1 }
 0x375   : > { %v15093_v60 = vpop.f32.mrb[34].mxu1 }
 0x376   : > { %v15095_v10 = vpop.f32.mrb[35].mxu1 }
 0x378   : > { %11181 = vmatmul.mubr.msk.bf16.gmra.mrb[108].mxu1 %vm895_vm1, %v4265_v9 }
 0x37b   : > { %v15098_v11 = vpop.f32.mrb[36].mxu1 }
 0x37c   : > { %v15100_v50 = vpop.f32.mrb[37].mxu1 }
 0x37d   : > { %v15102_v19 = vpop.f32.mrb[38].mxu1 }
 0x37e   : > { %v15104_v57 = vpop.f32.mrb[39].mxu1 }
 0x383   : > { %v15106_v14 = vpop.f32.mrb[40].mxu1 }
 0x384   : > { %v15108_v53 = vpop.f32.mrb[41].mxu1 }
 0x385   : > { %v15110_v52 = vpop.f32.mrb[42].mxu1  ;;  %v15112_v62 = vpop.f32.mrb[100].mxu0 }
 0x386   : > { %15973 = vst [vmem:[#allocation53_spill] sm:$0xff] %v15112_v62  ;;  %v15114_v0 = vpop.f32.mrb[43].mxu1  ;;  %v15116_v54 = vpop.f32.mrb[101].mxu0 }
 0x387   : > { %15974 = vst [vmem:[#allocation58_spill] sm:$0xff] %v15116_v54  ;;  %v11477_v6 = vpop.f32.mrb[102].mxu0 }
 0x388   : > { %v15118_v31 = vpop.f32.mrb[103].mxu0 }
 0x389   : > { %15975 = vst [vmem:[#allocation60_spill] sm:$0xff] %v15118_v31 }
 0x38b   : > { %v15120_v28 = vpop.f32.mrb[44].mxu1 }
 0x38c   : > { %v15122_v20 = vpop.f32.mrb[45].mxu1 }
 0x38d   : > { %v15124_v1 = vpop.f32.mrb[46].mxu1  ;;  %v11482_v9 = vpop.f32.mrb[0].mxu0 }
 0x38e   : > { %v15131_v49 = vpop.f32.mrb[47].mxu1  ;;  %v11578_v23 = vadd.f32 %v11482_v9, %v14933_v56  ;;  %v8210_v17 = vpop.f32.mrb[1].mxu0 }
 0x38f   : > { %v11579_v6 = vadd.f32 %v8210_v17, %v14936_v26  ;;  %v11483_v31 = vpop.f32.mrb[2].mxu0 }
 0x390   : > { %v8696_v54 = vadd.f32 %v11578_v23, %v15129_v55  ;;  %v11580_v62 = vadd.f32 %v11483_v31, %v14938_v51  ;;  %v8213_v32 = vpop.f32.mrb[3].mxu0 }
 0x391   : > { %v8694_v61 = vadd.f32 %v11579_v6, %v15129_v55  ;;  %v11581_v29 = vadd.f32 %v8213_v32, %v14941_v44 }
 0x392   : > { %v8791_v40 = vmax.f32 %v8696_v54, 0.0  ;;  %v8697_v35 = vadd.f32 %v11580_v62, %v15129_v55 }
 0x393   : > { %v8789_v17 = vmax.f32 %v8694_v61, 0.0  ;;  %v8695_v56 = vadd.f32 %v11581_v29, %v15129_v55 }
 0x394   : > { %v10160_v26 = vpack.c.bf16 %v8791_v40, %v8791_v40  ;;  %v8792_v51 = vmax.f32 %v8697_v35, 0.0 }
 0x395   : > { %v10158_v31 = vpack.c.bf16 %v8789_v17, %v8789_v17  ;;  %v8790_v32 = vmax.f32 %v8695_v56, 0.0  ;;  %v11486_v44 = vpop.f32.mrb[4].mxu0 }
 0x396   : > { %9268 = vst.msk [vmem:[%s15144_s18 + $0x8] sm:$0xf] %vm9265_vm9, %v10160_v26  ;;  %v10161_v62 = vpack.c.bf16 %v8792_v51, %v8792_v51  ;;  %v11582_v54 = vadd.f32 %v11486_v44, %v14953_v59  ;;  %v8226_v9 = vpop.f32.mrb[5].mxu0 }
 0x397   : > { %9266 = vst.msk [vmem:[%s15144_s18] sm:$0xf] %vm9265_vm9, %v10158_v31  ;;  %v10159_v23 = vpack.c.bf16 %v8790_v32, %v8790_v32  ;;  %v11583_v6 = vadd.f32 %v8226_v9, %v14956_v33  ;;  %v11487_v61 = vpop.f32.mrb[6].mxu0 }
 0x398   : > { %9269 = vst.msk [vmem:[%s15144_s18 + $0xc] sm:$0xf] %vm9265_vm9, %v10161_v62  ;;  %v8700_v35 = vadd.f32 %v11582_v54, %v15129_v55  ;;  %v11584_v40 = vadd.f32 %v11487_v61, %v14958_v46  ;;  %v8229_v29 = vpop.f32.mrb[7].mxu0 }
 0x399   : > { %9267 = vst.msk [vmem:[%s15144_s18 + $0x4] sm:$0xf] %vm9265_vm9, %v10159_v23  ;;  %v8698_v59 = vadd.f32 %v11583_v6, %v15129_v55  ;;  %v11585_v17 = vadd.f32 %v8229_v29, %v14961_v24 }
 0x39a   : > { %v8795_v56 = vmax.f32 %v8700_v35, 0.0  ;;  %v8701_v26 = vadd.f32 %v11584_v40, %v15129_v55 }
 0x39b   : > { %v8793_v33 = vmax.f32 %v8698_v59, 0.0  ;;  %v8699_v51 = vadd.f32 %v11585_v17, %v15129_v55 }
 0x39c   : > { %v10164_v31 = vpack.c.bf16 %v8795_v56, %v8795_v56  ;;  %v8796_v32 = vmax.f32 %v8701_v26, 0.0 }
 0x39d   : > { %v10162_v44 = vpack.c.bf16 %v8793_v33, %v8793_v33  ;;  %v8794_v46 = vmax.f32 %v8699_v51, 0.0  ;;  %v11490_v62 = vpop.f32.mrb[8].mxu0 }
 0x39e   : > { %9272 = vst.msk [vmem:[%s15144_s18 + $0x18] sm:$0xf] %vm9265_vm9, %v10164_v31  ;;  %v10165_v54 = vpack.c.bf16 %v8796_v32, %v8796_v32  ;;  %v11586_v9 = vadd.f32 %v11490_v62, %v14973_v48  ;;  %v8242_v23 = vpop.f32.mrb[9].mxu0 }
 0x39f   : > { %9270 = vst.msk [vmem:[%s15144_s18 + $0x10] sm:$0xf] %vm9265_vm9, %v10162_v44  ;;  %v10163_v24 = vpack.c.bf16 %v8794_v46, %v8794_v46  ;;  %v11587_v6 = vadd.f32 %v8242_v23, %v14976_v30  ;;  %v11491_v61 = vpop.f32.mrb[10].mxu0 }
 0x3a0   : > { %9273 = vst.msk [vmem:[%s15144_s18 + $0x1c] sm:$0xf] %vm9265_vm9, %v10165_v54  ;;  %v8704_v35 = vadd.f32 %v11586_v9, %v15129_v55  ;;  %v11588_v40 = vadd.f32 %v11491_v61, %v14978_v5  ;;  %v8245_v29 = vpop.f32.mrb[11].mxu0 }
 0x3a1   : > { %9271 = vst.msk [vmem:[%s15144_s18 + $0x14] sm:$0xf] %vm9265_vm9, %v10163_v24  ;;  %v8702_v48 = vadd.f32 %v11587_v6, %v15129_v55  ;;  %v11589_v59 = vadd.f32 %v8245_v29, %v14981_v12 }
 0x3a2   : > { %v8799_v17 = vmax.f32 %v8704_v35, 0.0  ;;  %v8705_v56 = vadd.f32 %v11588_v40, %v15129_v55 }
 0x3a3   : > { %v8797_v30 = vmax.f32 %v8702_v48, 0.0  ;;  %v8703_v26 = vadd.f32 %v11589_v59, %v15129_v55 }
 0x3a4   : > { %v10168_v33 = vpack.c.bf16 %v8799_v17, %v8799_v17  ;;  %v8800_v51 = vmax.f32 %v8705_v56, 0.0 }
 0x3a5   : > { %v10166_v31 = vpack.c.bf16 %v8797_v30, %v8797_v30  ;;  %v8798_v5 = vmax.f32 %v8703_v26, 0.0  ;;  %v11494_v32 = vpop.f32.mrb[12].mxu0 }
 0x3a6   : > { %9276 = vst.msk [vmem:[%s15144_s18 + $0x28] sm:$0xf] %vm9265_vm9, %v10168_v33  ;;  %v10169_v44 = vpack.c.bf16 %v8800_v51, %v8800_v51  ;;  %v11590_v46 = vadd.f32 %v11494_v32, %v14993_v37  ;;  %v8258_v62 = vpop.f32.mrb[13].mxu0 }
 0x3a7   : > { %9274 = vst.msk [vmem:[%s15144_s18 + $0x20] sm:$0xf] %vm9265_vm9, %v10166_v31  ;;  %v10167_v12 = vpack.c.bf16 %v8798_v5, %v8798_v5  ;;  %v11591_v54 = vadd.f32 %v8258_v62, %v14996_v63  ;;  %v11495_v9 = vpop.f32.mrb[14].mxu0 }
 0x3a8   : > { %9277 = vst.msk [vmem:[%s15144_s18 + $0x2c] sm:$0xf] %vm9265_vm9, %v10169_v44  ;;  %v8708_v23 = vadd.f32 %v11590_v46, %v15129_v55  ;;  %v11592_v24 = vadd.f32 %v11495_v9, %v14998_v18  ;;  %v8261_v6 = vpop.f32.mrb[15].mxu0 }
 0x3a9   : > { %9275 = vst.msk [vmem:[%s15144_s18 + $0x24] sm:$0xf] %vm9265_vm9, %v10167_v12  ;;  %v8706_v37 = vadd.f32 %v11591_v54, %v15129_v55  ;;  %v11593_v61 = vadd.f32 %v8261_v6, %v15001_v21 }
 0x3aa   : > { %v8803_v35 = vmax.f32 %v8708_v23, 0.0  ;;  %v8709_v40 = vadd.f32 %v11592_v24, %v15129_v55 }
 0x3ab   : > { %v8801_v63 = vmax.f32 %v8706_v37, 0.0  ;;  %v8707_v29 = vadd.f32 %v11593_v61, %v15129_v55 }
 0x3ac   : > { %v10172_v48 = vpack.c.bf16 %v8803_v35, %v8803_v35  ;;  %v8804_v59 = vmax.f32 %v8709_v40, 0.0 }
 0x3ad   : > { %v10170_v17 = vpack.c.bf16 %v8801_v63, %v8801_v63  ;;  %v8802_v18 = vmax.f32 %v8707_v29, 0.0  ;;  %v11498_v56 = vpop.f32.mrb[16].mxu0 }
 0x3ae   : > { %9280 = vst.msk [vmem:[%s15144_s18 + $0x38] sm:$0xf] %vm9265_vm9, %v10172_v48  ;;  %v10173_v30 = vpack.c.bf16 %v8804_v59, %v8804_v59  ;;  %v11594_v26 = vadd.f32 %v11498_v56, %v15013_v16  ;;  %v8274_v33 = vpop.f32.mrb[17].mxu0 }
 0x3af   : > { %9278 = vst.msk [vmem:[%s15144_s18 + $0x30] sm:$0xf] %vm9265_vm9, %v10170_v17  ;;  %v10171_v21 = vpack.c.bf16 %v8802_v18, %v8802_v18  ;;  %v11595_v51 = vadd.f32 %v8274_v33, %v15016_v39  ;;  %v11499_v31 = vpop.f32.mrb[18].mxu0 }
 0x3b0   : > { %9281 = vst.msk [vmem:[%s15144_s18 + $0x3c] sm:$0xf] %vm9265_vm9, %v10173_v30  ;;  %v8712_v5 = vadd.f32 %v11594_v26, %v15129_v55  ;;  %v11596_v32 = vadd.f32 %v11499_v31, %v15018_v43  ;;  %v8277_v44 = vpop.f32.mrb[19].mxu0 }
 0x3b1   : > { %9279 = vst.msk [vmem:[%s15144_s18 + $0x34] sm:$0xf] %vm9265_vm9, %v10171_v21  ;;  %v8710_v16 = vadd.f32 %v11595_v51, %v15129_v55  ;;  %v11597_v46 = vadd.f32 %v8277_v44, %v15021_v2 }
 0x3b2   : > { %v8807_v62 = vmax.f32 %v8712_v5, 0.0  ;;  %v8713_v12 = vadd.f32 %v11596_v32, %v15129_v55 }
 0x3b3   : > { %v8805_v39 = vmax.f32 %v8710_v16, 0.0  ;;  %v8711_v54 = vadd.f32 %v11597_v46, %v15129_v55 }
 0x3b4   : > { %v10176_v9 = vpack.c.bf16 %v8807_v62, %v8807_v62  ;;  %v8808_v23 = vmax.f32 %v8713_v12, 0.0 }
 0x3b5   : > { %v10174_v24 = vpack.c.bf16 %v8805_v39, %v8805_v39  ;;  %v8806_v43 = vmax.f32 %v8711_v54, 0.0  ;;  %v11502_v6 = vpop.f32.mrb[20].mxu0 }
 0x3b6   : > { %9284 = vst.msk [vmem:[%s15144_s18 + $0x48] sm:$0xf] %vm9265_vm9, %v10176_v9  ;;  %v10177_v37 = vpack.c.bf16 %v8808_v23, %v8808_v23  ;;  %v11598_v61 = vadd.f32 %v11502_v6, %v15033_v47  ;;  %v8290_v35 = vpop.f32.mrb[21].mxu0 }
 0x3b7   : > { %9282 = vst.msk [vmem:[%s15144_s18 + $0x40] sm:$0xf] %vm9265_vm9, %v10174_v24  ;;  %v10175_v2 = vpack.c.bf16 %v8806_v43, %v8806_v43  ;;  %v11599_v40 = vadd.f32 %v8290_v35, %v15036_v36  ;;  %v11503_v63 = vpop.f32.mrb[22].mxu0 }
 0x3b8   : > { %9285 = vst.msk [vmem:[%s15144_s18 + $0x4c] sm:$0xf] %vm9265_vm9, %v10177_v37  ;;  %v8716_v29 = vadd.f32 %v11598_v61, %v15129_v55  ;;  %v11600_v48 = vadd.f32 %v11503_v63, %v15038_v42  ;;  %v8293_v59 = vpop.f32.mrb[23].mxu0 }
 0x3b9   : > { %9283 = vst.msk [vmem:[%s15144_s18 + $0x44] sm:$0xf] %vm9265_vm9, %v10175_v2  ;;  %v8714_v47 = vadd.f32 %v11599_v40, %v15129_v55  ;;  %v11601_v17 = vadd.f32 %v8293_v59, %v15041_v38 }
 0x3ba   : > { %v8811_v18 = vmax.f32 %v8716_v29, 0.0  ;;  %v8717_v56 = vadd.f32 %v11600_v48, %v15129_v55 }
 0x3bb   : > { %v8809_v36 = vmax.f32 %v8714_v47, 0.0  ;;  %v8715_v30 = vadd.f32 %v11601_v17, %v15129_v55 }
 0x3bc   : > { %v10180_v26 = vpack.c.bf16 %v8811_v18, %v8811_v18  ;;  %v8812_v33 = vmax.f32 %v8717_v56, 0.0 }
 0x3bd   : > { %v10178_v21 = vpack.c.bf16 %v8809_v36, %v8809_v36  ;;  %v8810_v42 = vmax.f32 %v8715_v30, 0.0  ;;  %v11506_v51 = vpop.f32.mrb[24].mxu0 }
 0x3be   : > { %9288 = vst.msk [vmem:[%s15144_s18 + $0x58] sm:$0xf] %vm9265_vm9, %v10180_v26  ;;  %v10181_v31 = vpack.c.bf16 %v8812_v33, %v8812_v33  ;;  %v11602_v5 = vadd.f32 %v11506_v51, %v15053_v4  ;;  %v8306_v32 = vpop.f32.mrb[25].mxu0 }
 0x3bf   : > { %9286 = vst.msk [vmem:[%s15144_s18 + $0x50] sm:$0xf] %vm9265_vm9, %v10178_v21  ;;  %v10179_v38 = vpack.c.bf16 %v8810_v42, %v8810_v42  ;;  %v11603_v44 = vadd.f32 %v8306_v32, %v15056_v45  ;;  %v11507_v16 = vpop.f32.mrb[26].mxu0 }
 0x3c0   : > { %9289 = vst.msk [vmem:[%s15144_s18 + $0x5c] sm:$0xf] %vm9265_vm9, %v10181_v31  ;;  %v8720_v46 = vadd.f32 %v11602_v5, %v15129_v55  ;;  %v11604_v62 = vadd.f32 %v11507_v16, %v15058_v34  ;;  %v8309_v12 = vpop.f32.mrb[27].mxu0 }
 0x3c1   : > { %9287 = vst.msk [vmem:[%s15144_s18 + $0x54] sm:$0xf] %vm9265_vm9, %v10179_v38  ;;  %v8718_v4 = vadd.f32 %v11603_v44, %v15129_v55  ;;  %v11605_v39 = vadd.f32 %v8309_v12, %v15061_v3 }
 0x3c2   : > { %v8815_v54 = vmax.f32 %v8720_v46, 0.0  ;;  %v8721_v9 = vadd.f32 %v11604_v62, %v15129_v55 }
 0x3c3   : > { %v8813_v45 = vmax.f32 %v8718_v4, 0.0  ;;  %v8719_v23 = vadd.f32 %v11605_v39, %v15129_v55 }
 0x3c4   : > { %v10184_v24 = vpack.c.bf16 %v8815_v54, %v8815_v54  ;;  %v8816_v43 = vmax.f32 %v8721_v9, 0.0 }
 0x3c5   : > { %v10182_v6 = vpack.c.bf16 %v8813_v45, %v8813_v45  ;;  %v8814_v34 = vmax.f32 %v8719_v23, 0.0  ;;  %v11510_v37 = vpop.f32.mrb[28].mxu0 }
 0x3c6   : > { %9292 = vst.msk [vmem:[%s15144_s18 + $0x68] sm:$0xf] %vm9265_vm9, %v10184_v24  ;;  %v10185_v61 = vpack.c.bf16 %v8816_v43, %v8816_v43  ;;  %v11606_v35 = vadd.f32 %v11510_v37, %v15073_v27  ;;  %v8322_v2 = vpop.f32.mrb[29].mxu0 }
 0x3c7   : > { %9290 = vst.msk [vmem:[%s15144_s18 + $0x60] sm:$0xf] %vm9265_vm9, %v10182_v6  ;;  %v10183_v3 = vpack.c.bf16 %v8814_v34, %v8814_v34  ;;  %v11607_v40 = vadd.f32 %v8322_v2, %v15076_v25  ;;  %v11511_v63 = vpop.f32.mrb[30].mxu0 }
 0x3c8   : > { %9293 = vst.msk [vmem:[%s15144_s18 + $0x6c] sm:$0xf] %vm9265_vm9, %v10185_v61  ;;  %v8724_v29 = vadd.f32 %v11606_v35, %v15129_v55  ;;  %v11608_v48 = vadd.f32 %v11511_v63, %v15078_v7  ;;  %v8325_v59 = vpop.f32.mrb[31].mxu0 }
 0x3c9   : > { %9291 = vst.msk [vmem:[%s15144_s18 + $0x64] sm:$0xf] %vm9265_vm9, %v10183_v3  ;;  %v8722_v27 = vadd.f32 %v11607_v40, %v15129_v55  ;;  %v11609_v47 = vadd.f32 %v8325_v59, %v15081_v22 }
 0x3ca   : > { %v8819_v17 = vmax.f32 %v8724_v29, 0.0  ;;  %v8725_v18 = vadd.f32 %v11608_v48, %v15129_v55 }
 0x3cb   : > { %v8817_v25 = vmax.f32 %v8722_v27, 0.0  ;;  %v8723_v56 = vadd.f32 %v11609_v47, %v15129_v55 }
 0x3cc   : > { %v10188_v36 = vpack.c.bf16 %v8819_v17, %v8819_v17  ;;  %v8820_v30 = vmax.f32 %v8725_v18, 0.0 }
 0x3cd   : > { %v10186_v26 = vpack.c.bf16 %v8817_v25, %v8817_v25  ;;  %v8818_v7 = vmax.f32 %v8723_v56, 0.0  ;;  %v11514_v33 = vpop.f32.mrb[32].mxu0 }
 0x3ce   : > { %9296 = vst.msk [vmem:[%s15144_s18 + $0x78] sm:$0xf] %vm9265_vm9, %v10188_v36  ;;  %v10189_v21 = vpack.c.bf16 %v8820_v30, %v8820_v30  ;;  %v11610_v42 = vadd.f32 %v11514_v33, %v15089_v58  ;;  %v8338_v51 = vpop.f32.mrb[33].mxu0 }
 0x3cf   : > { %9294 = vst.msk [vmem:[%s15144_s18 + $0x70] sm:$0xf] %vm9265_vm9, %v10186_v26  ;;  %v10187_v22 = vpack.c.bf16 %v8818_v7, %v8818_v7  ;;  %v11611_v31 = vadd.f32 %v8338_v51, %v15091_v15  ;;  %v11515_v5 = vpop.f32.mrb[34].mxu0 }
 0x3d0   : > { %9297 = vst.msk [vmem:[%s15144_s18 + $0x7c] sm:$0xf] %vm9265_vm9, %v10189_v21  ;;  %v8728_v32 = vadd.f32 %v11610_v42, %v15129_v55  ;;  %v11612_v38 = vadd.f32 %v11515_v5, %v15093_v60  ;;  %v8341_v44 = vpop.f32.mrb[35].mxu0 }
 0x3d1   : > { %9295 = vst.msk [vmem:[%s15144_s18 + $0x74] sm:$0xf] %vm9265_vm9, %v10187_v22  ;;  %v8726_v58 = vadd.f32 %v11611_v31, %v15129_v55  ;;  %v11613_v16 = vadd.f32 %v8341_v44, %v15095_v10 }
 0x3d2   : > { %v8823_v46 = vmax.f32 %v8728_v32, 0.0  ;;  %v8729_v62 = vadd.f32 %v11612_v38, %v15129_v55 }
 0x3d3   : > { %v8821_v15 = vmax.f32 %v8726_v58, 0.0  ;;  %v8727_v12 = vadd.f32 %v11613_v16, %v15129_v55 }
 0x3d4   : > { %v10192_v4 = vpack.c.bf16 %v8823_v46, %v8823_v46  ;;  %v8824_v39 = vmax.f32 %v8729_v62, 0.0 }
 0x3d5   : > { %v10190_v54 = vpack.c.bf16 %v8821_v15, %v8821_v15  ;;  %v8822_v60 = vmax.f32 %v8727_v12, 0.0  ;;  %v11518_v9 = vpop.f32.mrb[36].mxu0 }
 0x3d6   : > { %9300 = vst.msk [vmem:[%s15144_s18 + $0x88] sm:$0xf] %vm9265_vm9, %v10192_v4  ;;  %v10193_v45 = vpack.c.bf16 %v8824_v39, %v8824_v39  ;;  %v11614_v23 = vadd.f32 %v11518_v9, %v15098_v11  ;;  %v8354_v24 = vpop.f32.mrb[37].mxu0 }
 0x3d7   : > { %9298 = vst.msk [vmem:[%s15144_s18 + $0x80] sm:$0xf] %vm9265_vm9, %v10190_v54  ;;  %v10191_v10 = vpack.c.bf16 %v8822_v60, %v8822_v60  ;;  %v11615_v43 = vadd.f32 %v8354_v24, %v15100_v50  ;;  %v11519_v6 = vpop.f32.mrb[38].mxu0 }
 0x3d8   : > { %9301 = vst.msk [vmem:[%s15144_s18 + $0x8c] sm:$0xf] %vm9265_vm9, %v10193_v45  ;;  %v8732_v34 = vadd.f32 %v11614_v23, %v15129_v55  ;;  %v11616_v37 = vadd.f32 %v11519_v6, %v15102_v19  ;;  %v8357_v61 = vpop.f32.mrb[39].mxu0 }
 0x3d9   : > { %9299 = vst.msk [vmem:[%s15144_s18 + $0x84] sm:$0xf] %vm9265_vm9, %v10191_v10  ;;  %v8730_v11 = vadd.f32 %v11615_v43, %v15129_v55  ;;  %v11617_v35 = vadd.f32 %v8357_v61, %v15104_v57 }
 0x3da   : > { %v8827_v2 = vmax.f32 %v8732_v34, 0.0  ;;  %v8733_v3 = vadd.f32 %v11616_v37, %v15129_v55 }
 0x3db   : > { %v8825_v50 = vmax.f32 %v8730_v11, 0.0  ;;  %v8731_v40 = vadd.f32 %v11617_v35, %v15129_v55 }
 0x3dc   : > { %v10196_v63 = vpack.c.bf16 %v8827_v2, %v8827_v2  ;;  %v8828_v29 = vmax.f32 %v8733_v3, 0.0 }
 0x3dd   : > { %v10194_v48 = vpack.c.bf16 %v8825_v50, %v8825_v50  ;;  %v8826_v19 = vmax.f32 %v8731_v40, 0.0  ;;  %v11522_v59 = vpop.f32.mrb[40].mxu0 }
 0x3de   : > { %9304 = vst.msk [vmem:[%s15144_s18 + $0x98] sm:$0xf] %vm9265_vm9, %v10196_v63  ;;  %v10197_v27 = vpack.c.bf16 %v8828_v29, %v8828_v29  ;;  %v11618_v47 = vadd.f32 %v11522_v59, %v15106_v14  ;;  %v8370_v17 = vpop.f32.mrb[41].mxu0 }
 0x3df   : > { %9302 = vst.msk [vmem:[%s15144_s18 + $0x90] sm:$0xf] %vm9265_vm9, %v10194_v48  ;;  %v10195_v57 = vpack.c.bf16 %v8826_v19, %v8826_v19  ;;  %v11619_v18 = vadd.f32 %v8370_v17, %v15108_v53  ;;  %v11523_v25 = vpop.f32.mrb[42].mxu0 }
 0x3e0   : > { %9305 = vst.msk [vmem:[%s15144_s18 + $0x9c] sm:$0xf] %vm9265_vm9, %v10197_v27  ;;  %v8736_v56 = vadd.f32 %v11618_v47, %v15129_v55  ;;  %v11620_v36 = vadd.f32 %v11523_v25, %v15110_v52  ;;  %v8373_v30 = vpop.f32.mrb[43].mxu0 }
 0x3e1   : > { %9303 = vst.msk [vmem:[%s15144_s18 + $0x94] sm:$0xf] %vm9265_vm9, %v10195_v57  ;;  %v8734_v14 = vadd.f32 %v11619_v18, %v15129_v55  ;;  %v11621_v26 = vadd.f32 %v8373_v30, %v15114_v0 }
 0x3e2   : > { %v8831_v7 = vmax.f32 %v8736_v56, 0.0  ;;  %v8737_v33 = vadd.f32 %v11620_v36, %v15129_v55 }
 0x3e3   : > { %v8829_v53 = vmax.f32 %v8734_v14, 0.0  ;;  %v8735_v21 = vadd.f32 %v11621_v26, %v15129_v55 }
 0x3e4   : > { %v10200_v42 = vpack.c.bf16 %v8831_v7, %v8831_v7  ;;  %v8832_v51 = vmax.f32 %v8737_v33, 0.0 }
 0x3e5   : > { %v10198_v22 = vpack.c.bf16 %v8829_v53, %v8829_v53  ;;  %v8830_v52 = vmax.f32 %v8735_v21, 0.0  ;;  %v11526_v31 = vpop.f32.mrb[44].mxu0 }
 0x3e6   : > { %9308 = vst.msk [vmem:[%s15144_s18 + $0xa8] sm:$0xf] %vm9265_vm9, %v10200_v42  ;;  %v10201_v5 = vpack.c.bf16 %v8832_v51, %v8832_v51  ;;  %v11622_v32 = vadd.f32 %v11526_v31, %v15120_v28  ;;  %v8386_v38 = vpop.f32.mrb[45].mxu0 }
 0x3e7   : > { %9306 = vst.msk [vmem:[%s15144_s18 + $0xa0] sm:$0xf] %vm9265_vm9, %v10198_v22  ;;  %v10199_v0 = vpack.c.bf16 %v8830_v52, %v8830_v52  ;;  %v11623_v44 = vadd.f32 %v8386_v38, %v15122_v20  ;;  %v11527_v58 = vpop.f32.mrb[46].mxu0 }
 0x3e8   : > { %9309 = vst.msk [vmem:[%s15144_s18 + $0xac] sm:$0xf] %vm9265_vm9, %v10201_v5  ;;  %v8740_v16 = vadd.f32 %v11622_v32, %v15129_v55  ;;  %v11624_v46 = vadd.f32 %v11527_v58, %v15124_v1  ;;  %v8389_v62 = vpop.f32.mrb[47].mxu0 }
 0x3e9   : > { %9307 = vst.msk [vmem:[%s15144_s18 + $0xa4] sm:$0xf] %vm9265_vm9, %v10199_v0  ;;  %v8738_v15 = vadd.f32 %v11623_v44, %v15129_v55  ;;  %v11625_v28 = vadd.f32 %v8389_v62, %v15131_v49 }
 0x3ea   : > { %v8835_v12 = vmax.f32 %v8740_v16, 0.0  ;;  %v8741_v4 = vadd.f32 %v11624_v46, %v15129_v55 }
 0x3eb   : > { %v8833_v39 = vmax.f32 %v8738_v15, 0.0  ;;  %v8739_v20 = vadd.f32 %v11625_v28, %v15129_v55  ;;  %v11084_v54 = vpop.f32.mrb[104].mxu1 }
 0x3ec   : > { %v10204_v60 = vpack.c.bf16 %v8835_v12, %v8835_v12  ;;  %v8836_v9 = vmax.f32 %v8741_v4, 0.0  ;;  %v15324_v1 = vadd.f32 %v11084_v54, %v14914_v8  ;;  %v4056_v45 = vpop.f32.mrb[105].mxu1 }
 0x3ed   : > { %v10202_v23 = vpack.c.bf16 %v8833_v39, %v8833_v39  ;;  %v8834_v24 = vmax.f32 %v8739_v20, 0.0  ;;  %v15327_v49 = vadd.f32 %v4056_v45, %v14917_v41  ;;  %v11085_v10 = vpop.f32.mrb[106].mxu1  ;;  %v11530_v43 = vpop.f32.mrb[48].mxu0 }
 0x3ee   : > { %9312 = vst.msk [vmem:[%s15144_s18 + $0xb8] sm:$0xf] %vm9265_vm9, %v10204_v60  ;;  %v10205_v6 = vpack.c.bf16 %v8836_v9, %v8836_v9  ;;  %v4059_v34 = vpop.f32.mrb[107].mxu1  ;;  %v8402_v37 = vpop.f32.mrb[49].mxu0 }
 0x3ef   : > { %9310 = vst.msk [vmem:[%s15144_s18 + $0xb0] sm:$0xf] %vm9265_vm9, %v10202_v23  ;;  %v10203_v61 = vpack.c.bf16 %v8834_v24, %v8834_v24  ;;  %v15334_v8 = vadd.f32 %v4059_v34, %v14924_v13  ;;  %v11531_v11 = vpop.f32.mrb[50].mxu0 }
 0x3f0   : > { %9313 = vst.msk [vmem:[%s15144_s18 + $0xbc] sm:$0xf] %vm9265_vm9, %v10205_v6  ;;  %v8405_v35 = vpop.f32.mrb[51].mxu0 }
 0x3f1   : > { %9311 = vst.msk [vmem:[%s15144_s18 + $0xb4] sm:$0xf] %vm9265_vm9, %v10203_v61 }
 0x3f3   : > { %v11138_v41 = vpop.f32.mrb[48].mxu1 }
 0x3f4   : > { %v11626_v2 = vadd.f32 %v11530_v43, %v11138_v41  ;;  %v4640_v3 = vpop.f32.mrb[49].mxu1 }
 0x3f5   : > { %v11627_v50 = vadd.f32 %v8402_v37, %v4640_v3  ;;  %v11139_v40 = vpop.f32.mrb[50].mxu1  ;;  %v11534_v63 = vpop.f32.mrb[52].mxu0 }
 0x3f6   : > { %v8744_v29 = vadd.f32 %v11626_v2, %v15129_v55  ;;  %v11628_v48 = vadd.f32 %v11531_v11, %v11139_v40  ;;  %v4643_v19 = vpop.f32.mrb[51].mxu1  ;;  %v8418_v59 = vpop.f32.mrb[53].mxu0 }
 0x3f7   : > { %v8742_v13 = vadd.f32 %v11627_v50, %v15129_v55  ;;  %v11629_v27 = vadd.f32 %v8405_v35, %v4643_v19  ;;  %v11535_v47 = vpop.f32.mrb[54].mxu0 }
 0x3f8   : > { %v8839_v17 = vmax.f32 %v8744_v29, 0.0  ;;  %v8745_v57 = vadd.f32 %v11628_v48, %v15129_v55  ;;  %v8421_v18 = vpop.f32.mrb[55].mxu0 }
 0x3f9   : > { %v8837_v25 = vmax.f32 %v8742_v13, 0.0  ;;  %v8743_v56 = vadd.f32 %v11629_v27, %v15129_v55 }
 0x3fa   : > { %v10208_v36 = vpack.c.bf16 %v8839_v17, %v8839_v17  ;;  %v8840_v30 = vmax.f32 %v8745_v57, 0.0 }
 0x3fb   : > { %v10206_v14 = vpack.c.bf16 %v8837_v25, %v8837_v25  ;;  %v8838_v26 = vmax.f32 %v8743_v56, 0.0  ;;  %v11142_v7 = vpop.f32.mrb[52].mxu1 }
 0x3fc   : > { %9316 = vst.msk [vmem:[%s15144_s18 + $0xc8] sm:$0xf] %vm9265_vm9, %v10208_v36  ;;  %v10209_v33 = vpack.c.bf16 %v8840_v30, %v8840_v30  ;;  %v11630_v53 = vadd.f32 %v11534_v63, %v11142_v7  ;;  %v4656_v21 = vpop.f32.mrb[53].mxu1 }
 0x3fd   : > { %9314 = vst.msk [vmem:[%s15144_s18 + $0xc0] sm:$0xf] %vm9265_vm9, %v10206_v14  ;;  %v10207_v42 = vpack.c.bf16 %v8838_v26, %v8838_v26  ;;  %v11631_v51 = vadd.f32 %v8418_v59, %v4656_v21  ;;  %v11143_v22 = vpop.f32.mrb[54].mxu1  ;;  %v11538_v52 = vpop.f32.mrb[56].mxu0 }
 0x3fe   : > { %9317 = vst.msk [vmem:[%s15144_s18 + $0xcc] sm:$0xf] %vm9265_vm9, %v10209_v33  ;;  %v8748_v31 = vadd.f32 %v11630_v53, %v15129_v55  ;;  %v11632_v5 = vadd.f32 %v11535_v47, %v11143_v22  ;;  %v4659_v32 = vpop.f32.mrb[55].mxu1  ;;  %v8434_v38 = vpop.f32.mrb[57].mxu0 }
 0x3ff   : > { %9315 = vst.msk [vmem:[%s15144_s18 + $0xc4] sm:$0xf] %vm9265_vm9, %v10207_v42  ;;  %v8746_v0 = vadd.f32 %v11631_v51, %v15129_v55  ;;  %v11633_v44 = vadd.f32 %v8421_v18, %v4659_v32  ;;  %v11539_v58 = vpop.f32.mrb[58].mxu0 }
 0x400   : > { %v8843_v16 = vmax.f32 %v8748_v31, 0.0  ;;  %v8749_v46 = vadd.f32 %v11632_v5, %v15129_v55  ;;  %v8437_v62 = vpop.f32.mrb[59].mxu0 }
 0x401   : > { %v8841_v15 = vmax.f32 %v8746_v0, 0.0  ;;  %v8747_v28 = vadd.f32 %v11633_v44, %v15129_v55 }
 0x402   : > { %v10212_v12 = vpack.c.bf16 %v8843_v16, %v8843_v16  ;;  %v8844_v4 = vmax.f32 %v8749_v46, 0.0 }
 0x403   : > { %v10210_v39 = vpack.c.bf16 %v8841_v15, %v8841_v15  ;;  %v8842_v20 = vmax.f32 %v8747_v28, 0.0  ;;  %v11146_v54 = vpop.f32.mrb[56].mxu1 }
 0x404   : > { %9320 = vst.msk [vmem:[%s15144_s18 + $0xd8] sm:$0xf] %vm9265_vm9, %v10212_v12  ;;  %v10213_v60 = vpack.c.bf16 %v8844_v4, %v8844_v4  ;;  %v11634_v9 = vadd.f32 %v11538_v52, %v11146_v54  ;;  %v4672_v45 = vpop.f32.mrb[57].mxu1 }
 0x405   : > { %9318 = vst.msk [vmem:[%s15144_s18 + $0xd0] sm:$0xf] %vm9265_vm9, %v10210_v39  ;;  %v10211_v23 = vpack.c.bf16 %v8842_v20, %v8842_v20  ;;  %v11635_v24 = vadd.f32 %v8434_v38, %v4672_v45  ;;  %v11147_v10 = vpop.f32.mrb[58].mxu1  ;;  %v11542_v43 = vpop.f32.mrb[60].mxu0 }
 0x406   : > { %9321 = vst.msk [vmem:[%s15144_s18 + $0xdc] sm:$0xf] %vm9265_vm9, %v10213_v60  ;;  %v8752_v6 = vadd.f32 %v11634_v9, %v15129_v55  ;;  %v11636_v34 = vadd.f32 %v11539_v58, %v11147_v10  ;;  %v4675_v37 = vpop.f32.mrb[59].mxu1  ;;  %v8450_v61 = vpop.f32.mrb[61].mxu0 }
 0x407   : > { %9319 = vst.msk [vmem:[%s15144_s18 + $0xd4] sm:$0xf] %vm9265_vm9, %v10211_v23  ;;  %v8750_v11 = vadd.f32 %v11635_v24, %v15129_v55  ;;  %v11637_v35 = vadd.f32 %v8437_v62, %v4675_v37  ;;  %v11543_v41 = vpop.f32.mrb[62].mxu0 }
 0x408   : > { %v8847_v2 = vmax.f32 %v8752_v6, 0.0  ;;  %v8753_v3 = vadd.f32 %v11636_v34, %v15129_v55  ;;  %v8453_v50 = vpop.f32.mrb[63].mxu0 }
 0x409   : > { %v8845_v40 = vmax.f32 %v8750_v11, 0.0  ;;  %v8751_v63 = vadd.f32 %v11637_v35, %v15129_v55 }
 0x40a   : > { %v10216_v29 = vpack.c.bf16 %v8847_v2, %v8847_v2  ;;  %v8848_v48 = vmax.f32 %v8753_v3, 0.0 }
 0x40b   : > { %v10214_v19 = vpack.c.bf16 %v8845_v40, %v8845_v40  ;;  %v8846_v59 = vmax.f32 %v8751_v63, 0.0  ;;  %v11150_v13 = vpop.f32.mrb[60].mxu1 }
 0x40c   : > { %9324 = vst.msk [vmem:[%s15144_s18 + $0xe8] sm:$0xf] %vm9265_vm9, %v10216_v29  ;;  %v10217_v27 = vpack.c.bf16 %v8848_v48, %v8848_v48  ;;  %v11638_v47 = vadd.f32 %v11542_v43, %v11150_v13  ;;  %v4688_v17 = vpop.f32.mrb[61].mxu1 }
 0x40d   : > { %9322 = vst.msk [vmem:[%s15144_s18 + $0xe0] sm:$0xf] %vm9265_vm9, %v10214_v19  ;;  %v10215_v57 = vpack.c.bf16 %v8846_v59, %v8846_v59  ;;  %v11639_v18 = vadd.f32 %v8450_v61, %v4688_v17  ;;  %v11151_v25 = vpop.f32.mrb[62].mxu1  ;;  %v11546_v56 = vpop.f32.mrb[64].mxu0 }
 0x40e   : > { %9325 = vst.msk [vmem:[%s15144_s18 + $0xec] sm:$0xf] %vm9265_vm9, %v10217_v27  ;;  %v8756_v36 = vadd.f32 %v11638_v47, %v15129_v55  ;;  %v11640_v30 = vadd.f32 %v11543_v41, %v11151_v25  ;;  %v4691_v14 = vpop.f32.mrb[63].mxu1  ;;  %v8466_v26 = vpop.f32.mrb[65].mxu0 }
 0x40f   : > { %9323 = vst.msk [vmem:[%s15144_s18 + $0xe4] sm:$0xf] %vm9265_vm9, %v10215_v57  ;;  %v8754_v7 = vadd.f32 %v11639_v18, %v15129_v55  ;;  %v11641_v33 = vadd.f32 %v8453_v50, %v4691_v14  ;;  %v11547_v53 = vpop.f32.mrb[66].mxu0 }
 0x410   : > { %v8851_v21 = vmax.f32 %v8756_v36, 0.0  ;;  %v8757_v42 = vadd.f32 %v11640_v30, %v15129_v55  ;;  %v8469_v51 = vpop.f32.mrb[67].mxu0 }
 0x411   : > { %v8849_v22 = vmax.f32 %v8754_v7, 0.0  ;;  %v8755_v52 = vadd.f32 %v11641_v33, %v15129_v55 }
 0x412   : > { %v10220_v31 = vpack.c.bf16 %v8851_v21, %v8851_v21  ;;  %v8852_v5 = vmax.f32 %v8757_v42, 0.0 }
 0x413   : > { %v10218_v32 = vpack.c.bf16 %v8849_v22, %v8849_v22  ;;  %v8850_v38 = vmax.f32 %v8755_v52, 0.0  ;;  %v11154_v0 = vpop.f32.mrb[64].mxu1 }
 0x414   : > { %9328 = vst.msk [vmem:[%s15144_s18 + $0xf8] sm:$0xf] %vm9265_vm9, %v10220_v31  ;;  %v10221_v44 = vpack.c.bf16 %v8852_v5, %v8852_v5  ;;  %v11642_v58 = vadd.f32 %v11546_v56, %v11154_v0  ;;  %v4704_v16 = vpop.f32.mrb[65].mxu1 }
 0x415   : > { %9326 = vst.msk [vmem:[%s15144_s18 + $0xf0] sm:$0xf] %vm9265_vm9, %v10218_v32  ;;  %v10219_v46 = vpack.c.bf16 %v8850_v38, %v8850_v38  ;;  %v11643_v62 = vadd.f32 %v8466_v26, %v4704_v16  ;;  %v11155_v15 = vpop.f32.mrb[66].mxu1  ;;  %v11550_v28 = vpop.f32.mrb[68].mxu0 }
 0x416   : > { %9329 = vst.msk [vmem:[%s15144_s18 + $0xfc] sm:$0xf] %vm9265_vm9, %v10221_v44  ;;  %v8760_v12 = vadd.f32 %v11642_v58, %v15129_v55  ;;  %v11644_v4 = vadd.f32 %v11547_v53, %v11155_v15  ;;  %v4707_v39 = vpop.f32.mrb[67].mxu1  ;;  %v8482_v20 = vpop.f32.mrb[69].mxu0 }
 0x417   : > { %9327 = vst.msk [vmem:[%s15144_s18 + $0xf4] sm:$0xf] %vm9265_vm9, %v10219_v46  ;;  %v8758_v54 = vadd.f32 %v11643_v62, %v15129_v55  ;;  %v11645_v60 = vadd.f32 %v8469_v51, %v4707_v39  ;;  %v11551_v9 = vpop.f32.mrb[70].mxu0 }
 0x418   : > { %v8855_v45 = vmax.f32 %v8760_v12, 0.0  ;;  %v8761_v23 = vadd.f32 %v11644_v4, %v15129_v55  ;;  %v8485_v24 = vpop.f32.mrb[71].mxu0 }
 0x419   : > { %v8853_v10 = vmax.f32 %v8758_v54, 0.0  ;;  %v8759_v43 = vadd.f32 %v11645_v60, %v15129_v55 }
 0x41a   : > { %v10224_v6 = vpack.c.bf16 %v8855_v45, %v8855_v45  ;;  %v8856_v34 = vmax.f32 %v8761_v23, 0.0 }
 0x41b   : > { %v10222_v37 = vpack.c.bf16 %v8853_v10, %v8853_v10  ;;  %v8854_v61 = vmax.f32 %v8759_v43, 0.0  ;;  %v11158_v11 = vpop.f32.mrb[68].mxu1 }
 0x41c   : > { %9332 = vst.msk [vmem:[%s15144_s18 + $0x108] sm:$0xf] %vm9265_vm9, %v10224_v6  ;;  %v10225_v35 = vpack.c.bf16 %v8856_v34, %v8856_v34  ;;  %v11646_v41 = vadd.f32 %v11550_v28, %v11158_v11  ;;  %v4720_v2 = vpop.f32.mrb[69].mxu1 }
 0x41d   : > { %9330 = vst.msk [vmem:[%s15144_s18 + $0x100] sm:$0xf] %vm9265_vm9, %v10222_v37  ;;  %v10223_v3 = vpack.c.bf16 %v8854_v61, %v8854_v61  ;;  %v11647_v50 = vadd.f32 %v8482_v20, %v4720_v2  ;;  %v11159_v40 = vpop.f32.mrb[70].mxu1  ;;  %v11554_v63 = vpop.f32.mrb[72].mxu0 }
 0x41e   : > { %9333 = vst.msk [vmem:[%s15144_s18 + $0x10c] sm:$0xf] %vm9265_vm9, %v10225_v35  ;;  %v8764_v29 = vadd.f32 %v11646_v41, %v15129_v55  ;;  %v11648_v48 = vadd.f32 %v11551_v9, %v11159_v40  ;;  %v4723_v19 = vpop.f32.mrb[71].mxu1  ;;  %v8498_v59 = vpop.f32.mrb[73].mxu0 }
 0x41f   : > { %9331 = vst.msk [vmem:[%s15144_s18 + $0x104] sm:$0xf] %vm9265_vm9, %v10223_v3  ;;  %v8762_v13 = vadd.f32 %v11647_v50, %v15129_v55  ;;  %v11649_v27 = vadd.f32 %v8485_v24, %v4723_v19  ;;  %v11555_v47 = vpop.f32.mrb[74].mxu0  ;;  %v15429_v3 = vld [vmem:[%s15503_s2] ss:$0 sm:$0xff] }
 0x420   : > { %v8859_v17 = vmax.f32 %v8764_v29, 0.0  ;;  %v8765_v57 = vadd.f32 %v11648_v48, %v15129_v55  ;;  %v8501_v18 = vpop.f32.mrb[75].mxu0 }
 0x421   : > { %v8857_v25 = vmax.f32 %v8762_v13, 0.0  ;;  %v8763_v56 = vadd.f32 %v11649_v27, %v15129_v55 }
 0x422   : > { %v10228_v36 = vpack.c.bf16 %v8859_v17, %v8859_v17  ;;  %v8860_v30 = vmax.f32 %v8765_v57, 0.0 }
 0x423   : > { %v10226_v14 = vpack.c.bf16 %v8857_v25, %v8857_v25  ;;  %v8858_v26 = vmax.f32 %v8763_v56, 0.0  ;;  %v11162_v7 = vpop.f32.mrb[72].mxu1 }
 0x424   : > { %9336 = vst.msk [vmem:[%s15144_s18 + $0x118] sm:$0xf] %vm9265_vm9, %v10228_v36  ;;  %v10229_v33 = vpack.c.bf16 %v8860_v30, %v8860_v30  ;;  %v11650_v53 = vadd.f32 %v11554_v63, %v11162_v7  ;;  %v4736_v21 = vpop.f32.mrb[73].mxu1 }
 0x425   : > { %9334 = vst.msk [vmem:[%s15144_s18 + $0x110] sm:$0xf] %vm9265_vm9, %v10226_v14  ;;  %v10227_v42 = vpack.c.bf16 %v8858_v26, %v8858_v26  ;;  %v11651_v51 = vadd.f32 %v8498_v59, %v4736_v21  ;;  %v11163_v22 = vpop.f32.mrb[74].mxu1  ;;  %v11558_v52 = vpop.f32.mrb[76].mxu0 }
 0x426   : > { %9337 = vst.msk [vmem:[%s15144_s18 + $0x11c] sm:$0xf] %vm9265_vm9, %v10229_v33  ;;  %v8768_v31 = vadd.f32 %v11650_v53, %v15129_v55  ;;  %v11652_v5 = vadd.f32 %v11555_v47, %v11163_v22  ;;  %v4739_v32 = vpop.f32.mrb[75].mxu1  ;;  %v8514_v38 = vpop.f32.mrb[77].mxu0 }
 0x427   : > { %9335 = vst.msk [vmem:[%s15144_s18 + $0x114] sm:$0xf] %vm9265_vm9, %v10227_v42  ;;  %v8766_v0 = vadd.f32 %v11651_v51, %v15129_v55  ;;  %v11653_v44 = vadd.f32 %v8501_v18, %v4739_v32  ;;  %v11559_v58 = vpop.f32.mrb[78].mxu0 }
 0x428   : > { %v8863_v16 = vmax.f32 %v8768_v31, 0.0  ;;  %v8769_v46 = vadd.f32 %v11652_v5, %v15129_v55  ;;  %v8517_v62 = vpop.f32.mrb[79].mxu0 }
 0x429   : > { %v8861_v15 = vmax.f32 %v8766_v0, 0.0  ;;  %v8767_v28 = vadd.f32 %v11653_v44, %v15129_v55 }
 0x42a   : > { %v10232_v12 = vpack.c.bf16 %v8863_v16, %v8863_v16  ;;  %v8864_v4 = vmax.f32 %v8769_v46, 0.0 }
 0x42b   : > { %v10230_v39 = vpack.c.bf16 %v8861_v15, %v8861_v15  ;;  %v8862_v20 = vmax.f32 %v8767_v28, 0.0  ;;  %v11166_v54 = vpop.f32.mrb[76].mxu1 }
 0x42c   : > { %9340 = vst.msk [vmem:[%s15144_s18 + $0x128] sm:$0xf] %vm9265_vm9, %v10232_v12  ;;  %v10233_v60 = vpack.c.bf16 %v8864_v4, %v8864_v4  ;;  %v11654_v9 = vadd.f32 %v11558_v52, %v11166_v54  ;;  %v4752_v45 = vpop.f32.mrb[77].mxu1 }
 0x42d   : > { %9338 = vst.msk [vmem:[%s15144_s18 + $0x120] sm:$0xf] %vm9265_vm9, %v10230_v39  ;;  %v10231_v23 = vpack.c.bf16 %v8862_v20, %v8862_v20  ;;  %v11655_v24 = vadd.f32 %v8514_v38, %v4752_v45  ;;  %v11167_v10 = vpop.f32.mrb[78].mxu1  ;;  %v11562_v43 = vpop.f32.mrb[80].mxu0 }
 0x42e   : > { %9341 = vst.msk [vmem:[%s15144_s18 + $0x12c] sm:$0xf] %vm9265_vm9, %v10233_v60  ;;  %v8772_v6 = vadd.f32 %v11654_v9, %v15129_v55  ;;  %v11656_v34 = vadd.f32 %v11559_v58, %v11167_v10  ;;  %v4755_v37 = vpop.f32.mrb[79].mxu1  ;;  %v8530_v61 = vpop.f32.mrb[81].mxu0 }
 0x42f   : > { %9339 = vst.msk [vmem:[%s15144_s18 + $0x124] sm:$0xf] %vm9265_vm9, %v10231_v23  ;;  %v8770_v11 = vadd.f32 %v11655_v24, %v15129_v55  ;;  %v11657_v35 = vadd.f32 %v8517_v62, %v4755_v37  ;;  %v11563_v41 = vpop.f32.mrb[82].mxu0 }
 0x430   : > { %v8867_v2 = vmax.f32 %v8772_v6, 0.0  ;;  %v8773_v50 = vadd.f32 %v15429_v3, %v11656_v34  ;;  %v8533_v40 = vpop.f32.mrb[83].mxu0 }
 0x431   : > { %v8865_v63 = vmax.f32 %v8770_v11, 0.0  ;;  %v8771_v29 = vadd.f32 %v15429_v3, %v11657_v35 }
 0x432   : > { %v10236_v48 = vpack.c.bf16 %v8867_v2, %v8867_v2  ;;  %v8868_v19 = vmax.f32 %v8773_v50, 0.0 }
 0x433   : > { %v10234_v59 = vpack.c.bf16 %v8865_v63, %v8865_v63  ;;  %v8866_v55 = vmax.f32 %v8771_v29, 0.0  ;;  %v11170_v13 = vpop.f32.mrb[80].mxu1 }
 0x434   : > { %9344 = vst.msk [vmem:[%s15144_s18 + $0x138] sm:$0xf] %vm9265_vm9, %v10236_v48  ;;  %v10237_v27 = vpack.c.bf16 %v8868_v19, %v8868_v19  ;;  %v11658_v47 = vadd.f32 %v11562_v43, %v11170_v13  ;;  %v4768_v17 = vpop.f32.mrb[81].mxu1 }
 0x435   : > { %9342 = vst.msk [vmem:[%s15144_s18 + $0x130] sm:$0xf] %vm9265_vm9, %v10234_v59  ;;  %v10235_v57 = vpack.c.bf16 %v8866_v55, %v8866_v55  ;;  %v11659_v18 = vadd.f32 %v8530_v61, %v4768_v17  ;;  %v11171_v25 = vpop.f32.mrb[82].mxu1  ;;  %v11566_v56 = vpop.f32.mrb[84].mxu0 }
 0x436   : > { %9345 = vst.msk [vmem:[%s15144_s18 + $0x13c] sm:$0xf] %vm9265_vm9, %v10237_v27  ;;  %v8776_v36 = vadd.f32 %v15429_v3, %v11658_v47  ;;  %v11660_v30 = vadd.f32 %v11563_v41, %v11171_v25  ;;  %v4771_v14 = vpop.f32.mrb[83].mxu1  ;;  %v8546_v26 = vpop.f32.mrb[85].mxu0 }
 0x437   : > { %9343 = vst.msk [vmem:[%s15144_s18 + $0x134] sm:$0xf] %vm9265_vm9, %v10235_v57  ;;  %v8774_v7 = vadd.f32 %v15429_v3, %v11659_v18  ;;  %v11661_v33 = vadd.f32 %v8533_v40, %v4771_v14  ;;  %v11567_v53 = vpop.f32.mrb[86].mxu0 }
 0x438   : > { %v8871_v21 = vmax.f32 %v8776_v36, 0.0  ;;  %v8777_v42 = vadd.f32 %v15429_v3, %v11660_v30  ;;  %v8549_v51 = vpop.f32.mrb[87].mxu0 }
 0x439   : > { %v8869_v22 = vmax.f32 %v8774_v7, 0.0  ;;  %v8775_v52 = vadd.f32 %v15429_v3, %v11661_v33 }
 0x43a   : > { %v10240_v31 = vpack.c.bf16 %v8871_v21, %v8871_v21  ;;  %v8872_v5 = vmax.f32 %v8777_v42, 0.0 }
 0x43b   : > { %v10238_v32 = vpack.c.bf16 %v8869_v22, %v8869_v22  ;;  %v8870_v38 = vmax.f32 %v8775_v52, 0.0  ;;  %v11174_v0 = vpop.f32.mrb[84].mxu1  ;;  %v15976_v52 = vld [vmem:[#allocation74_spill] sm:$0xff] }
 0x43c   : > { %9348 = vst.msk [vmem:[%s15144_s18 + $0x148] sm:$0xf] %vm9265_vm9, %v10240_v31  ;;  %v10241_v44 = vpack.c.bf16 %v8872_v5, %v8872_v5  ;;  %v11662_v58 = vadd.f32 %v11566_v56, %v11174_v0  ;;  %v4784_v16 = vpop.f32.mrb[85].mxu1 }
 0x43d   : > { %9346 = vst.msk [vmem:[%s15144_s18 + $0x140] sm:$0xf] %vm9265_vm9, %v10238_v32  ;;  %v10239_v46 = vpack.c.bf16 %v8870_v38, %v8870_v38  ;;  %v11663_v62 = vadd.f32 %v8546_v26, %v4784_v16  ;;  %v11175_v15 = vpop.f32.mrb[86].mxu1  ;;  %v11570_v28 = vpop.f32.mrb[88].mxu0  ;;  %v15977_v32 = vld [vmem:[#allocation75_spill] sm:$0xff] }
 0x43e   : > { %9349 = vst.msk [vmem:[%s15144_s18 + $0x14c] sm:$0xf] %vm9265_vm9, %v10241_v44  ;;  %v8780_v12 = vadd.f32 %v15429_v3, %v11662_v58  ;;  %v11664_v4 = vadd.f32 %v11567_v53, %v11175_v15  ;;  %v4787_v39 = vpop.f32.mrb[87].mxu1  ;;  %v8562_v20 = vpop.f32.mrb[89].mxu0  ;;  %v15978_v44 = vld [vmem:[#allocation54_spill] sm:$0xff]  ;;  %v15979_v58 = vld [vmem:[#allocation76_spill] sm:$0xff] }
 0x43f   : > { %9347 = vst.msk [vmem:[%s15144_s18 + $0x144] sm:$0xf] %vm9265_vm9, %v10239_v46  ;;  %v8778_v54 = vadd.f32 %v15429_v3, %v11663_v62  ;;  %v11665_v60 = vadd.f32 %v8549_v51, %v4787_v39  ;;  %v11571_v9 = vpop.f32.mrb[90].mxu0  ;;  %v15980_v46 = vld [vmem:[#allocation56_spill] sm:$0xff]  ;;  %v15981_v15 = vld [vmem:[#allocation53_spill] sm:$0xff] }
 0x440   : > { %v8875_v45 = vmax.f32 %v8780_v12, 0.0  ;;  %v8781_v23 = vadd.f32 %v15429_v3, %v11664_v4  ;;  %v8565_v24 = vpop.f32.mrb[91].mxu0  ;;  %v15983_v4 = vld [vmem:[#allocation52_spill] sm:$0xff] }
 0x441   : > { %v8873_v10 = vmax.f32 %v8778_v54, 0.0  ;;  %v8779_v43 = vadd.f32 %v15429_v3, %v11665_v60  ;;  %v15984_v60 = vld [vmem:[#allocation60_spill] sm:$0xff] }
 0x442   : > { %v10244_v6 = vpack.c.bf16 %v8875_v45, %v8875_v45  ;;  %v8876_v34 = vmax.f32 %v8781_v23, 0.0 }
 0x443   : > { %v10242_v37 = vpack.c.bf16 %v8873_v10, %v8873_v10  ;;  %v8874_v61 = vmax.f32 %v8779_v43, 0.0  ;;  %v11178_v11 = vpop.f32.mrb[88].mxu1 }
 0x444   : > { %9352 = vst.msk [vmem:[%s15144_s18 + $0x158] sm:$0xf] %vm9265_vm9, %v10244_v6  ;;  %v10245_v35 = vpack.c.bf16 %v8876_v34, %v8876_v34  ;;  %v11666_v41 = vadd.f32 %v11570_v28, %v11178_v11  ;;  %v4800_v2 = vpop.f32.mrb[89].mxu1  ;;  %v15982_v28 = vld [vmem:[#allocation58_spill] sm:$0xff] }
 0x445   : > { %9350 = vst.msk [vmem:[%s15144_s18 + $0x150] sm:$0xf] %vm9265_vm9, %v10242_v37  ;;  %v10243_v50 = vpack.c.bf16 %v8874_v61, %v8874_v61  ;;  %v11667_v40 = vadd.f32 %v8562_v20, %v4800_v2  ;;  %v11179_v63 = vpop.f32.mrb[90].mxu1  ;;  %v11574_v29 = vpop.f32.mrb[104].mxu0 }
 0x446   : > { %9353 = vst.msk [vmem:[%s15144_s18 + $0x15c] sm:$0xf] %vm9265_vm9, %v10245_v35  ;;  %v8784_v48 = vadd.f32 %v15429_v3, %v11666_v41  ;;  %v11668_v19 = vadd.f32 %v11571_v9, %v11179_v63  ;;  %v4803_v59 = vpop.f32.mrb[91].mxu1  ;;  %v8578_v55 = vpop.f32.mrb[105].mxu0 }
 0x447   : > { %9351 = vst.msk [vmem:[%s15144_s18 + $0x154] sm:$0xf] %vm9265_vm9, %v10243_v50  ;;  %v8782_v13 = vadd.f32 %v15429_v3, %v11667_v40  ;;  %v11669_v27 = vadd.f32 %v8565_v24, %v4803_v59  ;;  %v11575_v47 = vpop.f32.mrb[106].mxu0 }
 0x448   : > { %v8879_v17 = vmax.f32 %v8784_v48, 0.0  ;;  %v8785_v57 = vadd.f32 %v15429_v3, %v11668_v19  ;;  %v8581_v18 = vpop.f32.mrb[107].mxu0 }
 0x449   : > { %v8877_v25 = vmax.f32 %v8782_v13, 0.0  ;;  %v8783_v56 = vadd.f32 %v15429_v3, %v11669_v27 }
 0x44a   : > { %v10248_v36 = vpack.c.bf16 %v8879_v17, %v8879_v17  ;;  %v8880_v30 = vmax.f32 %v8785_v57, 0.0 }
 0x44b   : > { %v10246_v14 = vpack.c.bf16 %v8877_v25, %v8877_v25  ;;  %v8878_v26 = vmax.f32 %v8783_v56, 0.0  ;;  %v11182_v7 = vpop.f32.mrb[108].mxu1 }
 0x44c   : > { %9356 = vst.msk [vmem:[%s15144_s18 + $0x168] sm:$0xf] %vm9265_vm9, %v10248_v36  ;;  %v10249_v33 = vpack.c.bf16 %v8880_v30, %v8880_v30  ;;  %v4924_v53 = vadd.f32 %v11182_v7, %v15324_v1  ;;  %v4816_v21 = vpop.f32.mrb[109].mxu1 }
 0x44d   : > { %9354 = vst.msk [vmem:[%s15144_s18 + $0x160] sm:$0xf] %vm9265_vm9, %v10246_v14  ;;  %v10247_v42 = vpack.c.bf16 %v8878_v26, %v8878_v26  ;;  %v4922_v51 = vadd.f32 %v4816_v21, %v15327_v49  ;;  %v11183_v22 = vpop.f32.mrb[110].mxu1 }
 0x44e   : > { %9357 = vst.msk [vmem:[%s15144_s18 + $0x16c] sm:$0xf] %vm9265_vm9, %v10249_v33  ;;  %v5790_v31 = vadd.f32 %v15976_v52, %v4924_v53  ;;  %v4819_v5 = vpop.f32.mrb[111].mxu1 }
 0x44f   : > { %9355 = vst.msk [vmem:[%s15144_s18 + $0x164] sm:$0xf] %vm9265_vm9, %v10247_v42  ;;  %v5788_v38 = vadd.f32 %v15977_v32, %v4922_v51  ;;  %v4923_v0 = vadd.f32 %v4819_v5, %v15334_v8 }
 0x450   : > { %v6882_v1 = vadd.f32 %v15978_v44, %v5790_v31 }
 0x451   : > { %v5789_v16 = vadd.f32 %v15979_v58, %v4923_v0  ;;  %v6880_v62 = vadd.f32 %v15980_v46, %v5788_v38 }
 0x452   : > { %v7978_v49 = vadd.f32 %v15981_v15, %v6882_v1 }
 0x453   : > { %v7976_v12 = vadd.f32 %v15982_v28, %v6880_v62  ;;  %v6881_v39 = vadd.f32 %v15983_v4, %v5789_v16 }
 0x454   : > { %v8686_v20 = vadd.f32 %v11574_v29, %v7978_v49 }
 0x455   : > { %v8684_v54 = vadd.f32 %v8578_v55, %v7976_v12  ;;  %v7977_v9 = vadd.f32 %v15984_v60, %v6881_v39 }
 0x456   : > { %v8788_v8 = vadd.f32 %v15429_v3, %v8686_v20 }
 0x457   : > { %v8786_v45 = vadd.f32 %v15429_v3, %v8684_v54  ;;  %v8685_v23 = vadd.f32 %v8581_v18, %v7977_v9 }
 0x458   : > { %v8883_v24 = vmax.f32 %v8788_v8, 0.0 }
 0x459   : > { %v8881_v10 = vmax.f32 %v8786_v45, 0.0  ;;  %v8787_v43 = vadd.f32 %v15429_v3, %v8685_v23 }
 0x45a   : > { %v10252_v6 = vpack.c.bf16 %v8883_v24, %v8883_v24 }
 0x45b   : > { %v10250_v34 = vpack.c.bf16 %v8881_v10, %v8881_v10  ;;  %v8882_v37 = vmax.f32 %v8787_v43, 0.0 }
 0x45c   : > { %9360 = vst.msk [vmem:[%s15144_s18 + $0x178] sm:$0xf] %vm9265_vm9, %v10252_v6 }
 0x45d   : > { %9358 = vst.msk [vmem:[%s15144_s18 + $0x170] sm:$0xf] %vm9265_vm9, %v10250_v34  ;;  %v10251_v61 = vpack.c.bf16 %v8882_v37, %v8882_v37 }
 0x45f   : > { %9359 = vst.msk [vmem:[%s15144_s18 + $0x174] sm:$0xf] %vm9265_vm9, %v10251_v61 }
 0x460 PF: > { %s13_s12 = sadd.s32 1, %s12702_s12  }
 0x461   : > { %p10_p4 = scmp.ge.s32.totalorder %s13_s12, 4  }
 0x463   :  { %12 = sbr.rel (!%p10_p4) target bundleno = 1 (0x1), region = 70 }

</bundles_post_ra>
